<compile_context>
chip_gen: v6e
topology: v6e:2x2x1
jax: 0.10.0
libtpu: 0.0.40
codegen_flags: <defaults>
</compile_context>

<pallas_src>
import functools

import jax
import jax.numpy as jnp
from jax import lax
from jax.experimental import pallas as pl
from jax.experimental.pallas import tpu as pltpu


def _round_up(v, m):
    return ((v + m - 1) // m) * m


def _dncnn_fused_kernel(x_ref, wf_ref, wm_ref, wl_ref, sm_ref, bm_ref,
                        mask_ref, out_ref, act_a, act_b, slab, *,
                        channels, cin_pad, f_pad, n_mid, width, margin, lanes):
    # x_ref    : (1, cin_pad, lanes) f32   packed flat-padded input images
    # wf_ref   : (f_pad, 9*cin_pad)  bf16  first-layer weights
    # wm_ref   : (n_mid, f_pad, 9*f_pad) bf16  middle-layer weights
    # wl_ref   : (co_pad, 9*f_pad)   bf16  last-layer weights
    # sm/bm    : (n_mid, f_pad, 1)   f32   folded-BN scale / bias (middle only)
    # mask_ref : (1, lanes)          f32   1.0 at interior pixels
    # out_ref  : (1, channels, lanes) f32  residual output (packed layout)
    # act_a/b  : (f_pad, margin+lanes+margin) bf16  ping-pong activations
    # slab     : (9*f_pad, lanes)    bf16  im2col slab
    wp = width + 2

    # One-time hygiene zeroing of the persistent scratch (margins never get
    # written again).  Correctness does not depend on it: un-initialized data
    # can only reach halo/gap output lanes that the host-side crop discards.
    @pl.when(pl.program_id(0) == 0)
    def _():
        act_a[...] = jnp.zeros_like(act_a)
        act_b[...] = jnp.zeros_like(act_b)

    # Stage the packed input into the lane-margined activation buffer.
    # Single f32->bf16 cast; the 9 tap copies below move bf16 without casting.
    act_a[0:cin_pad, margin:margin + lanes] = x_ref[0].astype(jnp.bfloat16)

    valid = mask_ref[...] > 0.5          # (1, lanes) interior-pixel mask

    taps = [(dy, dx) for dy in range(3) for dx in range(3)]

    def im2col(src, rows):
        # 9 lane-shifted contiguous bf16 slices of the padded activations.
        # Offsets are static Python ints; interior outputs only ever read
        # their own image's P-region, so the zero halo rows/cols inside it
        # provide the conv's zero padding.
        for t, (dy, dx) in enumerate(taps):
            off = margin + (dy - 1) * wp + (dx - 1)
            slab[t * rows:(t + 1) * rows, :] = src[0:rows, off:off + lanes]

    def epilogue(y, dst):
        y = jnp.maximum(y, 0.0)
        # Halo / inter-image gap lanes become exact zeros: they are the next
        # layer's zero padding.
        y = jnp.where(valid, y, 0.0)
        dst[:, margin:margin + lanes] = y.astype(jnp.bfloat16)

    # ---- layer 0: conv(channels -> features) + ReLU (no BatchNorm) ---------
    im2col(act_a, cin_pad)
    y = jnp.dot(wf_ref[...], slab[0:9 * cin_pad, :],
                preferred_element_type=jnp.float32)
    epilogue(y, act_b)

    # ---- middle layers: conv + folded-BN affine + ReLU ----------------------
    bufs = (act_a, act_b)
    for m in range(n_mid):
        src = bufs[(m + 1) % 2]
        dst = bufs[m % 2]
        im2col(src, f_pad)
        y = jnp.dot(wm_ref[m], slab[...], preferred_element_type=jnp.float32)
        y = y * sm_ref[m] + bm_ref[m]
        epilogue(y, dst)

    # ---- last layer: conv(features -> channels) + fused residual ------------
    src = bufs[(n_mid + 1) % 2]
    im2col(src, f_pad)
    y = jnp.dot(wl_ref[...], slab[...], preferred_element_type=jnp.float32)
    y = jnp.where(valid, y, 0.0)         # keep discarded output lanes clean
    out_ref[0] = x_ref[0][0:channels, :] - y[0:channels, :]


def _pack_conv_weight(w_oihw, cin_pad, cout_pad):
    """(Cout, Cin, 3, 3) OIHW -> (cout_pad, 9*cin_pad); column = tap*cin_pad+cin."""
    cout, cin, kh, kw = w_oihw.shape
    assert (kh, kw) == (3, 3)
    w = jnp.transpose(w_oihw, (0, 2, 3, 1))                      # (Cout,3,3,Cin)
    w = jnp.pad(w, ((0, cout_pad - cout), (0, 0), (0, 0), (0, cin_pad - cin)))
    return w.reshape(cout_pad, 9 * cin_pad)


def dncnn_forward(x_nchw, params, *, images_per_block=None):
    """x - dncnn(x); input/output NCHW, matching the PyTorch module (eval BN)."""
    n, c, h, w = x_nchw.shape
    hp, wp = h + 2, w + 2
    p = hp * wp
    num_layers = len(params)
    assert num_layers >= 3, "DnCNN needs first / middle / last conv layers"
    n_mid = num_layers - 2
    features = params[0]["w"].shape[0]

    # bf16 activations pack 2 rows per sublane -> keep the per-tap row blocks
    # multiples of 16 so all slab / activation writes stay sublane-aligned.
    cin_pad = _round_up(c, 16)
    f_pad = max(_round_up(features, 16), cin_pad)
    co_pad = _round_up(c, 8)             # last-layer output rows stay in f32

    # Lane-dense layout.
    pimg = _round_up(p, 128)             # per-image padded flat length
    margin = 128                         # lane margin for the +/-(wp+1) taps
    assert margin >= wp + 1, "image width too large for the fixed lane margin"

    if images_per_block is None:
        # Keep >=2 grid blocks when the batch splits evenly so both v7x
        # TensorCores get work; otherwise pack the whole batch into lanes.
        # (On single-TC v5e/v6e, images_per_block=n avoids the serial loop.)
        images_per_block = n // 2 if (n >= 2 and n % 2 == 0) else n
    assert n % images_per_block == 0
    num_blocks = n // images_per_block
    lanes = images_per_block * pimg      # multiple of 128

    # ---- pack input: (N,C,H,W) -> (num_blocks, cin_pad, lanes) f32 ----------
    xf = x_nchw.astype(jnp.float32)
    x_flat = jnp.pad(xf, ((0, 0), (0, 0), (1, 1), (1, 1))).reshape(n, c, p)
    x_flat = jnp.pad(x_flat, ((0, 0), (0, cin_pad - c), (0, pimg - p)))
    x_packed = (x_flat.reshape(num_blocks, images_per_block, cin_pad, pimg)
                .transpose(0, 2, 1, 3)
                .reshape(num_blocks, cin_pad, lanes))

    # ---- pack weights per layer group (first / middle / last) ---------------
    w_first = _pack_conv_weight(params[0]["w"], cin_pad, f_pad).astype(jnp.bfloat16)
    w_mid = jnp.stack([_pack_conv_weight(params[i]["w"], f_pad, f_pad)
                       for i in range(1, num_layers - 1)]).astype(jnp.bfloat16)
    w_last = _pack_conv_weight(params[-1]["w"], f_pad, co_pad).astype(jnp.bfloat16)

    # Folded-BN affine for the middle layers only (first/last convs have no
    # BN).  Padded rows use scale=1.0 / bias=0.0 so they stay exactly zero.
    s_mid = jnp.stack([
        jnp.pad(params[i]["scale"].astype(jnp.float32),
                (0, f_pad - params[i]["scale"].shape[0]), constant_values=1.0)
        for i in range(1, num_layers - 1)])[..., None]
    b_mid = jnp.stack([
        jnp.pad(params[i]["bias"].astype(jnp.float32),
                (0, f_pad - params[i]["bias"].shape[0]))
        for i in range(1, num_layers - 1)])[..., None]

    # ---- interior-pixel mask over the packed lane axis -----------------------
    idx = jnp.arange(pimg)
    hh, ww = idx // wp, idx % wp
    m_img = ((idx < p) & (hh >= 1) & (hh <= h) & (ww >= 1) & (ww <= w))
    mask = jnp.tile(m_img.astype(jnp.float32),
                    (images_per_block,)).reshape(1, lanes)

    kernel = functools.partial(
        _dncnn_fused_kernel,
        channels=c, cin_pad=cin_pad, f_pad=f_pad, n_mid=n_mid,
        width=w, margin=margin, lanes=lanes)

    act_lanes = margin + lanes + margin          # multiple of 128

    out_packed = pl.pallas_call(
        kernel,
        out_shape=jax.ShapeDtypeStruct((num_blocks, c, lanes), jnp.float32),
        grid=(num_blocks,),
        in_specs=[
            pl.BlockSpec((1, cin_pad, lanes), lambda i: (i, 0, 0)),
            pl.BlockSpec((f_pad, 9 * cin_pad), lambda i: (0, 0)),
            pl.BlockSpec((n_mid, f_pad, 9 * f_pad), lambda i: (0, 0, 0)),
            pl.BlockSpec((co_pad, 9 * f_pad), lambda i: (0, 0)),
            pl.BlockSpec((n_mid, f_pad, 1), lambda i: (0, 0, 0)),
            pl.BlockSpec((n_mid, f_pad, 1), lambda i: (0, 0, 0)),
            pl.BlockSpec((1, lanes), lambda i: (0, 0)),
        ],
        out_specs=pl.BlockSpec((1, c, lanes), lambda i: (i, 0, 0)),
        scratch_shapes=[
            pltpu.VMEM((f_pad, act_lanes), jnp.bfloat16),   # ping activations
            pltpu.VMEM((f_pad, act_lanes), jnp.bfloat16),   # pong activations
            pltpu.VMEM((9 * f_pad, lanes), jnp.bfloat16),   # im2col slab
        ],
        compiler_params=pltpu.CompilerParams(
            dimension_semantics=("parallel",)),
    )(x_packed, w_first, w_mid, w_last, s_mid, b_mid, mask)

    # ---- unpack: (num_blocks, C, lanes) -> (N, C, H, W) ----------------------
    out = (out_packed.reshape(num_blocks, c, images_per_block, pimg)
           .transpose(0, 2, 1, 3)
           .reshape(n, c, pimg))
    return out[:, :, :p].reshape(n, c, hp, wp)[:, :, 1:-1, 1:-1]


def init_dncnn_params(key, channels, num_of_layers, features):
    """Deterministic synthetic parameters matching the DnCNN layer shapes."""
    eps = 1e-5
    layer_io = ([(channels, features)]
                + [(features, features)] * (num_of_layers - 2)
                + [(features, channels)])
    params = []
    for i, (cin, cout) in enumerate(layer_io):
        key, kw, kg, kb, km, kv = jax.random.split(key, 6)
        w = 0.1 * jax.random.normal(kw, (cout, cin, 3, 3), dtype=jnp.float32)  # OIHW
        first, last = (i == 0), (i == len(layer_io) - 1)
        if first or last:
            scale = jnp.ones((cout,), jnp.float32)
            bias = jnp.zeros((cout,), jnp.float32)
        else:
            gamma = 1.0 + 0.1 * jax.random.normal(kg, (cout,), dtype=jnp.float32)
            beta = 0.1 * jax.random.normal(kb, (cout,), dtype=jnp.float32)
            rmean = 0.1 * jax.random.normal(km, (cout,), dtype=jnp.float32)
            rvar = jnp.abs(1.0 + 0.1 * jax.random.normal(kv, (cout,), dtype=jnp.float32))
            scale = gamma * lax.rsqrt(rvar + eps)
            bias = beta - rmean * scale
        params.append(dict(w=w, scale=scale, bias=bias, relu=not last))
    return params


def _reference_forward(x_nchw, params):
    """Pure-JAX f32 reference (lax conv) for the correctness check."""
    y = x_nchw.astype(jnp.float32)
    for layer in params:
        y = lax.conv_general_dilated(
            y, layer["w"], window_strides=(1, 1), padding=((1, 1), (1, 1)),
            dimension_numbers=("NCHW", "OIHW", "NCHW"))
        y = y * layer["scale"][None, :, None, None] + layer["bias"][None, :, None, None]
        if layer["relu"]:
            y = jnp.maximum(y, 0.0)
    return x_nchw - y


if __name__ == "__main__":
    # Small DnCNN config: channels=4, 5 layers, 32 features, 2x4x16x16 input.
    channels, num_of_layers, features = 4, 5, 32
    N, H, W = 2, 16, 16

    key = jax.random.PRNGKey(0)
    key, kx = jax.random.split(key)
    x = jax.random.normal(kx, (N, channels, H, W), dtype=jnp.float32)
    params = init_dncnn_params(key, channels, num_of_layers, features)

    out = jax.block_until_ready(dncnn_forward(x, params))
    ref = jax.block_until_ready(_reference_forward(x, params))

    assert out.shape == (N, channels, H, W)
    # bf16 MXU inputs / bf16 activation storage -> loosened tolerance vs the
    # pure-f32 reference.
    err = float(jnp.max(jnp.abs(out - ref)))
    assert err < 1e-1, err

    print("KERNEL_OK")
</pallas_src>

<mosaic_0001>
module attributes {stable_mosaic.version = 11 : i64} {
  func.func @_dncnn_fused_kernel(%arg0: i32, %arg1: memref<1x16x384xf32, #tpu.memory_space<vmem>>, %arg2: memref<32x144xbf16, #tpu.memory_space<vmem>>, %arg3: memref<3x32x288xbf16, #tpu.memory_space<vmem>>, %arg4: memref<8x288xbf16, #tpu.memory_space<vmem>>, %arg5: memref<3x32x1xf32, #tpu.memory_space<vmem>>, %arg6: memref<3x32x1xf32, #tpu.memory_space<vmem>>, %arg7: memref<1x384xf32, #tpu.memory_space<vmem>>, %arg8: memref<1x4x384xf32, #tpu.memory_space<vmem>>, %arg9: memref<32x640xbf16, #tpu.memory_space<vmem>>, %arg10: memref<32x640xbf16, #tpu.memory_space<vmem>>, %arg11: memref<288x384xbf16, #tpu.memory_space<vmem>>) attributes {dimension_semantics = [#tpu.dimension_semantics<parallel>], iteration_bounds = array<i64: 2>, scalar_prefetch = 0 : i64, scratch_operands = 3 : i64, tpu.core_type = #tpu.core_type<tc>, window_params = [{transform_indices = @transform_0, window_bounds = array<i64: 1, 16, 384>}, {pipeline_mode = #tpu.pipeline_mode<synchronous>, transform_indices = @transform_1, window_bounds = array<i64: 32, 144>}, {pipeline_mode = #tpu.pipeline_mode<synchronous>, transform_indices = @transform_2, window_bounds = array<i64: 3, 32, 288>}, {pipeline_mode = #tpu.pipeline_mode<synchronous>, transform_indices = @transform_3, window_bounds = array<i64: 8, 288>}, {pipeline_mode = #tpu.pipeline_mode<synchronous>, transform_indices = @transform_4, window_bounds = array<i64: 3, 32, 1>}, {pipeline_mode = #tpu.pipeline_mode<synchronous>, transform_indices = @transform_5, window_bounds = array<i64: 3, 32, 1>}, {pipeline_mode = #tpu.pipeline_mode<synchronous>, transform_indices = @transform_6, window_bounds = array<i64: 1, 384>}, {transform_indices = @transform_7, window_bounds = array<i64: 1, 4, 384>}]} {
    %c0_i32 = arith.constant 0 : i32
    %0 = arith.cmpi eq, %arg0, %c0_i32 : i32
    %1 = arith.extui %0 : i1 to i32
    %c0_i32_0 = arith.constant 0 : i32
    %2 = arith.cmpi ne, %1, %c0_i32_0 : i32
    scf.if %2 {
      %cst_234 = arith.constant 0.000000e+00 : bf16
      %186 = vector.broadcast %cst_234 : bf16 to vector<32x640xbf16>
      %c0_235 = arith.constant 0 : index
      %c0_236 = arith.constant 0 : index
      %187 = vector.load %arg9[%c0_235, %c0_236] : memref<32x640xbf16, #tpu.memory_space<vmem>>, vector<32x640xbf16>
      tpu.vector_store %arg9[%c0_235, %c0_236], %186 {strides = array<i32>} : memref<32x640xbf16, #tpu.memory_space<vmem>>, vector<32x640xbf16>,
      %cst_237 = arith.constant 0.000000e+00 : bf16
      %188 = vector.broadcast %cst_237 : bf16 to vector<32x640xbf16>
      %c0_238 = arith.constant 0 : index
      %c0_239 = arith.constant 0 : index
      %189 = vector.load %arg10[%c0_238, %c0_239] : memref<32x640xbf16, #tpu.memory_space<vmem>>, vector<32x640xbf16>
      tpu.vector_store %arg10[%c0_238, %c0_239], %188 {strides = array<i32>} : memref<32x640xbf16, #tpu.memory_space<vmem>>, vector<32x640xbf16>,
    } else {
    }
    %c0 = arith.constant 0 : index
    %c0_1 = arith.constant 0 : index
    %c0_2 = arith.constant 0 : index
    %3 = vector.load %arg1[%c0, %c0_1, %c0_2] : memref<1x16x384xf32, #tpu.memory_space<vmem>>, vector<1x16x384xf32>
    %4 = vector.shape_cast %3 : vector<1x16x384xf32> to vector<16x384xf32>
    %5 = arith.truncf %4 : vector<16x384xf32> to vector<16x384xbf16>
    %c0_3 = arith.constant 0 : index
    %c128 = arith.constant 128 : index
    %6 = vector.load %arg9[%c0_3, %c128] : memref<32x640xbf16, #tpu.memory_space<vmem>>, vector<16x384xbf16>
    tpu.vector_store %arg9[%c0_3, %c128], %5 {strides = array<i32>} : memref<32x640xbf16, #tpu.memory_space<vmem>>, vector<16x384xbf16>,
    %c0_4 = arith.constant 0 : index
    %c0_5 = arith.constant 0 : index
    %7 = vector.load %arg7[%c0_4, %c0_5] : memref<1x384xf32, #tpu.memory_space<vmem>>, vector<1x384xf32>
    %cst = arith.constant 5.000000e-01 : f32
    %8 = vector.broadcast %cst : f32 to vector<1x384xf32>
    %9 = arith.cmpf ogt, %7, %8 : vector<1x384xf32>
    %c0_6 = arith.constant 0 : index
    %c109 = arith.constant 109 : index
    %10 = vector.load %arg9[%c0_6, %c109] : memref<32x640xbf16, #tpu.memory_space<vmem>>, vector<16x384xbf16>
    %c0_7 = arith.constant 0 : index
    %c0_8 = arith.constant 0 : index
    %11 = vector.load %arg11[%c0_7, %c0_8] : memref<288x384xbf16, #tpu.memory_space<vmem>>, vector<16x384xbf16>
    tpu.vector_store %arg11[%c0_7, %c0_8], %10 {strides = array<i32>} : memref<288x384xbf16, #tpu.memory_space<vmem>>, vector<16x384xbf16>,
    %c0_9 = arith.constant 0 : index
    %c110 = arith.constant 110 : index
    %12 = vector.load %arg9[%c0_9, %c110] : memref<32x640xbf16, #tpu.memory_space<vmem>>, vector<16x384xbf16>
    %c16 = arith.constant 16 : index
    %c0_10 = arith.constant 0 : index
    %13 = vector.load %arg11[%c16, %c0_10] : memref<288x384xbf16, #tpu.memory_space<vmem>>, vector<16x384xbf16>
    tpu.vector_store %arg11[%c16, %c0_10], %12 {strides = array<i32>} : memref<288x384xbf16, #tpu.memory_space<vmem>>, vector<16x384xbf16>,
    %c0_11 = arith.constant 0 : index
    %c111 = arith.constant 111 : index
    %14 = vector.load %arg9[%c0_11, %c111] : memref<32x640xbf16, #tpu.memory_space<vmem>>, vector<16x384xbf16>
    %c32 = arith.constant 32 : index
    %c0_12 = arith.constant 0 : index
    %15 = vector.load %arg11[%c32, %c0_12] : memref<288x384xbf16, #tpu.memory_space<vmem>>, vector<16x384xbf16>
    tpu.vector_store %arg11[%c32, %c0_12], %14 {strides = array<i32>} : memref<288x384xbf16, #tpu.memory_space<vmem>>, vector<16x384xbf16>,
    %c0_13 = arith.constant 0 : index
    %c127 = arith.constant 127 : index
    %16 = vector.load %arg9[%c0_13, %c127] : memref<32x640xbf16, #tpu.memory_space<vmem>>, vector<16x384xbf16>
    %c48 = arith.constant 48 : index
    %c0_14 = arith.constant 0 : index
    %17 = vector.load %arg11[%c48, %c0_14] : memref<288x384xbf16, #tpu.memory_space<vmem>>, vector<16x384xbf16>
    tpu.vector_store %arg11[%c48, %c0_14], %16 {strides = array<i32>} : memref<288x384xbf16, #tpu.memory_space<vmem>>, vector<16x384xbf16>,
    %c0_15 = arith.constant 0 : index
    %c128_16 = arith.constant 128 : index
    %18 = vector.load %arg9[%c0_15, %c128_16] : memref<32x640xbf16, #tpu.memory_space<vmem>>, vector<16x384xbf16>
    %c64 = arith.constant 64 : index
    %c0_17 = arith.constant 0 : index
    %19 = vector.load %arg11[%c64, %c0_17] : memref<288x384xbf16, #tpu.memory_space<vmem>>, vector<16x384xbf16>
    tpu.vector_store %arg11[%c64, %c0_17], %18 {strides = array<i32>} : memref<288x384xbf16, #tpu.memory_space<vmem>>, vector<16x384xbf16>,
    %c0_18 = arith.constant 0 : index
    %c129 = arith.constant 129 : index
    %20 = vector.load %arg9[%c0_18, %c129] : memref<32x640xbf16, #tpu.memory_space<vmem>>, vector<16x384xbf16>
    %c80 = arith.constant 80 : index
    %c0_19 = arith.constant 0 : index
    %21 = vector.load %arg11[%c80, %c0_19] : memref<288x384xbf16, #tpu.memory_space<vmem>>, vector<16x384xbf16>
    tpu.vector_store %arg11[%c80, %c0_19], %20 {strides = array<i32>} : memref<288x384xbf16, #tpu.memory_space<vmem>>, vector<16x384xbf16>,
    %c0_20 = arith.constant 0 : index
    %c145 = arith.constant 145 : index
    %22 = vector.load %arg9[%c0_20, %c145] : memref<32x640xbf16, #tpu.memory_space<vmem>>, vector<16x384xbf16>
    %c96 = arith.constant 96 : index
    %c0_21 = arith.constant 0 : index
    %23 = vector.load %arg11[%c96, %c0_21] : memref<288x384xbf16, #tpu.memory_space<vmem>>, vector<16x384xbf16>
    tpu.vector_store %arg11[%c96, %c0_21], %22 {strides = array<i32>} : memref<288x384xbf16, #tpu.memory_space<vmem>>, vector<16x384xbf16>,
    %c0_22 = arith.constant 0 : index
    %c146 = arith.constant 146 : index
    %24 = vector.load %arg9[%c0_22, %c146] : memref<32x640xbf16, #tpu.memory_space<vmem>>, vector<16x384xbf16>
    %c112 = arith.constant 112 : index
    %c0_23 = arith.constant 0 : index
    %25 = vector.load %arg11[%c112, %c0_23] : memref<288x384xbf16, #tpu.memory_space<vmem>>, vector<16x384xbf16>
    tpu.vector_store %arg11[%c112, %c0_23], %24 {strides = array<i32>} : memref<288x384xbf16, #tpu.memory_space<vmem>>, vector<16x384xbf16>,
    %c0_24 = arith.constant 0 : index
    %c147 = arith.constant 147 : index
    %26 = vector.load %arg9[%c0_24, %c147] : memref<32x640xbf16, #tpu.memory_space<vmem>>, vector<16x384xbf16>
    %c128_25 = arith.constant 128 : index
    %c0_26 = arith.constant 0 : index
    %27 = vector.load %arg11[%c128_25, %c0_26] : memref<288x384xbf16, #tpu.memory_space<vmem>>, vector<16x384xbf16>
    tpu.vector_store %arg11[%c128_25, %c0_26], %26 {strides = array<i32>} : memref<288x384xbf16, #tpu.memory_space<vmem>>, vector<16x384xbf16>,
    %c0_27 = arith.constant 0 : index
    %c0_28 = arith.constant 0 : index
    %28 = vector.load %arg2[%c0_27, %c0_28] : memref<32x144xbf16, #tpu.memory_space<vmem>>, vector<32x144xbf16>
    %c0_29 = arith.constant 0 : index
    %c0_30 = arith.constant 0 : index
    %29 = vector.load %arg11[%c0_29, %c0_30] : memref<288x384xbf16, #tpu.memory_space<vmem>>, vector<144x384xbf16>
    %cst_31 = arith.constant dense<0.000000e+00> : vector<32x384xf32>
    %30 = tpu.matmul %28, %29, %cst_31 {dimension_numbers = #tpu.dot_dimension_numbers<[1], [0], [0], [1], [0, 0, 1, 1], [], []>} : vector<32x144xbf16>, vector<144x384xbf16>, vector<32x384xf32> -> vector<32x384xf32>
    %cst_32 = arith.constant 0.000000e+00 : f32
    %31 = vector.broadcast %cst_32 : f32 to vector<32x384xf32>
    %32 = arith.maximumf %30, %31 : vector<32x384xf32>
    %cst_33 = arith.constant 0.000000e+00 : f32
    %33 = vector.shape_cast %9 : vector<1x384xi1> to vector<1x384xi1>
    %34 = vector.broadcast %33 : vector<1x384xi1> to vector<32x384xi1>
    %35 = vector.broadcast %cst_33 : f32 to vector<32x384xf32>
    %36 = arith.select %34, %32, %35 : vector<32x384xi1>, vector<32x384xf32>
    %37 = arith.truncf %36 : vector<32x384xf32> to vector<32x384xbf16>
    %c0_34 = arith.constant 0 : index
    %c128_35 = arith.constant 128 : index
    %38 = vector.load %arg10[%c0_34, %c128_35] : memref<32x640xbf16, #tpu.memory_space<vmem>>, vector<32x384xbf16>
    tpu.vector_store %arg10[%c0_34, %c128_35], %37 {strides = array<i32>} : memref<32x640xbf16, #tpu.memory_space<vmem>>, vector<32x384xbf16>,
    %c0_36 = arith.constant 0 : index
    %c109_37 = arith.constant 109 : index
    %39 = vector.load %arg10[%c0_36, %c109_37] : memref<32x640xbf16, #tpu.memory_space<vmem>>, vector<32x384xbf16>
    %c0_38 = arith.constant 0 : index
    %c0_39 = arith.constant 0 : index
    %40 = vector.load %arg11[%c0_38, %c0_39] : memref<288x384xbf16, #tpu.memory_space<vmem>>, vector<32x384xbf16>
    tpu.vector_store %arg11[%c0_38, %c0_39], %39 {strides = array<i32>} : memref<288x384xbf16, #tpu.memory_space<vmem>>, vector<32x384xbf16>,
    %c0_40 = arith.constant 0 : index
    %c110_41 = arith.constant 110 : index
    %41 = vector.load %arg10[%c0_40, %c110_41] : memref<32x640xbf16, #tpu.memory_space<vmem>>, vector<32x384xbf16>
    %c32_42 = arith.constant 32 : index
    %c0_43 = arith.constant 0 : index
    %42 = vector.load %arg11[%c32_42, %c0_43] : memref<288x384xbf16, #tpu.memory_space<vmem>>, vector<32x384xbf16>
    tpu.vector_store %arg11[%c32_42, %c0_43], %41 {strides = array<i32>} : memref<288x384xbf16, #tpu.memory_space<vmem>>, vector<32x384xbf16>,
    %c0_44 = arith.constant 0 : index
    %c111_45 = arith.constant 111 : index
    %43 = vector.load %arg10[%c0_44, %c111_45] : memref<32x640xbf16, #tpu.memory_space<vmem>>, vector<32x384xbf16>
    %c64_46 = arith.constant 64 : index
    %c0_47 = arith.constant 0 : index
    %44 = vector.load %arg11[%c64_46, %c0_47] : memref<288x384xbf16, #tpu.memory_space<vmem>>, vector<32x384xbf16>
    tpu.vector_store %arg11[%c64_46, %c0_47], %43 {strides = array<i32>} : memref<288x384xbf16, #tpu.memory_space<vmem>>, vector<32x384xbf16>,
    %c0_48 = arith.constant 0 : index
    %c127_49 = arith.constant 127 : index
    %45 = vector.load %arg10[%c0_48, %c127_49] : memref<32x640xbf16, #tpu.memory_space<vmem>>, vector<32x384xbf16>
    %c96_50 = arith.constant 96 : index
    %c0_51 = arith.constant 0 : index
    %46 = vector.load %arg11[%c96_50, %c0_51] : memref<288x384xbf16, #tpu.memory_space<vmem>>, vector<32x384xbf16>
    tpu.vector_store %arg11[%c96_50, %c0_51], %45 {strides = array<i32>} : memref<288x384xbf16, #tpu.memory_space<vmem>>, vector<32x384xbf16>,
    %c0_52 = arith.constant 0 : index
    %c128_53 = arith.constant 128 : index
    %47 = vector.load %arg10[%c0_52, %c128_53] : memref<32x640xbf16, #tpu.memory_space<vmem>>, vector<32x384xbf16>
    %c128_54 = arith.constant 128 : index
    %c0_55 = arith.constant 0 : index
    %48 = vector.load %arg11[%c128_54, %c0_55] : memref<288x384xbf16, #tpu.memory_space<vmem>>, vector<32x384xbf16>
    tpu.vector_store %arg11[%c128_54, %c0_55], %47 {strides = array<i32>} : memref<288x384xbf16, #tpu.memory_space<vmem>>, vector<32x384xbf16>,
    %c0_56 = arith.constant 0 : index
    %c129_57 = arith.constant 129 : index
    %49 = vector.load %arg10[%c0_56, %c129_57] : memref<32x640xbf16, #tpu.memory_space<vmem>>, vector<32x384xbf16>
    %c160 = arith.constant 160 : index
    %c0_58 = arith.constant 0 : index
    %50 = vector.load %arg11[%c160, %c0_58] : memref<288x384xbf16, #tpu.memory_space<vmem>>, vector<32x384xbf16>
    tpu.vector_store %arg11[%c160, %c0_58], %49 {strides = array<i32>} : memref<288x384xbf16, #tpu.memory_space<vmem>>, vector<32x384xbf16>,
    %c0_59 = arith.constant 0 : index
    %c145_60 = arith.constant 145 : index
    %51 = vector.load %arg10[%c0_59, %c145_60] : memref<32x640xbf16, #tpu.memory_space<vmem>>, vector<32x384xbf16>
    %c192 = arith.constant 192 : index
    %c0_61 = arith.constant 0 : index
    %52 = vector.load %arg11[%c192, %c0_61] : memref<288x384xbf16, #tpu.memory_space<vmem>>, vector<32x384xbf16>
    tpu.vector_store %arg11[%c192, %c0_61], %51 {strides = array<i32>} : memref<288x384xbf16, #tpu.memory_space<vmem>>, vector<32x384xbf16>,
    %c0_62 = arith.constant 0 : index
    %c146_63 = arith.constant 146 : index
    %53 = vector.load %arg10[%c0_62, %c146_63] : memref<32x640xbf16, #tpu.memory_space<vmem>>, vector<32x384xbf16>
    %c224 = arith.constant 224 : index
    %c0_64 = arith.constant 0 : index
    %54 = vector.load %arg11[%c224, %c0_64] : memref<288x384xbf16, #tpu.memory_space<vmem>>, vector<32x384xbf16>
    tpu.vector_store %arg11[%c224, %c0_64], %53 {strides = array<i32>} : memref<288x384xbf16, #tpu.memory_space<vmem>>, vector<32x384xbf16>,
    %c0_65 = arith.constant 0 : index
    %c147_66 = arith.constant 147 : index
    %55 = vector.load %arg10[%c0_65, %c147_66] : memref<32x640xbf16, #tpu.memory_space<vmem>>, vector<32x384xbf16>
    %c256 = arith.constant 256 : index
    %c0_67 = arith.constant 0 : index
    %56 = vector.load %arg11[%c256, %c0_67] : memref<288x384xbf16, #tpu.memory_space<vmem>>, vector<32x384xbf16>
    tpu.vector_store %arg11[%c256, %c0_67], %55 {strides = array<i32>} : memref<288x384xbf16, #tpu.memory_space<vmem>>, vector<32x384xbf16>,
    %c0_68 = arith.constant 0 : index
    %c0_69 = arith.constant 0 : index
    %c0_70 = arith.constant 0 : index
    %57 = vector.load %arg3[%c0_68, %c0_69, %c0_70] : memref<3x32x288xbf16, #tpu.memory_space<vmem>>, vector<1x32x288xbf16>
    %58 = vector.shape_cast %57 : vector<1x32x288xbf16> to vector<32x288xbf16>
    %c0_71 = arith.constant 0 : index
    %c0_72 = arith.constant 0 : index
    %59 = vector.load %arg11[%c0_71, %c0_72] : memref<288x384xbf16, #tpu.memory_space<vmem>>, vector<288x384xbf16>
    %cst_73 = arith.constant dense<0.000000e+00> : vector<32x384xf32>
    %60 = tpu.matmul %58, %59, %cst_73 {dimension_numbers = #tpu.dot_dimension_numbers<[1], [0], [0], [1], [0, 0, 1, 1], [], []>} : vector<32x288xbf16>, vector<288x384xbf16>, vector<32x384xf32> -> vector<32x384xf32>
    %c0_74 = arith.constant 0 : index
    %c0_75 = arith.constant 0 : index
    %c0_76 = arith.constant 0 : index
    %61 = vector.load %arg5[%c0_74, %c0_75, %c0_76] : memref<3x32x1xf32, #tpu.memory_space<vmem>>, vector<1x32x1xf32>
    %62 = vector.shape_cast %61 : vector<1x32x1xf32> to vector<32x1xf32>
    %63 = vector.broadcast %62 : vector<32x1xf32> to vector<32x384xf32>
    %64 = arith.mulf %60, %63 : vector<32x384xf32>
    %c0_77 = arith.constant 0 : index
    %c0_78 = arith.constant 0 : index
    %c0_79 = arith.constant 0 : index
    %65 = vector.load %arg6[%c0_77, %c0_78, %c0_79] : memref<3x32x1xf32, #tpu.memory_space<vmem>>, vector<1x32x1xf32>
    %66 = vector.shape_cast %65 : vector<1x32x1xf32> to vector<32x1xf32>
    %67 = vector.broadcast %66 : vector<32x1xf32> to vector<32x384xf32>
    %68 = arith.addf %64, %67 : vector<32x384xf32>
    %cst_80 = arith.constant 0.000000e+00 : f32
    %69 = vector.broadcast %cst_80 : f32 to vector<32x384xf32>
    %70 = arith.maximumf %68, %69 : vector<32x384xf32>
    %cst_81 = arith.constant 0.000000e+00 : f32
    %71 = vector.shape_cast %9 : vector<1x384xi1> to vector<1x384xi1>
    %72 = vector.broadcast %71 : vector<1x384xi1> to vector<32x384xi1>
    %73 = vector.broadcast %cst_81 : f32 to vector<32x384xf32>
    %74 = arith.select %72, %70, %73 : vector<32x384xi1>, vector<32x384xf32>
    %75 = arith.truncf %74 : vector<32x384xf32> to vector<32x384xbf16>
    %c0_82 = arith.constant 0 : index
    %c128_83 = arith.constant 128 : index
    %76 = vector.load %arg9[%c0_82, %c128_83] : memref<32x640xbf16, #tpu.memory_space<vmem>>, vector<32x384xbf16>
    tpu.vector_store %arg9[%c0_82, %c128_83], %75 {strides = array<i32>} : memref<32x640xbf16, #tpu.memory_space<vmem>>, vector<32x384xbf16>,
    %c0_84 = arith.constant 0 : index
    %c109_85 = arith.constant 109 : index
    %77 = vector.load %arg9[%c0_84, %c109_85] : memref<32x640xbf16, #tpu.memory_space<vmem>>, vector<32x384xbf16>
    %c0_86 = arith.constant 0 : index
    %c0_87 = arith.constant 0 : index
    %78 = vector.load %arg11[%c0_86, %c0_87] : memref<288x384xbf16, #tpu.memory_space<vmem>>, vector<32x384xbf16>
    tpu.vector_store %arg11[%c0_86, %c0_87], %77 {strides = array<i32>} : memref<288x384xbf16, #tpu.memory_space<vmem>>, vector<32x384xbf16>,
    %c0_88 = arith.constant 0 : index
    %c110_89 = arith.constant 110 : index
    %79 = vector.load %arg9[%c0_88, %c110_89] : memref<32x640xbf16, #tpu.memory_space<vmem>>, vector<32x384xbf16>
    %c32_90 = arith.constant 32 : index
    %c0_91 = arith.constant 0 : index
    %80 = vector.load %arg11[%c32_90, %c0_91] : memref<288x384xbf16, #tpu.memory_space<vmem>>, vector<32x384xbf16>
    tpu.vector_store %arg11[%c32_90, %c0_91], %79 {strides = array<i32>} : memref<288x384xbf16, #tpu.memory_space<vmem>>, vector<32x384xbf16>,
    %c0_92 = arith.constant 0 : index
    %c111_93 = arith.constant 111 : index
    %81 = vector.load %arg9[%c0_92, %c111_93] : memref<32x640xbf16, #tpu.memory_space<vmem>>, vector<32x384xbf16>
    %c64_94 = arith.constant 64 : index
    %c0_95 = arith.constant 0 : index
    %82 = vector.load %arg11[%c64_94, %c0_95] : memref<288x384xbf16, #tpu.memory_space<vmem>>, vector<32x384xbf16>
    tpu.vector_store %arg11[%c64_94, %c0_95], %81 {strides = array<i32>} : memref<288x384xbf16, #tpu.memory_space<vmem>>, vector<32x384xbf16>,
    %c0_96 = arith.constant 0 : index
    %c127_97 = arith.constant 127 : index
    %83 = vector.load %arg9[%c0_96, %c127_97] : memref<32x640xbf16, #tpu.memory_space<vmem>>, vector<32x384xbf16>
    %c96_98 = arith.constant 96 : index
    %c0_99 = arith.constant 0 : index
    %84 = vector.load %arg11[%c96_98, %c0_99] : memref<288x384xbf16, #tpu.memory_space<vmem>>, vector<32x384xbf16>
    tpu.vector_store %arg11[%c96_98, %c0_99], %83 {strides = array<i32>} : memref<288x384xbf16, #tpu.memory_space<vmem>>, vector<32x384xbf16>,
    %c0_100 = arith.constant 0 : index
    %c128_101 = arith.constant 128 : index
    %85 = vector.load %arg9[%c0_100, %c128_101] : memref<32x640xbf16, #tpu.memory_space<vmem>>, vector<32x384xbf16>
    %c128_102 = arith.constant 128 : index
    %c0_103 = arith.constant 0 : index
    %86 = vector.load %arg11[%c128_102, %c0_103] : memref<288x384xbf16, #tpu.memory_space<vmem>>, vector<32x384xbf16>
    tpu.vector_store %arg11[%c128_102, %c0_103], %85 {strides = array<i32>} : memref<288x384xbf16, #tpu.memory_space<vmem>>, vector<32x384xbf16>,
    %c0_104 = arith.constant 0 : index
    %c129_105 = arith.constant 129 : index
    %87 = vector.load %arg9[%c0_104, %c129_105] : memref<32x640xbf16, #tpu.memory_space<vmem>>, vector<32x384xbf16>
    %c160_106 = arith.constant 160 : index
    %c0_107 = arith.constant 0 : index
    %88 = vector.load %arg11[%c160_106, %c0_107] : memref<288x384xbf16, #tpu.memory_space<vmem>>, vector<32x384xbf16>
    tpu.vector_store %arg11[%c160_106, %c0_107], %87 {strides = array<i32>} : memref<288x384xbf16, #tpu.memory_space<vmem>>, vector<32x384xbf16>,
    %c0_108 = arith.constant 0 : index
    %c145_109 = arith.constant 145 : index
    %89 = vector.load %arg9[%c0_108, %c145_109] : memref<32x640xbf16, #tpu.memory_space<vmem>>, vector<32x384xbf16>
    %c192_110 = arith.constant 192 : index
    %c0_111 = arith.constant 0 : index
    %90 = vector.load %arg11[%c192_110, %c0_111] : memref<288x384xbf16, #tpu.memory_space<vmem>>, vector<32x384xbf16>
    tpu.vector_store %arg11[%c192_110, %c0_111], %89 {strides = array<i32>} : memref<288x384xbf16, #tpu.memory_space<vmem>>, vector<32x384xbf16>,
    %c0_112 = arith.constant 0 : index
    %c146_113 = arith.constant 146 : index
    %91 = vector.load %arg9[%c0_112, %c146_113] : memref<32x640xbf16, #tpu.memory_space<vmem>>, vector<32x384xbf16>
    %c224_114 = arith.constant 224 : index
    %c0_115 = arith.constant 0 : index
    %92 = vector.load %arg11[%c224_114, %c0_115] : memref<288x384xbf16, #tpu.memory_space<vmem>>, vector<32x384xbf16>
    tpu.vector_store %arg11[%c224_114, %c0_115], %91 {strides = array<i32>} : memref<288x384xbf16, #tpu.memory_space<vmem>>, vector<32x384xbf16>,
    %c0_116 = arith.constant 0 : index
    %c147_117 = arith.constant 147 : index
    %93 = vector.load %arg9[%c0_116, %c147_117] : memref<32x640xbf16, #tpu.memory_space<vmem>>, vector<32x384xbf16>
    %c256_118 = arith.constant 256 : index
    %c0_119 = arith.constant 0 : index
    %94 = vector.load %arg11[%c256_118, %c0_119] : memref<288x384xbf16, #tpu.memory_space<vmem>>, vector<32x384xbf16>
    tpu.vector_store %arg11[%c256_118, %c0_119], %93 {strides = array<i32>} : memref<288x384xbf16, #tpu.memory_space<vmem>>, vector<32x384xbf16>,
    %c1 = arith.constant 1 : index
    %c0_120 = arith.constant 0 : index
    %c0_121 = arith.constant 0 : index
    %95 = vector.load %arg3[%c1, %c0_120, %c0_121] : memref<3x32x288xbf16, #tpu.memory_space<vmem>>, vector<1x32x288xbf16>
    %96 = vector.shape_cast %95 : vector<1x32x288xbf16> to vector<32x288xbf16>
    %c0_122 = arith.constant 0 : index
    %c0_123 = arith.constant 0 : index
    %97 = vector.load %arg11[%c0_122, %c0_123] : memref<288x384xbf16, #tpu.memory_space<vmem>>, vector<288x384xbf16>
    %cst_124 = arith.constant dense<0.000000e+00> : vector<32x384xf32>
    %98 = tpu.matmul %96, %97, %cst_124 {dimension_numbers = #tpu.dot_dimension_numbers<[1], [0], [0], [1], [0, 0, 1, 1], [], []>} : vector<32x288xbf16>, vector<288x384xbf16>, vector<32x384xf32> -> vector<32x384xf32>
    %c1_125 = arith.constant 1 : index
    %c0_126 = arith.constant 0 : index
    %c0_127 = arith.constant 0 : index
    %99 = vector.load %arg5[%c1_125, %c0_126, %c0_127] : memref<3x32x1xf32, #tpu.memory_space<vmem>>, vector<1x32x1xf32>
    %100 = vector.shape_cast %99 : vector<1x32x1xf32> to vector<32x1xf32>
    %101 = vector.broadcast %100 : vector<32x1xf32> to vector<32x384xf32>
    %102 = arith.mulf %98, %101 : vector<32x384xf32>
    %c1_128 = arith.constant 1 : index
    %c0_129 = arith.constant 0 : index
    %c0_130 = arith.constant 0 : index
    %103 = vector.load %arg6[%c1_128, %c0_129, %c0_130] : memref<3x32x1xf32, #tpu.memory_space<vmem>>, vector<1x32x1xf32>
    %104 = vector.shape_cast %103 : vector<1x32x1xf32> to vector<32x1xf32>
    %105 = vector.broadcast %104 : vector<32x1xf32> to vector<32x384xf32>
    %106 = arith.addf %102, %105 : vector<32x384xf32>
    %cst_131 = arith.constant 0.000000e+00 : f32
    %107 = vector.broadcast %cst_131 : f32 to vector<32x384xf32>
    %108 = arith.maximumf %106, %107 : vector<32x384xf32>
    %cst_132 = arith.constant 0.000000e+00 : f32
    %109 = vector.shape_cast %9 : vector<1x384xi1> to vector<1x384xi1>
    %110 = vector.broadcast %109 : vector<1x384xi1> to vector<32x384xi1>
    %111 = vector.broadcast %cst_132 : f32 to vector<32x384xf32>
    %112 = arith.select %110, %108, %111 : vector<32x384xi1>, vector<32x384xf32>
    %113 = arith.truncf %112 : vector<32x384xf32> to vector<32x384xbf16>
    %c0_133 = arith.constant 0 : index
    %c128_134 = arith.constant 128 : index
    %114 = vector.load %arg10[%c0_133, %c128_134] : memref<32x640xbf16, #tpu.memory_space<vmem>>, vector<32x384xbf16>
    tpu.vector_store %arg10[%c0_133, %c128_134], %113 {strides = array<i32>} : memref<32x640xbf16, #tpu.memory_space<vmem>>, vector<32x384xbf16>,
    %c0_135 = arith.constant 0 : index
    %c109_136 = arith.constant 109 : index
    %115 = vector.load %arg10[%c0_135, %c109_136] : memref<32x640xbf16, #tpu.memory_space<vmem>>, vector<32x384xbf16>
    %c0_137 = arith.constant 0 : index
    %c0_138 = arith.constant 0 : index
    %116 = vector.load %arg11[%c0_137, %c0_138] : memref<288x384xbf16, #tpu.memory_space<vmem>>, vector<32x384xbf16>
    tpu.vector_store %arg11[%c0_137, %c0_138], %115 {strides = array<i32>} : memref<288x384xbf16, #tpu.memory_space<vmem>>, vector<32x384xbf16>,
    %c0_139 = arith.constant 0 : index
    %c110_140 = arith.constant 110 : index
    %117 = vector.load %arg10[%c0_139, %c110_140] : memref<32x640xbf16, #tpu.memory_space<vmem>>, vector<32x384xbf16>
    %c32_141 = arith.constant 32 : index
    %c0_142 = arith.constant 0 : index
    %118 = vector.load %arg11[%c32_141, %c0_142] : memref<288x384xbf16, #tpu.memory_space<vmem>>, vector<32x384xbf16>
    tpu.vector_store %arg11[%c32_141, %c0_142], %117 {strides = array<i32>} : memref<288x384xbf16, #tpu.memory_space<vmem>>, vector<32x384xbf16>,
    %c0_143 = arith.constant 0 : index
    %c111_144 = arith.constant 111 : index
    %119 = vector.load %arg10[%c0_143, %c111_144] : memref<32x640xbf16, #tpu.memory_space<vmem>>, vector<32x384xbf16>
    %c64_145 = arith.constant 64 : index
    %c0_146 = arith.constant 0 : index
    %120 = vector.load %arg11[%c64_145, %c0_146] : memref<288x384xbf16, #tpu.memory_space<vmem>>, vector<32x384xbf16>
    tpu.vector_store %arg11[%c64_145, %c0_146], %119 {strides = array<i32>} : memref<288x384xbf16, #tpu.memory_space<vmem>>, vector<32x384xbf16>,
    %c0_147 = arith.constant 0 : index
    %c127_148 = arith.constant 127 : index
    %121 = vector.load %arg10[%c0_147, %c127_148] : memref<32x640xbf16, #tpu.memory_space<vmem>>, vector<32x384xbf16>
    %c96_149 = arith.constant 96 : index
    %c0_150 = arith.constant 0 : index
    %122 = vector.load %arg11[%c96_149, %c0_150] : memref<288x384xbf16, #tpu.memory_space<vmem>>, vector<32x384xbf16>
    tpu.vector_store %arg11[%c96_149, %c0_150], %121 {strides = array<i32>} : memref<288x384xbf16, #tpu.memory_space<vmem>>, vector<32x384xbf16>,
    %c0_151 = arith.constant 0 : index
    %c128_152 = arith.constant 128 : index
    %123 = vector.load %arg10[%c0_151, %c128_152] : memref<32x640xbf16, #tpu.memory_space<vmem>>, vector<32x384xbf16>
    %c128_153 = arith.constant 128 : index
    %c0_154 = arith.constant 0 : index
    %124 = vector.load %arg11[%c128_153, %c0_154] : memref<288x384xbf16, #tpu.memory_space<vmem>>, vector<32x384xbf16>
    tpu.vector_store %arg11[%c128_153, %c0_154], %123 {strides = array<i32>} : memref<288x384xbf16, #tpu.memory_space<vmem>>, vector<32x384xbf16>,
    %c0_155 = arith.constant 0 : index
    %c129_156 = arith.constant 129 : index
    %125 = vector.load %arg10[%c0_155, %c129_156] : memref<32x640xbf16, #tpu.memory_space<vmem>>, vector<32x384xbf16>
    %c160_157 = arith.constant 160 : index
    %c0_158 = arith.constant 0 : index
    %126 = vector.load %arg11[%c160_157, %c0_158] : memref<288x384xbf16, #tpu.memory_space<vmem>>, vector<32x384xbf16>
    tpu.vector_store %arg11[%c160_157, %c0_158], %125 {strides = array<i32>} : memref<288x384xbf16, #tpu.memory_space<vmem>>, vector<32x384xbf16>,
    %c0_159 = arith.constant 0 : index
    %c145_160 = arith.constant 145 : index
    %127 = vector.load %arg10[%c0_159, %c145_160] : memref<32x640xbf16, #tpu.memory_space<vmem>>, vector<32x384xbf16>
    %c192_161 = arith.constant 192 : index
    %c0_162 = arith.constant 0 : index
    %128 = vector.load %arg11[%c192_161, %c0_162] : memref<288x384xbf16, #tpu.memory_space<vmem>>, vector<32x384xbf16>
    tpu.vector_store %arg11[%c192_161, %c0_162], %127 {strides = array<i32>} : memref<288x384xbf16, #tpu.memory_space<vmem>>, vector<32x384xbf16>,
    %c0_163 = arith.constant 0 : index
    %c146_164 = arith.constant 146 : index
    %129 = vector.load %arg10[%c0_163, %c146_164] : memref<32x640xbf16, #tpu.memory_space<vmem>>, vector<32x384xbf16>
    %c224_165 = arith.constant 224 : index
    %c0_166 = arith.constant 0 : index
    %130 = vector.load %arg11[%c224_165, %c0_166] : memref<288x384xbf16, #tpu.memory_space<vmem>>, vector<32x384xbf16>
    tpu.vector_store %arg11[%c224_165, %c0_166], %129 {strides = array<i32>} : memref<288x384xbf16, #tpu.memory_space<vmem>>, vector<32x384xbf16>,
    %c0_167 = arith.constant 0 : index
    %c147_168 = arith.constant 147 : index
    %131 = vector.load %arg10[%c0_167, %c147_168] : memref<32x640xbf16, #tpu.memory_space<vmem>>, vector<32x384xbf16>
    %c256_169 = arith.constant 256 : index
    %c0_170 = arith.constant 0 : index
    %132 = vector.load %arg11[%c256_169, %c0_170] : memref<288x384xbf16, #tpu.memory_space<vmem>>, vector<32x384xbf16>
    tpu.vector_store %arg11[%c256_169, %c0_170], %131 {strides = array<i32>} : memref<288x384xbf16, #tpu.memory_space<vmem>>, vector<32x384xbf16>,
    %c2 = arith.constant 2 : index
    %c0_171 = arith.constant 0 : index
    %c0_172 = arith.constant 0 : index
    %133 = vector.load %arg3[%c2, %c0_171, %c0_172] : memref<3x32x288xbf16, #tpu.memory_space<vmem>>, vector<1x32x288xbf16>
    %134 = vector.shape_cast %133 : vector<1x32x288xbf16> to vector<32x288xbf16>
    %c0_173 = arith.constant 0 : index
    %c0_174 = arith.constant 0 : index
    %135 = vector.load %arg11[%c0_173, %c0_174] : memref<288x384xbf16, #tpu.memory_space<vmem>>, vector<288x384xbf16>
    %cst_175 = arith.constant dense<0.000000e+00> : vector<32x384xf32>
    %136 = tpu.matmul %134, %135, %cst_175 {dimension_numbers = #tpu.dot_dimension_numbers<[1], [0], [0], [1], [0, 0, 1, 1], [], []>} : vector<32x288xbf16>, vector<288x384xbf16>, vector<32x384xf32> -> vector<32x384xf32>
    %c2_176 = arith.constant 2 : index
    %c0_177 = arith.constant 0 : index
    %c0_178 = arith.constant 0 : index
    %137 = vector.load %arg5[%c2_176, %c0_177, %c0_178] : memref<3x32x1xf32, #tpu.memory_space<vmem>>, vector<1x32x1xf32>
    %138 = vector.shape_cast %137 : vector<1x32x1xf32> to vector<32x1xf32>
    %139 = vector.broadcast %138 : vector<32x1xf32> to vector<32x384xf32>
    %140 = arith.mulf %136, %139 : vector<32x384xf32>
    %c2_179 = arith.constant 2 : index
    %c0_180 = arith.constant 0 : index
    %c0_181 = arith.constant 0 : index
    %141 = vector.load %arg6[%c2_179, %c0_180, %c0_181] : memref<3x32x1xf32, #tpu.memory_space<vmem>>, vector<1x32x1xf32>
    %142 = vector.shape_cast %141 : vector<1x32x1xf32> to vector<32x1xf32>
    %143 = vector.broadcast %142 : vector<32x1xf32> to vector<32x384xf32>
    %144 = arith.addf %140, %143 : vector<32x384xf32>
    %cst_182 = arith.constant 0.000000e+00 : f32
    %145 = vector.broadcast %cst_182 : f32 to vector<32x384xf32>
    %146 = arith.maximumf %144, %145 : vector<32x384xf32>
    %cst_183 = arith.constant 0.000000e+00 : f32
    %147 = vector.shape_cast %9 : vector<1x384xi1> to vector<1x384xi1>
    %148 = vector.broadcast %147 : vector<1x384xi1> to vector<32x384xi1>
    %149 = vector.broadcast %cst_183 : f32 to vector<32x384xf32>
    %150 = arith.select %148, %146, %149 : vector<32x384xi1>, vector<32x384xf32>
    %151 = arith.truncf %150 : vector<32x384xf32> to vector<32x384xbf16>
    %c0_184 = arith.constant 0 : index
    %c128_185 = arith.constant 128 : index
    %152 = vector.load %arg9[%c0_184, %c128_185] : memref<32x640xbf16, #tpu.memory_space<vmem>>, vector<32x384xbf16>
    tpu.vector_store %arg9[%c0_184, %c128_185], %151 {strides = array<i32>} : memref<32x640xbf16, #tpu.memory_space<vmem>>, vector<32x384xbf16>,
    %c0_186 = arith.constant 0 : index
    %c109_187 = arith.constant 109 : index
    %153 = vector.load %arg9[%c0_186, %c109_187] : memref<32x640xbf16, #tpu.memory_space<vmem>>, vector<32x384xbf16>
    %c0_188 = arith.constant 0 : index
    %c0_189 = arith.constant 0 : index
    %154 = vector.load %arg11[%c0_188, %c0_189] : memref<288x384xbf16, #tpu.memory_space<vmem>>, vector<32x384xbf16>
    tpu.vector_store %arg11[%c0_188, %c0_189], %153 {strides = array<i32>} : memref<288x384xbf16, #tpu.memory_space<vmem>>, vector<32x384xbf16>,
    %c0_190 = arith.constant 0 : index
    %c110_191 = arith.constant 110 : index
    %155 = vector.load %arg9[%c0_190, %c110_191] : memref<32x640xbf16, #tpu.memory_space<vmem>>, vector<32x384xbf16>
    %c32_192 = arith.constant 32 : index
    %c0_193 = arith.constant 0 : index
    %156 = vector.load %arg11[%c32_192, %c0_193] : memref<288x384xbf16, #tpu.memory_space<vmem>>, vector<32x384xbf16>
    tpu.vector_store %arg11[%c32_192, %c0_193], %155 {strides = array<i32>} : memref<288x384xbf16, #tpu.memory_space<vmem>>, vector<32x384xbf16>,
    %c0_194 = arith.constant 0 : index
    %c111_195 = arith.constant 111 : index
    %157 = vector.load %arg9[%c0_194, %c111_195] : memref<32x640xbf16, #tpu.memory_space<vmem>>, vector<32x384xbf16>
    %c64_196 = arith.constant 64 : index
    %c0_197 = arith.constant 0 : index
    %158 = vector.load %arg11[%c64_196, %c0_197] : memref<288x384xbf16, #tpu.memory_space<vmem>>, vector<32x384xbf16>
    tpu.vector_store %arg11[%c64_196, %c0_197], %157 {strides = array<i32>} : memref<288x384xbf16, #tpu.memory_space<vmem>>, vector<32x384xbf16>,
    %c0_198 = arith.constant 0 : index
    %c127_199 = arith.constant 127 : index
    %159 = vector.load %arg9[%c0_198, %c127_199] : memref<32x640xbf16, #tpu.memory_space<vmem>>, vector<32x384xbf16>
    %c96_200 = arith.constant 96 : index
    %c0_201 = arith.constant 0 : index
    %160 = vector.load %arg11[%c96_200, %c0_201] : memref<288x384xbf16, #tpu.memory_space<vmem>>, vector<32x384xbf16>
    tpu.vector_store %arg11[%c96_200, %c0_201], %159 {strides = array<i32>} : memref<288x384xbf16, #tpu.memory_space<vmem>>, vector<32x384xbf16>,
    %c0_202 = arith.constant 0 : index
    %c128_203 = arith.constant 128 : index
    %161 = vector.load %arg9[%c0_202, %c128_203] : memref<32x640xbf16, #tpu.memory_space<vmem>>, vector<32x384xbf16>
    %c128_204 = arith.constant 128 : index
    %c0_205 = arith.constant 0 : index
    %162 = vector.load %arg11[%c128_204, %c0_205] : memref<288x384xbf16, #tpu.memory_space<vmem>>, vector<32x384xbf16>
    tpu.vector_store %arg11[%c128_204, %c0_205], %161 {strides = array<i32>} : memref<288x384xbf16, #tpu.memory_space<vmem>>, vector<32x384xbf16>,
    %c0_206 = arith.constant 0 : index
    %c129_207 = arith.constant 129 : index
    %163 = vector.load %arg9[%c0_206, %c129_207] : memref<32x640xbf16, #tpu.memory_space<vmem>>, vector<32x384xbf16>
    %c160_208 = arith.constant 160 : index
    %c0_209 = arith.constant 0 : index
    %164 = vector.load %arg11[%c160_208, %c0_209] : memref<288x384xbf16, #tpu.memory_space<vmem>>, vector<32x384xbf16>
    tpu.vector_store %arg11[%c160_208, %c0_209], %163 {strides = array<i32>} : memref<288x384xbf16, #tpu.memory_space<vmem>>, vector<32x384xbf16>,
    %c0_210 = arith.constant 0 : index
    %c145_211 = arith.constant 145 : index
    %165 = vector.load %arg9[%c0_210, %c145_211] : memref<32x640xbf16, #tpu.memory_space<vmem>>, vector<32x384xbf16>
    %c192_212 = arith.constant 192 : index
    %c0_213 = arith.constant 0 : index
    %166 = vector.load %arg11[%c192_212, %c0_213] : memref<288x384xbf16, #tpu.memory_space<vmem>>, vector<32x384xbf16>
    tpu.vector_store %arg11[%c192_212, %c0_213], %165 {strides = array<i32>} : memref<288x384xbf16, #tpu.memory_space<vmem>>, vector<32x384xbf16>,
    %c0_214 = arith.constant 0 : index
    %c146_215 = arith.constant 146 : index
    %167 = vector.load %arg9[%c0_214, %c146_215] : memref<32x640xbf16, #tpu.memory_space<vmem>>, vector<32x384xbf16>
    %c224_216 = arith.constant 224 : index
    %c0_217 = arith.constant 0 : index
    %168 = vector.load %arg11[%c224_216, %c0_217] : memref<288x384xbf16, #tpu.memory_space<vmem>>, vector<32x384xbf16>
    tpu.vector_store %arg11[%c224_216, %c0_217], %167 {strides = array<i32>} : memref<288x384xbf16, #tpu.memory_space<vmem>>, vector<32x384xbf16>,
    %c0_218 = arith.constant 0 : index
    %c147_219 = arith.constant 147 : index
    %169 = vector.load %arg9[%c0_218, %c147_219] : memref<32x640xbf16, #tpu.memory_space<vmem>>, vector<32x384xbf16>
    %c256_220 = arith.constant 256 : index
    %c0_221 = arith.constant 0 : index
    %170 = vector.load %arg11[%c256_220, %c0_221] : memref<288x384xbf16, #tpu.memory_space<vmem>>, vector<32x384xbf16>
    tpu.vector_store %arg11[%c256_220, %c0_221], %169 {strides = array<i32>} : memref<288x384xbf16, #tpu.memory_space<vmem>>, vector<32x384xbf16>,
    %c0_222 = arith.constant 0 : index
    %c0_223 = arith.constant 0 : index
    %171 = vector.load %arg4[%c0_222, %c0_223] : memref<8x288xbf16, #tpu.memory_space<vmem>>, vector<8x288xbf16>
    %c0_224 = arith.constant 0 : index
    %c0_225 = arith.constant 0 : index
    %172 = vector.load %arg11[%c0_224, %c0_225] : memref<288x384xbf16, #tpu.memory_space<vmem>>, vector<288x384xbf16>
    %cst_226 = arith.constant dense<0.000000e+00> : vector<8x384xf32>
    %173 = tpu.matmul %171, %172, %cst_226 {dimension_numbers = #tpu.dot_dimension_numbers<[1], [0], [0], [1], [0, 0, 1, 1], [], []>} : vector<8x288xbf16>, vector<288x384xbf16>, vector<8x384xf32> -> vector<8x384xf32>
    %cst_227 = arith.constant 0.000000e+00 : f32
    %174 = vector.shape_cast %9 : vector<1x384xi1> to vector<1x384xi1>
    %175 = vector.broadcast %174 : vector<1x384xi1> to vector<8x384xi1>
    %176 = vector.broadcast %cst_227 : f32 to vector<8x384xf32>
    %177 = arith.select %175, %173, %176 : vector<8x384xi1>, vector<8x384xf32>
    %c0_228 = arith.constant 0 : index
    %c0_229 = arith.constant 0 : index
    %c0_230 = arith.constant 0 : index
    %178 = vector.load %arg1[%c0_228, %c0_229, %c0_230] : memref<1x16x384xf32, #tpu.memory_space<vmem>>, vector<1x16x384xf32>
    %179 = vector.shape_cast %178 : vector<1x16x384xf32> to vector<16x384xf32>
    %180 = vector.extract_strided_slice %179 {offsets = [0, 0], sizes = [4, 384], strides = [1, 1]} : vector<16x384xf32> to vector<4x384xf32>
    %181 = vector.extract_strided_slice %177 {offsets = [0, 0], sizes = [4, 384], strides = [1, 1]} : vector<8x384xf32> to vector<4x384xf32>
    %182 = arith.subf %180, %181 : vector<4x384xf32>
    %c0_231 = arith.constant 0 : index
    %c0_232 = arith.constant 0 : index
    %c0_233 = arith.constant 0 : index
    %183 = vector.load %arg8[%c0_231, %c0_232, %c0_233] : memref<1x4x384xf32, #tpu.memory_space<vmem>>, vector<1x4x384xf32>
    %184 = vector.shape_cast %183 : vector<1x4x384xf32> to vector<4x384xf32>
    %185 = vector.shape_cast %182 : vector<4x384xf32> to vector<1x4x384xf32>
    tpu.vector_store %arg8[%c0_231, %c0_232, %c0_233], %185 {strides = array<i32>} : memref<1x4x384xf32, #tpu.memory_space<vmem>>, vector<1x4x384xf32>,
    return
  }
  func.func @transform_0(%arg0: i32) -> (i32, i32, i32) {
    %c0_i32 = arith.constant 0 : i32
    %c0_i32_0 = arith.constant 0 : i32
    %c0_i32_1 = arith.constant 0 : i32
    return %arg0, %c0_i32, %c0_i32_0 : i32, i32, i32
  }
  func.func @transform_1(%arg0: i32) -> (i32, i32) {
    %c0_i32 = arith.constant 0 : i32
    %c0_i32_0 = arith.constant 0 : i32
    %c0_i32_1 = arith.constant 0 : i32
    return %c0_i32, %c0_i32_0 : i32, i32
  }
  func.func @transform_2(%arg0: i32) -> (i32, i32, i32) {
    %c0_i32 = arith.constant 0 : i32
    %c0_i32_0 = arith.constant 0 : i32
    %c0_i32_1 = arith.constant 0 : i32
    %c0_i32_2 = arith.constant 0 : i32
    return %c0_i32, %c0_i32_0, %c0_i32_1 : i32, i32, i32
  }
  func.func @transform_3(%arg0: i32) -> (i32, i32) {
    %c0_i32 = arith.constant 0 : i32
    %c0_i32_0 = arith.constant 0 : i32
    %c0_i32_1 = arith.constant 0 : i32
    return %c0_i32, %c0_i32_0 : i32, i32
  }
  func.func @transform_4(%arg0: i32) -> (i32, i32, i32) {
    %c0_i32 = arith.constant 0 : i32
    %c0_i32_0 = arith.constant 0 : i32
    %c0_i32_1 = arith.constant 0 : i32
    %c0_i32_2 = arith.constant 0 : i32
    return %c0_i32, %c0_i32_0, %c0_i32_1 : i32, i32, i32
  }
  func.func @transform_5(%arg0: i32) -> (i32, i32, i32) {
    %c0_i32 = arith.constant 0 : i32
    %c0_i32_0 = arith.constant 0 : i32
    %c0_i32_1 = arith.constant 0 : i32
    %c0_i32_2 = arith.constant 0 : i32
    return %c0_i32, %c0_i32_0, %c0_i32_1 : i32, i32, i32
  }
  func.func @transform_6(%arg0: i32) -> (i32, i32) {
    %c0_i32 = arith.constant 0 : i32
    %c0_i32_0 = arith.constant 0 : i32
    %c0_i32_1 = arith.constant 0 : i32
    return %c0_i32, %c0_i32_0 : i32, i32
  }
  func.func @transform_7(%arg0: i32) -> (i32, i32, i32) {
    %c0_i32 = arith.constant 0 : i32
    %c0_i32_0 = arith.constant 0 : i32
    %c0_i32_1 = arith.constant 0 : i32
    return %arg0, %c0_i32, %c0_i32_0 : i32, i32, i32
  }
}

</mosaic_0001>

<bundles_post_ra>
// kernel: tpu_custom_call.1
= control target key start
LH: loop header
LB: loop body
LE: loop exit
PB: predicated region body
PF: predicated region fallthrough
CT: control target
= control target key end

     0   :  { %s9530_s0 = inlined_call_operand.hbm [shape: f32[2,16,384], index: 0, kind: input, shape index: {}]   ;;  %s9531_s1 = inlined_call_operand.vmem [shape: bf16[32,144], index: 1, kind: input, shape index: {}]   ;;  %s9532_s2 = inlined_call_operand.vmem [shape: bf16[3,32,288], index: 2, kind: input, shape index: {}]   ;;  %s9533_s3 = inlined_call_operand.vmem [shape: bf16[8,288], index: 3, kind: input, shape index: {}]   ;;  %s9534_s4 = inlined_call_operand.vmem [shape: f32[3,32,1], index: 4, kind: input, shape index: {}]   ;;  %s9535_s5 = inlined_call_operand.vmem [shape: f32[3,32,1], index: 5, kind: input, shape index: {}]   ;;  %s9536_s6 = inlined_call_operand.vmem [shape: f32[1,384], index: 6, kind: input, shape index: {}]   ;;  %s9537_s7 = inlined_call_operand.hbm [shape: f32[2,4,384], index: 7, kind: output, shape index: {}]  }
   0x1   :  { %9573 = sst [smem:[#allocation11_spill]] %s9530_s0 }
   0x2   :  { %9574 = sst [smem:[#allocation12_spill]] %s9531_s1 }
   0x3   :  { %9575 = sst [smem:[#allocation13_spill]] %s9536_s6 }
   0x4   :  { %12 = vsyncpa [#allocation6], 0 }
   0x5   :  { %14 = vsyncpa [#allocation6 + $0x1], 0 }
   0x6   :  { %15 = vsyncpa [#allocation7], 0 }
   0x7   :  { %17 = vsyncpa [#allocation7 + $0x1], 0  ;;  %s7093_s24 = smov 0   ;;  %s7095_s25 = smov 0  }
   0x8   :  { %s7097_s26 = smov 0   ;;  %s7099_s27 = smov 0  }
   0x9 LB: > { %s7114_s28 = sadd.s32 4294967295, %s7035_s27   ;;  %s6186_s29 = sadd.s32 4294967294, %s7035_s27   ;;  %s7035_s27 = sphi %s7099_s27, %s9619_s27   ;;  %s7031_s26 = sphi %s7097_s26, %s9618_s26   ;;  %s7027_s25 = sphi %s7095_s25, %s9617_s25   ;;  %s7023_s24 = sphi %s7093_s24, %s9616_s24  }
   0xa   : > { %s7118_s30 = sadd.s32 1, %s7035_s27   ;;  %s30_s8 = sadd.s32 1, %s7031_s26 }
   0xb   : > { %s27_s9 = ssub.s32 %s7035_s27, %s7118_s30  ;;  %p37_p0 = scmp.ne.s32.totalorder %s7031_s26, %s7027_s25 }
   0xc   : > { %p28_p1 = scmp.eq.s32.totalorder %s27_s9, 0  ;;  %p38_p2 = scmp.eq.s32.totalorder %s7035_s27, 0 }
   0xd   : > { %p43_p3 = scmp.ne.s32.totalorder %s7027_s25, %s7023_s24  ;;  %p44_p4 = scmp.eq.s32.totalorder %s7114_s28, 0 }
   0xe   : > { %s7130_s10 = scalar_select %p28_p1, %s7031_s26, %s30_s8  }
   0xf   : > { %p39_p5 = por %p38_p2, %p37_p0  ;;  %p7132_p6 = por %p44_p4, %p43_p3 }
  0x10   : > { %p193_p7 = scmp.eq.s32.totalorder %s7114_s28, 1  ;;  %p199_p8 = scmp.eq.s32.totalorder %s6186_s29, 1 }
  0x11   : > { %s9576_s11 = scalar_select %p7132_p6, 1, 0 }
  0x12   : > { %p6755_p10 = scmp.lt.s32.totalorder %s7035_s27, 2  ;;  %p7139_p11 = por %p193_p7, %p37_p0 }
  0x13   : > { %p7143_p12 = por %p199_p8, %p43_p3  ;;  %s237_s14 = sand.u32 1, %s7031_s26  }
  0x14   : > { %s9577_s12 = scalar_select %p7139_p11, 1, 0 }
  0x15   : > { %s9578_s13 = scalar_select %p7143_p12, 1, 0 }
  0x16   : > { %s6739_s15 = smul.u32 768, %s7035_s27  ;;  %s9579_s0 = sld [smem:[#allocation11_spill]] }
  0x17   : > { %s6738_s16 = smul.u32 48, %s237_s14  ;;  %p7154_p13 = pnand %p6755_p10, %p39_p5 }
  0x18   : > { %s7160_s23 = scalar_lea.sflag [#allocation6], %s237_s14 }
  0x19   : > { %s241_s21 = scalar_lea.vmem [#allocation5], %s6738_s16  ;;  %p6945_p1 = pneg %p7154_p13 }
  0x1a   : > { %s248_s22 = sshll.u32 %s241_s21, 4  ;;  %s7158_s22 = int_to_ptr.vmem [resolvable:$true] %s248_s22 }
  0x1c   : > { %s7152_s19 = scalar_lea.hbm %s9579_s0, %s6739_s15  ;;  %s6948_s15 = scalar_lea.hbm %s9579_s0, 1536 }
  0x1d   : > { %s6943_s29 = scalar_lea.hbm %s7152_s19, 768  ;;  %p6949_p4 = scmp.lt.s32.totalorder %s7152_s19, %s9579_s0 }
  0x1e   : > { %p6944_p0 = scmp.ne.s32.totalorder %s7152_s19, %s6943_s29  ;;  %p6950_p5 = scmp.lt.s32.totalorder %s6948_s15, %s6943_s29 }
  0x20   : > { %p6946_p2 = pnand %p6945_p1, %p6944_p0  ;;  %p6951_p7 = por %p6950_p5, %p6949_p4 }
  0x22   : > { %p6947_p3 = pneg %p6946_p2 }
  0x24   : > { %p6952_p8 = pnand %p6951_p7, %p6947_p3 }
  0x26   : > { %6955 = shalt.err (!%p6952_p8)
}
  0x27   : > { %s6956_s14 = scalar_lea.vmem %s7158_s22, 768  ;;  %s7037_s16 = smov [#allocation5]  }
  0x28   : > { %p6957_p10 = scmp.ne.s32.totalorder %s7158_s22, %s6956_s14  ;;  %s6961_s21 = sshll.u32 %s7037_s16, 4  ;;  %s6962_s21 = int_to_ptr.vmem [resolvable:$false] %s6961_s21 }
  0x29   : > { %s6963_s8 = scalar_lea.vmem %s6962_s21, 1536  ;;  %p6964_p2 = scmp.lt.s32.totalorder %s7158_s22, %s6962_s21 }
  0x2a   : > { %p6959_p9 = pnand %p6957_p10, %p6945_p1  ;;  %p6965_p12 = scmp.lt.s32.totalorder %s6963_s8, %s6956_s14 }
  0x2c   : > { %p6960_p0 = pneg %p6959_p9  ;;  %p6966_p11 = por %p6965_p12, %p6964_p2 }
  0x2e   : > { %p6967_p6 = pnand %p6966_p11, %p6960_p0 }
  0x30   : > { %6970 = shalt.err (!%p6967_p6)
}
  0x31   : > { %s7038_s29 = smov 384   ;;  %s7039_s9 = smov 24  }
  0x32   : > { %6750 = dma.hbm_to_vmem [thread:$0]  (!%p7154_p13), %s7152_s19, 768, %s7158_s22, %s7160_s23, %s7038_s29, %s7038_s29, %s7039_s9  }
  0x33   : > { %p6190_p9 = scmp.ge.s32.totalorder %s7035_s27, 1  ;;  %p256_p1 = scmp.lt.s32.totalorder %s7035_s27, 3 }
  0x35   : > { %p257_p3 = pnand %p6190_p9, %p256_p1 }
  0x36   : > { %s7184_s15 = sand.u32 (!%p257_p3), 1, %s7027_s25   ;;  %p9581_p6 = scmp.ne.s32.totalorder (!%p257_p3), %s9576_s11, 0 }
  0x37   : > { %260 = sbr.rel (%p257_p3) target bundleno = 2409 (0x969), region = 48  ;;  %s263_s18 = scalar_lea.sflag (!%p257_p3), [#allocation6], %s7184_s15 }
  0x38   : > { %s6740_s17 = smul.u32 (!%p257_p3), 48, %s7184_s15 }
  0x3a   : > { %s7188_s14 = scalar_lea.vmem (!%p257_p3), [#allocation5], %s6740_s17 }
  0x3c   : > { %7014 = dma.done.wait (%p9581_p6), %s263_s18, 768  }
  0x3d   : > { %7016 = vsyncadd (%p9581_p6), %s263_s18, 4294966528  ;;  %s6741_s19 = smul.u32 12, %s7184_s15  ;;  %p6191_p11 = scmp.ne.s32.totalorder %s7114_s28, 0 }
  0x3f   : > { %s7195_s20 = scalar_lea.vmem [#allocation8], %s6741_s19  ;;  %301 = sbr.rel (%p6191_p11) target bundleno = 81 (0x51), region = 56 }
  0x44   : > { %v7040_v0 = vmov 0  }
  0x45   : > { %302 = vst [vmem:[#allocation2] sm:$0xff] %v7040_v0  ;;  %303 = vst [vmem:[#allocation2 + $0x8] sm:$0xff] %v7040_v0 }
  0x46   : > { %304 = vst [vmem:[#allocation2 + $0x10] sm:$0xf] %v7040_v0  ;;  %305 = vst [vmem:[#allocation2 + $0x14] sm:$0xff] %v7040_v0 }
  0x47   : > { %306 = vst [vmem:[#allocation2 + $0x1c] sm:$0xff] %v7040_v0  ;;  %307 = vst [vmem:[#allocation2 + $0x24] sm:$0xf] %v7040_v0 }
  0x48   : > { %308 = vst [vmem:[#allocation2 + $0x28] sm:$0xff] %v7040_v0  ;;  %309 = vst [vmem:[#allocation2 + $0x30] sm:$0xff] %v7040_v0 }
  0x49   : > { %310 = vst [vmem:[#allocation2 + $0x38] sm:$0xf] %v7040_v0  ;;  %311 = vst [vmem:[#allocation2 + $0x3c] sm:$0xff] %v7040_v0 }
  0x4a   : > { %312 = vst [vmem:[#allocation2 + $0x44] sm:$0xff] %v7040_v0  ;;  %313 = vst [vmem:[#allocation2 + $0x4c] sm:$0xf] %v7040_v0 }
  0x4b   : > { %314 = vst [vmem:[#allocation3] sm:$0xff] %v7040_v0  ;;  %315 = vst [vmem:[#allocation3 + $0x8] sm:$0xff] %v7040_v0 }
  0x4c   : > { %316 = vst [vmem:[#allocation3 + $0x10] sm:$0xf] %v7040_v0  ;;  %317 = vst [vmem:[#allocation3 + $0x14] sm:$0xff] %v7040_v0 }
  0x4d   : > { %318 = vst [vmem:[#allocation3 + $0x1c] sm:$0xff] %v7040_v0  ;;  %319 = vst [vmem:[#allocation3 + $0x24] sm:$0xf] %v7040_v0 }
  0x4e   : > { %320 = vst [vmem:[#allocation3 + $0x28] sm:$0xff] %v7040_v0  ;;  %321 = vst [vmem:[#allocation3 + $0x30] sm:$0xff] %v7040_v0 }
  0x4f   : > { %322 = vst [vmem:[#allocation3 + $0x38] sm:$0xf] %v7040_v0  ;;  %323 = vst [vmem:[#allocation3 + $0x3c] sm:$0xff] %v7040_v0 }
  0x50   : > { %324 = vst [vmem:[#allocation3 + $0x44] sm:$0xff] %v7040_v0  ;;  %325 = vst [vmem:[#allocation3 + $0x4c] sm:$0xf] %v7040_v0 }
  0x51 PF: > { %v7199_v1 = vld [vmem:[%s7188_s14 + $0x18] sm:$0xff]  ;;  %v7202_v2 = vld [vmem:[%s7188_s14 + $0x20] sm:$0xff]  ;;  %v7212_v5 = vld [vmem:[%s7188_s14 + $0x8] sm:$0xff]  ;;  %s9552_s11 = smov 110   ;;  %v9557_v11 = vmov 0   ;;  %s9542_s22 = smov 111  }
  0x52   : > { %v7205_v3 = vld [vmem:[%s7188_s14] sm:$0xff]  ;;  %v7209_v4 = vpack.c.bf16 %v7202_v2, %v7199_v1  ;;  %v331_v6 = vld [vmem:[%s7188_s14 + $0x28] sm:$0xff]  ;;  %v328_v7 = vld [vmem:[%s7188_s14 + $0x10] sm:$0xff]  ;;  %909 = vmatprep.subr.bf16.mxu1 %v9557_v11  ;;  %6804 = vset.pattern.permute.xlu1 %v9557_v11  ;;  %s9540_s23 = smov 127   ;;  %s9550_s16 = smov 1   ;;  %vm849_vm0 = vcmask 130048  }
  0x53   : > { %v6549_v8 = vpack.c.bf16 %v7212_v5, %v7205_v3  ;;  %v6552_v9 = vpack.c.bf16 %v331_v6, %v331_v6  ;;  %v6550_v10 = vpack.c.bf16 %v328_v7, %v328_v7  ;;  %6803 = vset.pattern.permute.xlu0 %v9557_v11  ;;  %s9548_s21 = smov 17   ;;  %s9546_s8 = smov 18   ;;  %vm378_vm1 = vcmask 1043456  }
  0x54   : > { %354 = vst [vmem:[#allocation2 + $0x18] sm:$0xff] %v7209_v4  ;;  %589 = vrot.lane.b32.xlu1 %v7209_v4, %s9552_s11  ;;  %s9544_s29 = smov 19   ;;  %s9582_s1 = sld [smem:[#allocation12_spill]]  ;;  %vm598_vm2 = vcmask 900096   ;;  %vm563_vm3 = vcmask 908288   ;;  %vm528_vm4 = vcmask 1039360  }
  0x55   : > { %352 = vst [vmem:[#allocation2 + $0x4] sm:$0xff] %v6549_v8  ;;  %585 = vrot.lane.b32.xlu0 %v6549_v8, %s9552_s11  ;;  %355 = vst [vmem:[#allocation2 + $0x20] sm:$0xf] %v6552_v9  ;;  %s9554_s18 = smov 109   ;;  %vm485_vm5 = vcmask 7168   ;;  %vm450_vm6 = vcmask 138240  }
  0x56   : > { %353 = vst [vmem:[#allocation2 + $0xc] sm:$0xf] %v6550_v10  ;;  %vm415_vm7 = vcmask 146432   ;;  %vm380_vm8 = vcmask 154624   ;;  %vm633_vm9 = vcmask 891904   ;;  %s9583_s6 = sld [smem:[#allocation13_spill]] }
  0x57   : > { %s9586_s9 = smov 127   ;;  %vm2004_vm14 = vcmask 261120   ;;  %s9598_s17 = smov 18   ;;  %vm7051_vm15 = vmmov 0  }
  0x58   : > { %p9613_p13 = scmp.ne.s32.totalorder %s9577_s12, 0 }
  0x5a   : > { %v6816_v20 = vld [vmem:[%s9582_s1 + $0x4] ss:$8 sps:$4 sm:$0xff]  }
  0x5b   : > { %v466_v19 = vld [vmem:[#allocation2 + $0x14] sm:$0xff]  ;;  %6229 = vmatprep.mubr.msk.bf16.mxu1 %vm849_vm0, %v6816_v20  ;;  %6227 = vmatprep.mubr.msk.bf16.mxu0 %vm849_vm0, %v6816_v20  ;;  %v6942_v20 = vpack.c.bf16 %v7199_v1, %v7205_v3 }
  0x5c   : > { %v580_v12 = vld [vmem:[#allocation2 + $0x20] sm:$0xff] }
  0x5d   : > { %v578_v13 = vld [vmem:[#allocation2 + $0xc] sm:$0xff]  ;;  %591 = vrot.lane.b32.xlu1 %v580_v12, %s9552_s11  ;;  %v502_v15 = vld [vmem:[#allocation2 + $0x20] sm:$0xf] }
  0x5e   : > { %587 = vrot.lane.b32.xlu0 %v578_v13, %s9552_s11  ;;  %v500_v14 = vld [vmem:[#allocation2 + $0xc] sm:$0xf]  ;;  %506 = vst [vmem:[#allocation4 + $0x74] sm:$0xf] %v502_v15  ;;  %v464_v17 = vld [vmem:[#allocation2] sm:$0xff] }
  0x5f   : > { %504 = vst [vmem:[#allocation4 + $0x68] sm:$0xf] %v500_v14  ;;  %v465_v16 = vld [vmem:[#allocation2 + $0x8] sm:$0xff]  ;;  %v467_v18 = vld [vmem:[#allocation2 + $0x1c] sm:$0xff] }
  0x61   : > { %552 = vrot.lane.b32.xlu1 %v578_v13, %s9542_s22 }
  0x62   : > { %550 = vrot.lane.b32.xlu0 %v6549_v8, %s9542_s22 }
  0x65   : > { %556 = vrot.lane.b32.xlu1 %v580_v12, %s9542_s22 }
  0x66   : > { %554 = vrot.lane.b32.xlu0 %v7209_v4, %s9542_s22  ;;  %s9584_s22 = smov 19  }
  0x69   : > { %517 = vrot.lane.b32.xlu1 %v578_v13, %s9540_s23 }
  0x6a   : > { %515 = vrot.lane.b32.xlu0 %v6549_v8, %s9540_s23 }
  0x6d   : > { %521 = vrot.lane.b32.xlu1 %v580_v12, %s9540_s23 }
  0x6e   : > { %519 = vrot.lane.b32.xlu0 %v7209_v4, %s9540_s23  ;;  %s9597_s23 = smov 17  }
  0x71   : > { %474 = vrot.lane.b32.xlu1 %v465_v16, %s9550_s16 }
  0x72   : > { %472 = vrot.lane.b32.xlu0 %v464_v17, %s9550_s16 }
  0x75   : > { %478 = vrot.lane.b32.xlu1 %v467_v18, %s9550_s16 }
  0x76   : > { %476 = vrot.lane.b32.xlu0 %v466_v19, %s9550_s16 }
  0x79   : > { %439 = vrot.lane.b32.xlu1 %v465_v16, %s9548_s21 }
  0x7a   : > { %437 = vrot.lane.b32.xlu0 %v464_v17, %s9548_s21 }
  0x7d   : > { %443 = vrot.lane.b32.xlu1 %v467_v18, %s9548_s21 }
  0x7e   : > { %441 = vrot.lane.b32.xlu0 %v466_v19, %s9548_s21 }
  0x81   : > { %404 = vrot.lane.b32.xlu1 %v465_v16, %s9546_s8 }
  0x82   : > { %402 = vrot.lane.b32.xlu0 %v464_v17, %s9546_s8 }
  0x85   : > { %408 = vrot.lane.b32.xlu1 %v467_v18, %s9546_s8 }
  0x86   : > { %406 = vrot.lane.b32.xlu0 %v466_v19, %s9546_s8 }
  0x89   : > { %368 = vrot.lane.b32.xlu1 %v465_v16, %s9544_s29 }
  0x8a   : > { %366 = vrot.lane.b32.xlu0 %v464_v17, %s9544_s29 }
  0x8d   : > { %372 = vrot.lane.b32.xlu1 %v467_v18, %s9544_s29 }
  0x8e   : > { %370 = vrot.lane.b32.xlu0 %v466_v19, %s9544_s29  ;;  %s9585_s29 = smov 111  }
  0x91   : > { %622 = vrot.lane.b32.xlu1 %v578_v13, %s9554_s18 }
  0x92   : > { %620 = vrot.lane.b32.xlu0 %v6549_v8, %s9554_s18 }
  0x95   : > { %626 = vrot.lane.b32.xlu1 %v580_v12, %s9554_s18  ;;  %v6941_v12 = vpack.c.bf16 %v7202_v2, %v7212_v5 }
  0x96   : > { %624 = vrot.lane.b32.xlu0 %v7209_v4, %s9554_s18 }
  0xc6   : > { %v590_v21 = vpop.permute.xlu1 %589 }
  0xc7   : > { %v586_v22 = vpop.permute.xlu0 %585  ;;  %v595_v26 = vrot.slane %v590_v21, 4 }
  0xc8   : > { %v593_v23 = vrot.slane %v586_v22, 4 }
  0xcf   : > { %v592_v24 = vpop.permute.xlu1 %591 }
  0xd0   : > { %v588_v25 = vpop.permute.xlu0 %587  ;;  %v596_v27 = vrot.slane %v592_v24, 4 }
  0xd1   : > { %v594_v28 = vrot.slane %v588_v25, 4 }
  0xd2   : > { %v601_v29 = vsel %vm378_vm1, %v595_v26, %v596_v27  ;;  %v603_v30 = vsel %vm598_vm2, %v592_v24, %v596_v27 }
  0xd3   : > { %v597_v31 = vsel %vm378_vm1, %v593_v23, %v594_v28  ;;  %v600_v32 = vsel %vm598_vm2, %v588_v25, %v594_v28  ;;  %v602_v33 = vsel %vm598_vm2, %v590_v21, %v601_v29  ;;  %611 = vst [vmem:[#allocation4 + $0xbc] sm:$0xf] %v603_v30  ;;  %v553_v35 = vpop.permute.xlu1 %552  ;;  %v6808_v29 = vld [vmem:[#allocation4 + $0x68] ss:$12 sps:$4 sm:$0xff]  }
  0xd4   : > { %v599_v34 = vsel %vm598_vm2, %v586_v22, %v597_v31  ;;  %609 = vst [vmem:[#allocation4 + $0xb0] sm:$0xf] %v600_v32  ;;  %v551_v36 = vpop.permute.xlu0 %550  ;;  %v559_v37 = vrot.slane %v553_v35, 4 }
  0xd5   : > { %v558_v38 = vrot.slane %v551_v36, 4  ;;  %v6222_v39 = vcombine.high %v599_v34, %v602_v33  ;;  %v6221_v40 = vcombine.low %v599_v34, %v602_v33 }
  0xd6   : > { %v565_v41 = vsel %vm563_vm3, %v553_v35, %v559_v37 }
  0xd7   : > { %856 = vmatprep.subr.bf16.mxu0 %v6222_v39  ;;  %574 = vst [vmem:[#allocation4 + $0x98] sm:$0xf] %v565_v41  ;;  %v557_v42 = vpop.permute.xlu1 %556  ;;  %v562_v44 = vsel %vm378_vm1, %v558_v38, %v559_v37 }
  0xd8   : > { %v555_v43 = vpop.permute.xlu0 %554  ;;  %857 = vmatpush1.bf16.msra.mxu0 %v6221_v40  ;;  %v561_v45 = vrot.slane %v557_v42, 4  ;;  %v564_v50 = vsel %vm563_vm3, %v551_v36, %v562_v44 }
  0xd9   : > { %v560_v46 = vrot.slane %v555_v43, 4 }
  0xda   : > { %v568_v47 = vsel %vm563_vm3, %v557_v42, %v561_v45 }
  0xdb   : > { %v566_v48 = vsel %vm378_vm1, %v560_v46, %v561_v45  ;;  %v6805_v49 = vld [vmem:[#allocation4 + $0xb0] ss:$12 sps:$4 sm:$0xff]   ;;  %576 = vst [vmem:[#allocation4 + $0xa4] sm:$0xf] %v568_v47  ;;  %v518_v52 = vpop.permute.xlu1 %517 }
  0xdc   : > { %v567_v51 = vsel %vm563_vm3, %v555_v43, %v566_v48  ;;  %v516_v53 = vpop.permute.xlu0 %515  ;;  %v524_v54 = vrot.slane %v518_v52, 4  ;;  %910 = vmatpush1.bf16.msra.mxu1 %v6805_v49 }
  0xdd   : > { %v523_v55 = vrot.slane %v516_v53, 4  ;;  %v6219_v56 = vcombine.high %v564_v50, %v567_v51  ;;  %v6218_v57 = vcombine.low %v564_v50, %v567_v51  ;;  %911 = vmatprep.subr.bf16.mxu1 %v9557_v11 }
  0xde   : > { %v530_v58 = vsel %vm528_vm4, %v518_v52, %v524_v54 }
  0xdf   : > { %858 = vmatprep.subr.bf16.mxu0 %v6219_v56  ;;  %539 = vst [vmem:[#allocation4 + $0x80] sm:$0xf] %v530_v58  ;;  %v522_v59 = vpop.permute.xlu1 %521  ;;  %v527_v61 = vsel %vm378_vm1, %v523_v55, %v524_v54 }
  0xe0   : > { %v520_v60 = vpop.permute.xlu0 %519  ;;  %859 = vmatpush1.bf16.msra.mxu0 %v6218_v57  ;;  %v526_v62 = vrot.slane %v522_v59, 4  ;;  %v529_v7 = vsel %vm528_vm4, %v516_v53, %v527_v61 }
  0xe1   : > { %v525_v63 = vrot.slane %v520_v60, 4 }
  0xe2   : > { %v533_v0 = vsel %vm528_vm4, %v522_v59, %v526_v62  ;;  %v6806_v6 = vld [vmem:[#allocation4 + $0x98] ss:$12 sps:$4 sm:$0xff]  }
  0xe3   : > { %v531_v4 = vsel %vm378_vm1, %v525_v63, %v526_v62  ;;  %541 = vst [vmem:[#allocation4 + $0x8c] sm:$0xf] %v533_v0  ;;  %v475_v9 = vpop.permute.xlu1 %474  ;;  %912 = vmatpush1.bf16.msra.mxu1 %v6806_v6 }
  0xe4   : > { %v532_v8 = vsel %vm528_vm4, %v520_v60, %v531_v4  ;;  %v473_v10 = vpop.permute.xlu0 %472  ;;  %v481_v13 = vrot.slane %v475_v9, 4  ;;  %913 = vmatprep.subr.bf16.mxu1 %v9557_v11 }
  0xe5   : > { %v480_v14 = vrot.slane %v473_v10, 4  ;;  %v6216_v15 = vcombine.high %v529_v7, %v532_v8  ;;  %v6215_v16 = vcombine.low %v529_v7, %v532_v8 }
  0xe6   : > { %v487_v17 = vsel %vm485_vm5, %v475_v9, %v481_v13 }
  0xe7   : > { %860 = vmatprep.subr.bf16.mxu0 %v6216_v15  ;;  %496 = vst [vmem:[#allocation4 + $0x50] sm:$0xf] %v487_v17  ;;  %v479_v18 = vpop.permute.xlu1 %478  ;;  %v484_v21 = vsel %vm378_vm1, %v480_v14, %v481_v13 }
  0xe8   : > { %v477_v19 = vpop.permute.xlu0 %476  ;;  %861 = vmatpush1.bf16.msra.mxu0 %v6215_v16  ;;  %v483_v2 = vrot.slane %v479_v18, 4  ;;  %v486_v25 = vsel %vm485_vm5, %v473_v10, %v484_v21 }
  0xe9   : > { %v482_v5 = vrot.slane %v477_v19, 4  ;;  %862 = vmatprep.subr.bf16.mxu0 %v6941_v12 }
  0xea   : > { %v490_v22 = vsel %vm485_vm5, %v479_v18, %v483_v2  ;;  %v6807_v24 = vld [vmem:[#allocation4 + $0x80] ss:$12 sps:$4 sm:$0xff]  }
  0xeb   : > { %v488_v23 = vsel %vm378_vm1, %v482_v5, %v483_v2  ;;  %498 = vst [vmem:[#allocation4 + $0x5c] sm:$0xf] %v490_v22  ;;  %v440_v27 = vpop.permute.xlu1 %439  ;;  %914 = vmatpush1.bf16.msra.mxu1 %v6807_v24 }
  0xec   : > { %v489_v26 = vsel %vm485_vm5, %v477_v19, %v488_v23  ;;  %v438_v28 = vpop.permute.xlu0 %437  ;;  %863 = vmatpush1.bf16.msra.mxu0 %v6942_v20  ;;  %v446_v1 = vrot.slane %v440_v27, 4  ;;  %915 = vmatprep.subr.bf16.mxu1 %v9557_v11 }
  0xed   : > { %v445_v3 = vrot.slane %v438_v28, 4  ;;  %v6210_v30 = vcombine.high %v486_v25, %v489_v26  ;;  %v6209_v31 = vcombine.low %v486_v25, %v489_v26 }
  0xee   : > { %v452_v32 = vsel %vm450_vm6, %v440_v27, %v446_v1 }
  0xef   : > { %864 = vmatprep.subr.bf16.mxu0 %v6210_v30  ;;  %461 = vst [vmem:[#allocation4 + $0x38] sm:$0xf] %v452_v32  ;;  %v444_v33 = vpop.permute.xlu1 %443  ;;  %v449_v35 = vsel %vm378_vm1, %v445_v3, %v446_v1  ;;  %916 = vmatpush1.bf16.msra.mxu1 %v6808_v29 }
  0xf0   : > { %v442_v34 = vpop.permute.xlu0 %441  ;;  %865 = vmatpush1.bf16.msra.mxu0 %v6209_v31  ;;  %v448_v36 = vrot.slane %v444_v33, 4  ;;  %917 = vmatprep.subr.bf16.mxu1 %v9557_v11  ;;  %v451_v41 = vsel %vm450_vm6, %v438_v28, %v449_v35 }
  0xf1   : > { %v447_v37 = vrot.slane %v442_v34, 4 }
  0xf2   : > { %v455_v38 = vsel %vm450_vm6, %v444_v33, %v448_v36  ;;  %v6809_v40 = vld [vmem:[#allocation4 + $0x50] ss:$12 sps:$4 sm:$0xff]   ;;  %v6814_v33 = vld [vmem:[%s9582_s1] ss:$8 sps:$4 sm:$0xff]  }
  0xf3   : > { %v453_v39 = vsel %vm378_vm1, %v447_v37, %v448_v36  ;;  %463 = vst [vmem:[#allocation4 + $0x44] sm:$0xf] %v455_v38  ;;  %v405_v43 = vpop.permute.xlu1 %404  ;;  %918 = vmatpush1.bf16.msra.mxu1 %v6809_v40  ;;  %v6819_v36 = vld [vmem:[%s9582_s1 + $0x10] ss:$8 sps:$4 sm:$0xff]   ;;  %v971_v37 = vlaneseq  ;;  %v356_v38 = vld [vmem:[%s9583_s6] sm:$0x7] }
  0xf4   : > { %v454_v42 = vsel %vm450_vm6, %v442_v34, %v453_v39  ;;  %v403_v44 = vpop.permute.xlu0 %402  ;;  %v411_v45 = vrot.slane %v405_v43, 4  ;;  %919 = vmatprep.subr.bf16.mxu1 %v9557_v11  ;;  %v6817_v34 = vld [vmem:[%s9582_s1 + $0x14] ss:$8 sps:$4 sm:$0xff]   ;;  %vm357_vm10 = vcmp.gt.f32.partialorder %v356_v38, 0.5 }
  0xf5   : > { %v410_v46 = vrot.slane %v403_v44, 4  ;;  %v6207_v47 = vcombine.high %v451_v41, %v454_v42  ;;  %v6206_v48 = vcombine.low %v451_v41, %v454_v42  ;;  %v972_v39 = vshrl.u32 %v971_v37, 7 }
  0xf6   : > { %v417_v49 = vsel %vm415_vm7, %v405_v43, %v411_v45  ;;  %v970_v41 = vsel %vm357_vm10, 1, %v9557_v11 }
  0xf7   : > { %866 = vmatprep.subr.bf16.mxu0 %v6207_v47  ;;  %426 = vst [vmem:[#allocation4 + $0x20] sm:$0xf] %v417_v49  ;;  %v409_v50 = vpop.permute.xlu1 %408  ;;  %v414_v52 = vsel %vm378_vm1, %v410_v46, %v411_v45  ;;  %v973_v40 = vsub.s32 0, %v972_v39  ;;  %v977_v42 = vsub.s32 1, %v972_v39 }
  0xf8   : > { %v407_v51 = vpop.permute.xlu0 %406  ;;  %867 = vmatpush1.bf16.msra.mxu0 %v6206_v48  ;;  %v413_v53 = vrot.slane %v409_v50, 4  ;;  %v416_v58 = vsel %vm415_vm7, %v403_v44, %v414_v52  ;;  %v981_v44 = vsub.s32 2, %v972_v39 }
  0xf9   : > { %v412_v54 = vrot.slane %v407_v51, 4  ;;  %v7339_v43 = vrot.slane %v970_v41, %v973_v40  ;;  %v7341_v45 = vrot.slane %v970_v41, %v977_v42 }
  0xfa   : > { %v420_v55 = vsel %vm415_vm7, %v409_v50, %v413_v53  ;;  %v6810_v57 = vld [vmem:[#allocation4 + $0x38] ss:$12 sps:$4 sm:$0xff]   ;;  %v7344_v47 = vrot.slane %v970_v41, %v981_v44 }
  0xfb   : > { %v418_v56 = vsel %vm378_vm1, %v412_v54, %v413_v53  ;;  %428 = vst [vmem:[#allocation4 + $0x2c] sm:$0xf] %v420_v55  ;;  %v369_v60 = vpop.permute.xlu1 %368  ;;  %920 = vmatpush1.bf16.msra.mxu1 %v6810_v57  ;;  %vm983_vm11 = vcmp.eq.s32.totalorder %v7339_v43, 1  ;;  %vm984_vm12 = vcmp.eq.s32.totalorder %v7341_v45, 1 }
  0xfc   : > { %v419_v59 = vsel %vm415_vm7, %v407_v51, %v418_v56  ;;  %v367_v61 = vpop.permute.xlu0 %366  ;;  %v375_v62 = vrot.slane %v369_v60, 4  ;;  %921 = vmatprep.subr.bf16.mxu1 %v9557_v11  ;;  %vm985_vm13 = vcmp.eq.s32.totalorder %v7344_v47, 1 }
  0xfd   : > { %v374_v63 = vrot.slane %v367_v61, 4  ;;  %v6204_v0 = vcombine.high %v416_v58, %v419_v59  ;;  %v6203_v4 = vcombine.low %v416_v58, %v419_v59 }
  0xfe   : > { %v382_v6 = vsel %vm380_vm8, %v369_v60, %v375_v62 }
  0xff   : > { %868 = vmatprep.subr.bf16.mxu0 %v6204_v0  ;;  %391 = vst [vmem:[#allocation4 + $0x8] sm:$0xf] %v382_v6  ;;  %v373_v7 = vpop.permute.xlu1 %372  ;;  %v379_v9 = vsel %vm378_vm1, %v374_v63, %v375_v62 }
 0x100   : > { %v371_v8 = vpop.permute.xlu0 %370  ;;  %869 = vmatpush1.bf16.msra.mxu0 %v6203_v4  ;;  %v377_v10 = vrot.slane %v373_v7, 4  ;;  %v381_v16 = vsel %vm380_vm8, %v367_v61, %v379_v9 }
 0x101   : > { %v376_v12 = vrot.slane %v371_v8, 4 }
 0x102   : > { %v385_v13 = vsel %vm380_vm8, %v373_v7, %v377_v10  ;;  %v6811_v15 = vld [vmem:[#allocation4 + $0x20] ss:$12 sps:$4 sm:$0xff]  }
 0x103   : > { %v383_v14 = vsel %vm378_vm1, %v376_v12, %v377_v10  ;;  %393 = vst [vmem:[#allocation4 + $0x14] sm:$0xf] %v385_v13  ;;  %v623_v18 = vpop.permute.xlu1 %622  ;;  %922 = vmatpush1.bf16.msra.mxu1 %v6811_v15 }
 0x104   : > { %v384_v17 = vsel %vm380_vm8, %v371_v8, %v383_v14  ;;  %v621_v19 = vpop.permute.xlu0 %620  ;;  %v629_v20 = vrot.slane %v623_v18, 4  ;;  %923 = vmatprep.subr.bf16.mxu1 %v9557_v11 }
 0x105   : > { %v628_v21 = vrot.slane %v621_v19, 4  ;;  %v6201_v2 = vcombine.high %v381_v16, %v384_v17  ;;  %v6200_v5 = vcombine.low %v381_v16, %v384_v17 }
 0x106   : > { %v635_v22 = vsel %vm633_vm9, %v623_v18, %v629_v20 }
 0x107   : > { %870 = vmatprep.subr.bf16.mxu0 %v6201_v2  ;;  %644 = vst [vmem:[#allocation4 + $0xc8] sm:$0xf] %v635_v22  ;;  %v627_v23 = vpop.permute.xlu1 %626  ;;  %v632_v25 = vsel %vm378_vm1, %v628_v21, %v629_v20 }
 0x108   : > { %v625_v24 = vpop.permute.xlu0 %624  ;;  %871 = vmatpush1.bf16.msra.mxu0 %v6200_v5  ;;  %v631_v26 = vrot.slane %v627_v23, 4  ;;  %v634_v29 = vsel %vm633_vm9, %v621_v19, %v632_v25 }
 0x109   : > { %v630_v27 = vrot.slane %v625_v24, 4 }
 0x10a   : > { %v638_v28 = vsel %vm633_vm9, %v627_v23, %v631_v26  ;;  %v6812_v3 = vld [vmem:[#allocation4 + $0x8] ss:$12 sps:$4 sm:$0xff]  }
 0x10b   : > { %v636_v1 = vsel %vm378_vm1, %v630_v27, %v631_v26  ;;  %646 = vst [vmem:[#allocation4 + $0xd4] sm:$0xf] %v638_v28  ;;  %924 = vmatpush1.bf16.msra.mxu1 %v6812_v3 }
 0x10c   : > { %v637_v30 = vsel %vm633_vm9, %v625_v24, %v636_v1  ;;  %939 = vmatprep.subr.bf16.mxu1 %v9557_v11 }
 0x10d   : > { %v6225_v31 = vcombine.high %v634_v29, %v637_v30  ;;  %v6224_v32 = vcombine.low %v634_v29, %v637_v30 }
 0x10f   : > { %886 = vmatprep.subr.bf16.mxu0 %v6225_v31 }
 0x110   : > { %887 = vmatpush2.bf16.msra.mxu0 %v6224_v32 }
 0x112   : > { %v6813_v35 = vld [vmem:[#allocation4 + $0xc8] ss:$12 sps:$4 sm:$0xff]  }
 0x113   : > { %889 = vmatmul.mubr.bf16.vlgmr.msra.gmra.mxu0 %v6814_v33  ;;  %940 = vmatpush2.bf16.msra.mxu1 %v6813_v35 }
 0x114   : > { %6228 = vmatprep.mubr.msk.bf16.mxu0 %vm849_vm0, %v6817_v34 }
 0x116   : > { %942 = vmatmul.mubr.bf16.vlgmr.msra.gmra.mxu1 %v6814_v33 }
 0x117   : > { %6230 = vmatprep.mubr.msk.bf16.mxu1 %vm849_vm0, %v6817_v34 }
 0x11b   : > { %899 = vmatmul.mubr.bf16.gmra.mxu0 %v6819_v36 }
 0x11e   : > { %950 = vmatmul.mubr.bf16.gmra.mxu1 %v6819_v36 }
 0x11f   : > { %2096 = vmatprep.mubr.bf16.mxu1 %v9557_v11 }
 0x1d3   : > { %v890_v46 = vpop.f32.mrf.mxu0 }
 0x1d4   : > { %v958_v48 = vmax.f32 %v890_v46, 0.0 }
 0x1d5   : > { %v892_v49 = vpop.f32.mrf.mxu0 }
 0x1d6   : > { %v986_v50 = vsel %vm983_vm11, %v958_v48, 0.0  ;;  %v959_v51 = vmax.f32 %v892_v49, 0.0  ;;  %v943_v53 = vpop.f32.mrf.mxu1 }
 0x1d7   : > { %v894_v52 = vpop.f32.mrf.mxu0  ;;  %v960_v56 = vmax.f32 %v943_v53, 0.0 }
 0x1d8   : > { %v987_v54 = vsel %vm984_vm12, %v959_v51, 0.0  ;;  %v961_v55 = vmax.f32 %v894_v52, 0.0  ;;  %v945_v59 = vpop.f32.mrf.mxu1 }
 0x1d9   : > { %v7352_v57 = vpack.c.bf16 %v987_v54, %v986_v50  ;;  %v896_v58 = vpop.f32.mrf.mxu0  ;;  %v988_v62 = vsel %vm985_vm13, %v960_v56, 0.0 }
 0x1da   : > { %v989_v60 = vsel %vm983_vm11, %v961_v55, 0.0  ;;  %v962_v61 = vmax.f32 %v896_v58, 0.0  ;;  %v6554_v0 = vpack.c.bf16 %v988_v62, %v988_v62  ;;  %v946_v4 = vpop.f32.mrf.mxu1 }
 0x1db   : > { %1038 = vst [vmem:[#allocation3 + $0x4] sm:$0xff] %v7352_v57  ;;  %1326 = vst [vmem:[#allocation4 + $0xc0] sm:$0xff] %v7352_v57  ;;  %v900_v63 = vpop.f32.mrf.mxu0  ;;  %v963_v8 = vmax.f32 %v946_v4, 0.0 }
 0x1dc   : > { %v990_v6 = vsel %vm984_vm12, %v962_v61, 0.0  ;;  %v964_v7 = vmax.f32 %v900_v63, 0.0  ;;  %1039 = vst [vmem:[#allocation3 + $0xc] sm:$0xf] %v6554_v0  ;;  %v948_v12 = vpop.f32.mrf.mxu1 }
 0x1dd   : > { %v7362_v9 = vpack.c.bf16 %v990_v6, %v989_v60  ;;  %v902_v10 = vpop.f32.mrf.mxu0  ;;  %v991_v15 = vsel %vm985_vm13, %v963_v8, 0.0  ;;  %v7509_v6 = vld [vmem:[%s9532_s2 + $0x4] ss:$12 sps:$4 sm:$0xff]  }
 0x1de   : > { %v992_v13 = vsel %vm983_vm11, %v964_v7, 0.0  ;;  %v965_v14 = vmax.f32 %v902_v10, 0.0  ;;  %v6556_v17 = vpack.c.bf16 %v991_v15, %v991_v15  ;;  %v951_v18 = vpop.f32.mrf.mxu1  ;;  %2043 = vmatprep.mubr.bf16.mxu0 %v7509_v6 }
 0x1df   : > { %1040 = vst [vmem:[#allocation3 + $0x18] sm:$0xff] %v7362_v9  ;;  %1328 = vst [vmem:[#allocation4 + $0xcc] sm:$0xff] %v7362_v9  ;;  %v904_v16 = vpop.f32.mrf.mxu0  ;;  %v966_v21 = vmax.f32 %v951_v18, 0.0 }
 0x1e0   : > { %v993_v19 = vsel %vm984_vm12, %v965_v14, 0.0  ;;  %v967_v20 = vmax.f32 %v904_v16, 0.0  ;;  %1041 = vst [vmem:[#allocation3 + $0x20] sm:$0xf] %v6556_v17  ;;  %v953_v22 = vpop.f32.mrf.mxu1 }
 0x1e1   : > { %v7372_v2 = vpack.c.bf16 %v993_v19, %v992_v13  ;;  %v906_v5 = vpop.f32.mrf.mxu0  ;;  %v994_v25 = vsel %vm985_vm13, %v966_v21, 0.0 }
 0x1e2   : > { %v995_v23 = vsel %vm983_vm11, %v967_v20, 0.0  ;;  %v968_v24 = vmax.f32 %v906_v5, 0.0  ;;  %v6558_v26 = vpack.c.bf16 %v994_v25, %v994_v25  ;;  %v954_v27 = vpop.f32.mrf.mxu1  ;;  %v1250_v36 = vld [vmem:[#allocation3] sm:$0xff] }
 0x1e3   : > { %1042 = vst [vmem:[#allocation3 + $0x2c] sm:$0xff] %v7372_v2  ;;  %1330 = vst [vmem:[#allocation4 + $0xd8] sm:$0xff] %v7372_v2  ;;  %v1319_v1 = vld [vmem:[#allocation3 + $0xc] sm:$0xf]  ;;  %v969_v29 = vmax.f32 %v954_v27, 0.0  ;;  %v2217_v25 = vld [vmem:[%s9534_s4 + $0x10] sm:$0xff] }
 0x1e4   : > { %v996_v28 = vsel %vm984_vm12, %v968_v24, 0.0  ;;  %v7382_v3 = vld [vmem:[#allocation3 + $0xc] sm:$0xff]  ;;  %1327 = vst [vmem:[#allocation4 + $0xc8] sm:$0xf] %v1319_v1  ;;  %1043 = vst [vmem:[#allocation3 + $0x34] sm:$0xf] %v6558_v26  ;;  %v956_v31 = vpop.f32.mrf.mxu1 }
 0x1e5   : > { %v7384_v30 = vpack.c.bf16 %v996_v28, %v995_v23  ;;  %1556 = vrot.lane.b32.xlu1 %v7382_v3, %s9554_s18  ;;  %1488 = vrot.lane.b32.xlu0 %v7382_v3, %s9552_s11  ;;  %v997_v32 = vsel %vm985_vm13, %v969_v29, 0.0  ;;  %v1251_v35 = vld [vmem:[#allocation3 + $0x8] sm:$0xff]  ;;  %v2253_v27 = vld [vmem:[%s9535_s5 + $0x10] sm:$0xff] }
 0x1e6   : > { %v6560_v33 = vpack.c.bf16 %v997_v32, %v997_v32  ;;  %v1252_v40 = vld [vmem:[#allocation3 + $0x14] sm:$0xff]  ;;  %v2218_v24 = vld [vmem:[%s9534_s4 + $0x18] sm:$0xff] }
 0x1e7   : > { %1044 = vst [vmem:[#allocation3 + $0x40] sm:$0xff] %v7384_v30  ;;  %1332 = vst [vmem:[#allocation4 + $0xe4] sm:$0xff] %v7384_v30  ;;  %v1321_v34 = vld [vmem:[#allocation3 + $0x20] sm:$0xf]  ;;  %v2254_v28 = vld [vmem:[%s9535_s5 + $0x18] sm:$0xff] }
 0x1e8   : > { %1329 = vst [vmem:[#allocation4 + $0xd4] sm:$0xf] %v1321_v34  ;;  %1045 = vst [vmem:[#allocation3 + $0x48] sm:$0xf] %v6560_v33  ;;  %v1541_v39 = vld [vmem:[#allocation3 + $0x20] sm:$0xff]  ;;  %v2215_v32 = vld [vmem:[%s9534_s4] sm:$0xff] }
 0x1e9   : > { %1268 = vrot.lane.b32.xlu1 %v1251_v35, %s9550_s16  ;;  %1266 = vrot.lane.b32.xlu0 %v1250_v36, %s9550_s16  ;;  %v1253_v41 = vld [vmem:[#allocation3 + $0x1c] sm:$0xff] }
 0x1ea   : > { %v1254_v46 = vld [vmem:[#allocation3 + $0x28] sm:$0xff]  ;;  %v2216_v33 = vld [vmem:[%s9534_s4 + $0x8] sm:$0xff] }
 0x1eb   : > { %v1323_v37 = vld [vmem:[#allocation3 + $0x34] sm:$0xf] }
 0x1ec   : > { %1331 = vst [vmem:[#allocation4 + $0xe0] sm:$0xf] %v1323_v37  ;;  %v1543_v42 = vld [vmem:[#allocation3 + $0x34] sm:$0xff] }
 0x1ed   : > { %1200 = vrot.lane.b32.xlu1 %v1251_v35, %s9548_s21  ;;  %1198 = vrot.lane.b32.xlu0 %v1250_v36, %s9548_s21  ;;  %v1255_v44 = vld [vmem:[#allocation3 + $0x30] sm:$0xff] }
 0x1ee   : > { %v1256_v50 = vld [vmem:[#allocation3 + $0x3c] sm:$0xff] }
 0x1ef   : > { %v1325_v38 = vld [vmem:[#allocation3 + $0x48] sm:$0xf] }
 0x1f0   : > { %1333 = vst [vmem:[#allocation4 + $0xec] sm:$0xf] %v1325_v38  ;;  %v1545_v48 = vld [vmem:[#allocation3 + $0x48] sm:$0xff] }
 0x1f1   : > { %1132 = vrot.lane.b32.xlu1 %v1251_v35, %s9546_s8  ;;  %1130 = vrot.lane.b32.xlu0 %v1250_v36, %s9546_s8  ;;  %v1257_v49 = vld [vmem:[#allocation3 + $0x44] sm:$0xff] }
 0x1f5   : > { %1560 = vrot.lane.b32.xlu1 %v1541_v39, %s9554_s18  ;;  %1554 = vrot.lane.b32.xlu0 %v7352_v57, %s9554_s18 }
 0x1f9   : > { %1064 = vrot.lane.b32.xlu1 %v1251_v35, %s9584_s22  ;;  %1062 = vrot.lane.b32.xlu0 %v1250_v36, %s9584_s22 }
 0x1fd   : > { %1492 = vrot.lane.b32.xlu1 %v1541_v39, %s9552_s11  ;;  %1270 = vrot.lane.b32.xlu0 %v1252_v40, %s9550_s16 }
 0x201   : > { %1272 = vrot.lane.b32.xlu1 %v1253_v41, %s9550_s16  ;;  %1202 = vrot.lane.b32.xlu0 %v1252_v40, %s9548_s21 }
 0x205   : > { %1204 = vrot.lane.b32.xlu1 %v1253_v41, %s9548_s21  ;;  %1134 = vrot.lane.b32.xlu0 %v1252_v40, %s9546_s8 }
 0x209   : > { %1564 = vrot.lane.b32.xlu1 %v1543_v42, %s9554_s18  ;;  %1558 = vrot.lane.b32.xlu0 %v7362_v9, %s9554_s18 }
 0x20d   : > { %1136 = vrot.lane.b32.xlu1 %v1253_v41, %s9546_s8  ;;  %1496 = vrot.lane.b32.xlu0 %v1543_v42, %s9552_s11 }
 0x211   : > { %1068 = vrot.lane.b32.xlu1 %v1253_v41, %s9584_s22  ;;  %1066 = vrot.lane.b32.xlu0 %v1252_v40, %s9584_s22  ;;  %v2251_v41 = vld [vmem:[%s9535_s5] sm:$0xff] }
 0x215   : > { %1276 = vrot.lane.b32.xlu1 %v1255_v44, %s9550_s16  ;;  %1274 = vrot.lane.b32.xlu0 %v1254_v46, %s9550_s16 }
 0x219   : > { %1208 = vrot.lane.b32.xlu1 %v1255_v44, %s9548_s21  ;;  %1206 = vrot.lane.b32.xlu0 %v1254_v46, %s9548_s21 }
 0x21d   : > { %1140 = vrot.lane.b32.xlu1 %v1255_v44, %s9546_s8  ;;  %1138 = vrot.lane.b32.xlu0 %v1254_v46, %s9546_s8 }
 0x221   : > { %1568 = vrot.lane.b32.xlu1 %v1545_v48, %s9554_s18  ;;  %1562 = vrot.lane.b32.xlu0 %v7372_v2, %s9554_s18 }
 0x225   : > { %1072 = vrot.lane.b32.xlu1 %v1255_v44, %s9584_s22  ;;  %1070 = vrot.lane.b32.xlu0 %v1254_v46, %s9584_s22 }
 0x229   : > { %1500 = vrot.lane.b32.xlu1 %v1545_v48, %s9552_s11  ;;  %1494 = vrot.lane.b32.xlu0 %v7372_v2, %s9552_s11 }
 0x22d   : > { %1280 = vrot.lane.b32.xlu1 %v1257_v49, %s9550_s16  ;;  %1278 = vrot.lane.b32.xlu0 %v1256_v50, %s9550_s16 }
 0x231   : > { %1432 = vrot.lane.b32.xlu1 %v1545_v48, %s9585_s29  ;;  %1428 = vrot.lane.b32.xlu0 %v1543_v42, %s9585_s29 }
 0x235   : > { %1212 = vrot.lane.b32.xlu1 %v1257_v49, %s9548_s21  ;;  %1210 = vrot.lane.b32.xlu0 %v1256_v50, %s9548_s21  ;;  %s6102_s21 = scalar_lea.sflag [#allocation7], %s7184_s15 }
 0x239   : > { %1144 = vrot.lane.b32.xlu1 %v1257_v49, %s9546_s8  ;;  %1142 = vrot.lane.b32.xlu0 %v1256_v50, %s9546_s8  ;;  %s9595_s8 = smov 110  }
 0x23d   : > { %1490 = vrot.lane.b32.xlu1 %v7362_v9, %s9552_s11  ;;  %1566 = vrot.lane.b32.xlu0 %v7384_v30, %s9554_s18  ;;  %s9596_s18 = smov 1  }
 0x241   : > { %1424 = vrot.lane.b32.xlu1 %v1541_v39, %s9585_s29  ;;  %1486 = vrot.lane.b32.xlu0 %v7352_v57, %s9552_s11 }
 0x245   : > { %1076 = vrot.lane.b32.xlu1 %v1257_v49, %s9584_s22  ;;  %1074 = vrot.lane.b32.xlu0 %v1256_v50, %s9584_s22 }
 0x249   : > { %1364 = vrot.lane.b32.xlu1 %v1545_v48, %s9586_s9  ;;  %1420 = vrot.lane.b32.xlu0 %v7382_v3, %s9585_s29 }
 0x24d   : > { %1498 = vrot.lane.b32.xlu1 %v7384_v30, %s9552_s11  ;;  %1426 = vrot.lane.b32.xlu0 %v7372_v2, %s9585_s29  ;;  %s9594_s11 = smov 109  }
 0x251   : > { %1422 = vrot.lane.b32.xlu1 %v7362_v9, %s9585_s29  ;;  %1360 = vrot.lane.b32.xlu0 %v1543_v42, %s9586_s9  ;;  %v2252_v42 = vld [vmem:[%s9535_s5 + $0x8] sm:$0xff] }
 0x255   : > { %1430 = vrot.lane.b32.xlu1 %v7384_v30, %s9585_s29  ;;  %1418 = vrot.lane.b32.xlu0 %v7352_v57, %s9585_s29 }
 0x257   : > { %v7463_v51 = vpop.permute.xlu1 %1556  ;;  %v7465_v52 = vpop.permute.xlu0 %1488 }
 0x258   : > { %v1571_v53 = vrot.slane %v7463_v51, 4  ;;  %v9559_v54 = vrot.slane %v7465_v52, 4 }
 0x259   : > { %1356 = vrot.lane.b32.xlu1 %v1541_v39, %s9586_s9  ;;  %1352 = vrot.lane.b32.xlu0 %v7382_v3, %s9586_s9 }
 0x25a   : > { %v1580_v55 = vsel %vm633_vm9, %v7463_v51, %v1571_v53  ;;  %v1512_v56 = vsel %vm598_vm2, %v7465_v52, %v9559_v54 }
 0x25b   : > { %1599 = vst [vmem:[#allocation4 + $0x188] sm:$0xf] %v1580_v55  ;;  %1531 = vst [vmem:[#allocation4 + $0x158] sm:$0xf] %v1512_v56  ;;  %v7480_v58 = vpop.permute.xlu1 %1268  ;;  %v7482_v59 = vpop.permute.xlu0 %1266 }
 0x25c   : > { %v1283_v60 = vrot.slane %v7480_v58, 4 }
 0x25d   : > { %1362 = vrot.lane.b32.xlu1 %v7384_v30, %s9586_s9  ;;  %1358 = vrot.lane.b32.xlu0 %v7372_v2, %s9586_s9 }
 0x25e   : > { %v1292_v61 = vsel %vm485_vm5, %v7480_v58, %v1283_v60 }
 0x25f   : > { %1311 = vst [vmem:[#allocation4 + $0x98] sm:$0xf] %v1292_v61  ;;  %v7493_v62 = vpop.permute.xlu1 %1200  ;;  %v7495_v63 = vpop.permute.xlu0 %1198 }
 0x260   : > { %v1215_v0 = vrot.slane %v7493_v62, 4 }
 0x261   : > { %1354 = vrot.lane.b32.xlu1 %v7362_v9, %s9586_s9  ;;  %1350 = vrot.lane.b32.xlu0 %v7352_v57, %s9586_s9 }
 0x262   : > { %v1224_v4 = vsel %vm450_vm6, %v7493_v62, %v1215_v0 }
 0x263   : > { %1243 = vst [vmem:[#allocation4 + $0x68] sm:$0xf] %v1224_v4  ;;  %v7511_v7 = vpop.permute.xlu1 %1132  ;;  %v7513_v8 = vpop.permute.xlu0 %1130 }
 0x264   : > { %v1147_v9 = vrot.slane %v7511_v7, 4 }
 0x265   : > { %2236 = vperm.xlu1 %6804, %v2218_v24   ;;  %2231 = vperm.xlu0 %6803, %v2217_v25  }
 0x266   : > { %v1156_v57 = vsel %vm415_vm7, %v7511_v7, %v1147_v9 }
 0x267   : > { %1175 = vst [vmem:[#allocation4 + $0x38] sm:$0xf] %v1156_v57  ;;  %v1561_v10 = vpop.permute.xlu1 %1560  ;;  %v1555_v12 = vpop.permute.xlu0 %1554 }
 0x268   : > { %v1573_v13 = vrot.slane %v1561_v10, 4  ;;  %v1570_v29 = vrot.slane %v1555_v12, 4 }
 0x269   : > { %2267 = vperm.xlu1 %6804, %v2253_v27   ;;  %2272 = vperm.xlu0 %6803, %v2254_v28  }
 0x26a   : > { %v1583_v14 = vsel %vm633_vm9, %v1561_v10, %v1573_v13  ;;  %v1578_v36 = vsel %vm378_vm1, %v1570_v29, %v1571_v53 }
 0x26b   : > { %1601 = vst [vmem:[#allocation4 + $0x194] sm:$0xf] %v1583_v14  ;;  %v7522_v15 = vpop.permute.xlu1 %1064  ;;  %v7524_v16 = vpop.permute.xlu0 %1062  ;;  %v7594_v44 = vsel %vm633_vm9, %v1555_v12, %v1578_v36 }
 0x26c   : > { %v9561_v17 = vrot.slane %v7522_v15, 4 }
 0x26d   : > { %2221 = vperm.xlu1 %6804, %v2215_v32   ;;  %2226 = vperm.xlu0 %6803, %v2216_v33  }
 0x26e   : > { %v1088_v18 = vsel %vm380_vm8, %v7522_v15, %v9561_v17 }
 0x26f   : > { %1107 = vst [vmem:[#allocation4 + $0x8] sm:$0xf] %v1088_v18  ;;  %v7531_v19 = vpop.permute.xlu1 %1492  ;;  %v7533_v20 = vpop.permute.xlu0 %1270 }
 0x270   : > { %v9556_v21 = vrot.slane %v7531_v19, 4 }
 0x271   : > { %2257 = vperm.xlu1 %6804, %v2251_v41   ;;  %2262 = vperm.xlu0 %6803, %v2252_v42  }
 0x272   : > { %v1515_v2 = vsel %vm598_vm2, %v7531_v19, %v9556_v21 }
 0x273   : > { %1533 = vst [vmem:[#allocation4 + $0x164] sm:$0xf] %v1515_v2  ;;  %v7540_v5 = vpop.permute.xlu1 %1272  ;;  %v7542_v22 = vpop.permute.xlu0 %1202 }
 0x274   : > { %v1285_v23 = vrot.slane %v7540_v5, 4 }
 0x276   : > { %v1295_v26 = vsel %vm485_vm5, %v7540_v5, %v1285_v23 }
 0x277   : > { %1313 = vst [vmem:[#allocation4 + $0xa4] sm:$0xf] %v1295_v26  ;;  %v7561_v1 = vpop.permute.xlu1 %1204  ;;  %v7563_v3 = vpop.permute.xlu0 %1134 }
 0x278   : > { %v1217_v30 = vrot.slane %v7561_v1, 4 }
 0x27a   : > { %v1227_v31 = vsel %vm450_vm6, %v7561_v1, %v1217_v30 }
 0x27b   : > { %1245 = vst [vmem:[#allocation4 + $0x74] sm:$0xf] %v1227_v31  ;;  %v7576_v34 = vpop.permute.xlu1 %1564  ;;  %v1559_v35 = vpop.permute.xlu0 %1558 }
 0x27c   : > { %v1575_v37 = vrot.slane %v7576_v34, 4  ;;  %v1572_v38 = vrot.slane %v1559_v35, 4 }
 0x27e   : > { %v1586_v39 = vsel %vm633_vm9, %v7576_v34, %v1575_v37  ;;  %v1581_v40 = vsel %vm378_vm1, %v1572_v38, %v1573_v13 }
 0x27f   : > { %1603 = vst [vmem:[#allocation4 + $0x1a0] sm:$0xf] %v1586_v39  ;;  %v7597_v46 = vsel %vm633_vm9, %v1559_v35, %v1581_v40  ;;  %v7599_v48 = vpop.permute.xlu1 %1136  ;;  %v7601_v49 = vpop.permute.xlu0 %1496 }
 0x280   : > { %v1149_v50 = vrot.slane %v7599_v48, 4  ;;  %v9560_v51 = vrot.slane %v7601_v49, 4  ;;  %v6294_v53 = vcombine.high %v7594_v44, %v7597_v46 }
 0x282   : > { %v1159_v56 = vsel %vm415_vm7, %v7599_v48, %v1149_v50  ;;  %v1518_v61 = vsel %vm598_vm2, %v7601_v49, %v9560_v51 }
 0x283   : > { %1177 = vst [vmem:[#allocation4 + $0x44] sm:$0xf] %v1159_v56  ;;  %1535 = vst [vmem:[#allocation4 + $0x170] sm:$0xf] %v1518_v61  ;;  %v7617_v4 = vpop.permute.xlu1 %1068  ;;  %v7619_v57 = vpop.permute.xlu0 %1066 }
 0x284   : > { %v1081_v10 = vrot.slane %v7617_v4, 4 }
 0x286   : > { %v1091_v12 = vsel %vm380_vm8, %v7617_v4, %v1081_v10  ;;  %v9587_v4 = vrot.slane %v7522_v15, 4 }
 0x287   : > { %1109 = vst [vmem:[#allocation4 + $0x14] sm:$0xf] %v1091_v12  ;;  %v1277_v13 = vpop.permute.xlu1 %1276  ;;  %v1275_v14 = vpop.permute.xlu0 %1274 }
 0x288   : > { %v1287_v18 = vrot.slane %v1277_v13, 4  ;;  %v1286_v12 = vrot.slane %v1275_v14, 4 }
 0x28a   : > { %v1298_v2 = vsel %vm485_vm5, %v1277_v13, %v1287_v18  ;;  %v1296_v21 = vsel %vm378_vm1, %v1286_v12, %v1287_v18 }
 0x28b   : > { %1315 = vst [vmem:[#allocation4 + $0xb0] sm:$0xf] %v1298_v2  ;;  %v7627_v24 = vpop.permute.xlu1 %1208  ;;  %v7629_v25 = vpop.permute.xlu0 %1206  ;;  %v1282_v2 = vrot.slane %v7482_v59, 4 }
 0x28c   : > { %v1219_v26 = vrot.slane %v7627_v24, 4  ;;  %v1218_v5 = vrot.slane %v7629_v25, 4 }
 0x28d   : > { %v1290_v51 = vsel %vm378_vm1, %v1282_v2, %v1283_v60 }
 0x28e   : > { %v1230_v27 = vsel %vm450_vm6, %v7627_v24, %v1219_v26  ;;  %v1284_v24 = vrot.slane %v7533_v20, 4 }
 0x28f   : > { %1247 = vst [vmem:[#allocation4 + $0x80] sm:$0xf] %v1230_v27  ;;  %v7634_v28 = vpop.permute.xlu1 %1140  ;;  %v7636_v29 = vpop.permute.xlu0 %1138 }
 0x290   : > { %v1151_v31 = vrot.slane %v7634_v28, 4 }
 0x292   : > { %v1162_v32 = vsel %vm415_vm7, %v7634_v28, %v1151_v31 }
 0x293   : > { %1179 = vst [vmem:[#allocation4 + $0x50] sm:$0xf] %v1162_v32  ;;  %v7643_v33 = vpop.permute.xlu1 %1568  ;;  %v7645_v35 = vpop.permute.xlu0 %1562 }
 0x294   : > { %v1577_v36 = vrot.slane %v7643_v33, 4 }
 0x296   : > { %v1589_v38 = vsel %vm633_vm9, %v7643_v33, %v1577_v36 }
 0x297   : > { %1605 = vst [vmem:[#allocation4 + $0x1ac] sm:$0xf] %v1589_v38  ;;  %v7652_v39 = vpop.permute.xlu1 %1072  ;;  %v7654_v40 = vpop.permute.xlu0 %1070 }
 0x298   : > { %v1083_v41 = vrot.slane %v7652_v39, 4 }
 0x29a   : > { %v1094_v42 = vsel %vm380_vm8, %v7652_v39, %v1083_v41 }
 0x29b   : > { %1111 = vst [vmem:[#allocation4 + $0x20] sm:$0xf] %v1094_v42  ;;  %v7661_v56 = vpop.permute.xlu1 %1500  ;;  %v7663_v61 = vpop.permute.xlu0 %1494  ;;  %v1293_v42 = vsel %vm378_vm1, %v1284_v24, %v1285_v23  ;;  %v1228_v24 = vsel %vm378_vm1, %v1218_v5, %v1219_v26  ;;  %v1574_v26 = vrot.slane %v7645_v35, 4 }
 0x29c   : > { %v9562_v13 = vrot.slane %v7661_v56, 4  ;;  %v1506_v15 = vrot.slane %v7663_v61, 4 }
 0x29d   : > { %v1584_v28 = vsel %vm378_vm1, %v1574_v26, %v1575_v37  ;;  %v1080_v37 = vrot.slane %v7619_v57, 4 }
 0x29e   : > { %v1521_v27 = vsel %vm598_vm2, %v7661_v56, %v9562_v13  ;;  %v1297_v13 = vsel %vm485_vm5, %v1275_v14, %v1296_v21  ;;  %v1216_v21 = vrot.slane %v7542_v22, 4 }
 0x29f   : > { %1537 = vst [vmem:[#allocation4 + $0x17c] sm:$0xf] %v1521_v27  ;;  %v1281_v32 = vpop.permute.xlu1 %1280  ;;  %v1279_v38 = vpop.permute.xlu0 %1278  ;;  %v1294_v27 = vsel %vm485_vm5, %v7533_v20, %v1293_v42  ;;  %v1214_v20 = vrot.slane %v7495_v63, 4 }
 0x2a0   : > { %v1289_v11 = vrot.slane %v1281_v32, 4  ;;  %v1288_v54 = vrot.slane %v1279_v38, 4 }
 0x2a2   : > { %v1301_v55 = vsel %vm485_vm5, %v1281_v32, %v1289_v11  ;;  %v1299_v17 = vsel %vm378_vm1, %v1288_v54, %v1289_v11  ;;  %v1291_v54 = vsel %vm485_vm5, %v7482_v59, %v1290_v51  ;;  %v1225_v51 = vsel %vm378_vm1, %v1216_v21, %v1217_v30 }
 0x2a3   : > { %1317 = vst [vmem:[#allocation4 + $0xbc] sm:$0xf] %v1301_v55  ;;  %v1300_v23 = vsel %vm485_vm5, %v1279_v38, %v1299_v17  ;;  %v7686_v18 = vpop.permute.xlu1 %1432  ;;  %v7688_v12 = vpop.permute.xlu0 %1428  ;;  %v6264_v14 = vcombine.high %v1291_v54, %v1294_v27  ;;  %v6263_v42 = vcombine.low %v1291_v54, %v1294_v27  ;;  %v1226_v1 = vsel %vm450_vm6, %v7542_v22, %v1225_v51 }
 0x2a4   : > { %v1441_v58 = vrot.slane %v7686_v18, 4  ;;  %v1439_v60 = vrot.slane %v7688_v12, 4  ;;  %v6267_v2 = vcombine.high %v1297_v13, %v1300_v23  ;;  %v6266_v11 = vcombine.low %v1297_v13, %v1300_v23 }
 0x2a5   : > { %v1222_v23 = vsel %vm378_vm1, %v1214_v20, %v1215_v0  ;;  %v1229_v30 = vsel %vm450_vm6, %v7629_v25, %v1228_v24  ;;  %v1146_v22 = vrot.slane %v7513_v8, 4 }
 0x2a6   : > { %v1453_v17 = vsel %vm563_vm3, %v7686_v18, %v1441_v58  ;;  %v1450_v55 = vsel %vm563_vm3, %v7688_v12, %v1439_v60  ;;  %2011 = vmatprep.subr.bf16.mxu0 %v6267_v2  ;;  %v1150_v2 = vrot.slane %v7636_v29, 4 }
 0x2a7   : > { %1469 = vst [vmem:[#allocation4 + $0x14c] sm:$0xf] %v1453_v17  ;;  %1467 = vst [vmem:[#allocation4 + $0x140] sm:$0xf] %v1450_v55  ;;  %v1213_v13 = vpop.permute.xlu1 %1212  ;;  %v1211_v59 = vpop.permute.xlu0 %1210  ;;  %2012 = vmatpush1.bf16.msra.mxu0 %v6266_v11  ;;  %v1223_v55 = vsel %vm450_vm6, %v7495_v63, %v1222_v23 }
 0x2a8   : > { %v1221_v32 = vrot.slane %v1213_v13, 4  ;;  %v1220_v38 = vrot.slane %v1211_v59, 4  ;;  %2013 = vmatprep.subr.bf16.mxu0 %v6264_v14  ;;  %v1148_v14 = vrot.slane %v7563_v3, 4  ;;  %v1160_v25 = vsel %vm378_vm1, %v1150_v2, %v1151_v31 }
 0x2a9   : > { %v6258_v51 = vcombine.high %v1223_v55, %v1226_v1  ;;  %v6257_v23 = vcombine.low %v1223_v55, %v1226_v1  ;;  %v1154_v2 = vsel %vm378_vm1, %v1146_v22, %v1147_v9  ;;  %v1082_v9 = vrot.slane %v7654_v40, 4  ;;  %v6820_v22 = vld [vmem:[#allocation4 + $0x170] ss:$12 sps:$4 sm:$0xff]  }
 0x2aa   : > { %v1233_v17 = vsel %vm450_vm6, %v1213_v13, %v1221_v32  ;;  %v1231_v11 = vsel %vm378_vm1, %v1220_v38, %v1221_v32  ;;  %v1157_v38 = vsel %vm378_vm1, %v1148_v14, %v1149_v50  ;;  %v1585_v50 = vsel %vm633_vm9, %v7645_v35, %v1584_v28  ;;  %v7784_v14 = vld [vmem:[%s9532_s2 + $0x8] ss:$12 sps:$4 sm:$0xff]  }
 0x2ab   : > { %1249 = vst [vmem:[#allocation4 + $0x8c] sm:$0xf] %v1233_v17  ;;  %v1232_v27 = vsel %vm450_vm6, %v1211_v59, %v1231_v11  ;;  %v1145_v62 = vpop.permute.xlu1 %1144  ;;  %v1143_v5 = vpop.permute.xlu0 %1142  ;;  %2014 = vmatpush1.bf16.msra.mxu0 %v6263_v42  ;;  %v1161_v42 = vsel %vm415_vm7, %v7636_v29, %v1160_v25  ;;  %v1158_v34 = vsel %vm415_vm7, %v7563_v3, %v1157_v38  ;;  %v1078_v35 = vrot.slane %v7524_v16, 4 }
 0x2ac   : > { %v1153_v0 = vrot.slane %v1145_v62, 4  ;;  %v1152_v54 = vrot.slane %v1143_v5, 4  ;;  %v6261_v20 = vcombine.high %v1229_v30, %v1232_v27  ;;  %v6260_v21 = vcombine.low %v1229_v30, %v1232_v27 }
 0x2ad   : > { %v1155_v3 = vsel %vm415_vm7, %v7513_v8, %v1154_v2  ;;  %v1092_v8 = vsel %vm378_vm1, %v1082_v9, %v1083_v41  ;;  %v6823_v2 = vld [vmem:[#allocation4 + $0x158] ss:$12 sps:$4 sm:$0xff]  }
 0x2ae   : > { %v1165_v13 = vsel %vm415_vm7, %v1145_v62, %v1153_v0  ;;  %v1163_v59 = vsel %vm378_vm1, %v1152_v54, %v1153_v0  ;;  %2015 = vmatprep.subr.bf16.mxu0 %v6261_v20  ;;  %v6252_v27 = vcombine.high %v1155_v3, %v1158_v34  ;;  %v1089_v62 = vsel %vm378_vm1, %v1080_v37, %v1081_v10 }
 0x2af   : > { %1181 = vst [vmem:[#allocation4 + $0x5c] sm:$0xf] %v1165_v13  ;;  %v1164_v24 = vsel %vm415_vm7, %v1143_v5, %v1163_v59  ;;  %v7730_v32 = vpop.permute.xlu1 %1490  ;;  %v1567_v63 = vpop.permute.xlu0 %1566  ;;  %2016 = vmatpush1.bf16.msra.mxu0 %v6260_v21  ;;  %v6251_v21 = vcombine.low %v1155_v3, %v1158_v34  ;;  %v1086_v10 = vsel %vm378_vm1, %v1078_v35, %v9587_v4  ;;  %v9590_v37 = vrot.slane %v7465_v52, 4  ;;  %v7829_v52 = vld [vmem:[%s9532_s2 + $0x20] ss:$12 sps:$4 sm:$0xff]  }
 0x2b0   : > { %v1576_v31 = vrot.slane %v1567_v63, 4  ;;  %2017 = vmatprep.subr.bf16.mxu0 %v6258_v51  ;;  %v6255_v17 = vcombine.high %v1161_v42, %v1164_v24  ;;  %v6254_v30 = vcombine.low %v1161_v42, %v1164_v24  ;;  %v1090_v55 = vsel %vm380_vm8, %v7619_v57, %v1089_v62 }
 0x2b1   : > { %v9588_v51 = vcombine.low %v7594_v44, %v7597_v46  ;;  %v1087_v28 = vsel %vm380_vm8, %v7524_v16, %v1086_v10  ;;  %v1504_v42 = vrot.slane %v7730_v32, 4  ;;  %v9592_v3 = vrot.slane %v7531_v19, 4 }
 0x2b2   : > { %v1587_v48 = vsel %vm378_vm1, %v1576_v31, %v1577_v36  ;;  %v6822_v31 = vld [vmem:[#allocation4 + $0xb0] ss:$12 sps:$4 sm:$0xff]   ;;  %v6246_v46 = vcombine.high %v1087_v28, %v1090_v55  ;;  %v6245_v9 = vcombine.low %v1087_v28, %v1090_v55  ;;  %v9593_v35 = vrot.slane %v7661_v56, 4  ;;  %v6826_v4 = vld [vmem:[#allocation4 + $0x80] ss:$12 sps:$4 sm:$0xff]  }
 0x2b3   : > { %v1588_v29 = vsel %vm633_vm9, %v1567_v63, %v1587_v48  ;;  %v7752_v11 = vpop.permute.xlu1 %1424  ;;  %v7754_v7 = vpop.permute.xlu0 %1486  ;;  %2018 = vmatpush1.bf16.msra.mxu0 %v6257_v23 }
 0x2b4   : > { %v1437_v33 = vrot.slane %v7752_v11, 4  ;;  %2019 = vmatprep.subr.bf16.mxu0 %v6255_v17  ;;  %v6297_v36 = vcombine.high %v1585_v50, %v1588_v29  ;;  %v6296_v1 = vcombine.low %v1585_v50, %v1588_v29  ;;  %v1502_v25 = vrot.slane %v7754_v7, 4 }
 0x2b5   : > { %v9589_v17 = vrot.slane %v7601_v49, 4 }
 0x2b6   : > { %v1447_v26 = vsel %vm563_vm3, %v7752_v11, %v1437_v33  ;;  %2076 = vmatprep.subr.bf16.mxu1 %v6297_v36  ;;  %v1510_v50 = vsel %vm378_vm1, %v1502_v25, %v9590_v37  ;;  %v6824_v36 = vld [vmem:[#allocation4 + $0x98] ss:$12 sps:$4 sm:$0xff]   ;;  %v6828_v25 = vld [vmem:[#allocation4 + $0x68] ss:$12 sps:$4 sm:$0xff]  }
 0x2b7   : > { %1465 = vst [vmem:[#allocation4 + $0x134] sm:$0xf] %v1447_v26  ;;  %v1077_v5 = vpop.permute.xlu1 %1076  ;;  %v1075_v0 = vpop.permute.xlu0 %1074  ;;  %2020 = vmatpush1.bf16.msra.mxu0 %v6254_v30  ;;  %2077 = vmatpush1.bf16.msra.mxu1 %v6296_v1  ;;  %v1516_v34 = vsel %vm378_vm1, %v1506_v15, %v9589_v17  ;;  %v9591_v1 = vmov 0   ;;  %v1513_v30 = vsel %vm378_vm1, %v1504_v42, %v9592_v3  ;;  %v6825_v26 = vld [vmem:[#allocation4 + $0x140] ss:$12 sps:$4 sm:$0xff]  }
 0x2b8   : > { %v1085_v54 = vrot.slane %v1077_v5, 4  ;;  %v1084_v20 = vrot.slane %v1075_v0, 4  ;;  %2021 = vmatprep.subr.bf16.mxu0 %v6252_v27  ;;  %2078 = vmatprep.subr.bf16.mxu1 %v6294_v53  ;;  %v1093_v53 = vsel %vm380_vm8, %v7654_v40, %v1092_v8  ;;  %v1517_v27 = vsel %vm598_vm2, %v7663_v61, %v1516_v34 }
 0x2b9   : > { %v1511_v62 = vsel %vm598_vm2, %v7754_v7, %v1510_v50 }
 0x2ba   : > { %v1097_v39 = vsel %vm380_vm8, %v1077_v5, %v1085_v54  ;;  %v1095_v41 = vsel %vm378_vm1, %v1084_v20, %v1085_v54 }
 0x2bb   : > { %1113 = vst [vmem:[#allocation4 + $0x2c] sm:$0xf] %v1097_v39  ;;  %v1096_v57 = vsel %vm380_vm8, %v1075_v0, %v1095_v41  ;;  %v7791_v13 = vpop.permute.xlu1 %1364  ;;  %v7793_v59 = vpop.permute.xlu0 %1420  ;;  %2022 = vmatpush1.bf16.msra.mxu0 %v6251_v21  ;;  %2079 = vmatpush1.bf16.msra.mxu1 %v9588_v51  ;;  %v1514_v21 = vsel %vm598_vm2, %v7730_v32, %v1513_v30 }
 0x2bc   : > { %v1373_v24 = vrot.slane %v7791_v13, 4  ;;  %v1435_v40 = vrot.slane %v7793_v59, 4  ;;  %6585 = vmatprep.subr.bf16.mxu1 %v6820_v22  ;;  %v6249_v63 = vcombine.high %v1093_v53, %v1096_v57  ;;  %v6248_v38 = vcombine.low %v1093_v53, %v1096_v57 }
 0x2bd   : > { %v6288_v10 = vcombine.high %v1511_v62, %v1514_v21  ;;  %v6287_v15 = vcombine.low %v1511_v62, %v1514_v21  ;;  %v6844_v21 = vld [vmem:[#allocation4 + $0xd8] ss:$12 sps:$4 sm:$0xff]  }
 0x2be   : > { %v1385_v23 = vsel %vm528_vm4, %v7791_v13, %v1373_v24  ;;  %v1444_v44 = vsel %vm563_vm3, %v7793_v59, %v1435_v40  ;;  %2023 = vmatprep.subr.bf16.mxu0 %v6249_v63  ;;  %6299 = vmatmul.mubr.msk.bf16.vlgmr.msra.gmra.mxu1 %vm2004_vm14, %v7784_v14 }
 0x2bf   : > { %1401 = vst [vmem:[#allocation4 + $0x11c] sm:$0xf] %v1385_v23  ;;  %1463 = vst [vmem:[#allocation4 + $0x128] sm:$0xf] %v1444_v44  ;;  %v1499_v16 = vpop.permute.xlu1 %1498  ;;  %v1427_v48 = vpop.permute.xlu0 %1426  ;;  %2024 = vmatpush1.bf16.msra.mxu0 %v6248_v38  ;;  %6586 = vmatpush3.bf16.msra.mxu1 %v6822_v31 }
 0x2c0   : > { %v1508_v29 = vrot.slane %v1499_v16, 4  ;;  %2025 = vmatprep.subr.bf16.mxu0 %v6246_v46  ;;  %6587 = vmatprep.subr.bf16.mxu1 %v6823_v2  ;;  %v1438_v56 = vrot.slane %v1427_v48, 4  ;;  %v6830_v2 = vld [vmem:[#allocation4 + $0x50] ss:$12 sps:$4 sm:$0xff]  }
 0x2c1   : > { %2106 = vmatprep.mubr.bf16.mxu1 %v9591_v1 }
 0x2c2   : > { %v1519_v49 = vsel %vm378_vm1, %v1508_v29, %v9593_v35  ;;  %v1448_v32 = vsel %vm378_vm1, %v1438_v56, %v1439_v60 }
 0x2c3   : > { %v1520_v19 = vsel %vm598_vm2, %v1499_v16, %v1519_v49  ;;  %v1423_v5 = vpop.permute.xlu1 %1422  ;;  %v7836_v0 = vpop.permute.xlu0 %1360  ;;  %2026 = vmatpush1.bf16.msra.mxu0 %v6245_v9  ;;  %6588 = vmatpush3.bf16.msra.mxu1 %v6824_v36  ;;  %v1449_v60 = vsel %vm563_vm3, %v1427_v48, %v1448_v32  ;;  %v6851_v32 = vld [vmem:[%s9532_s2 + $0x18] ss:$12 sps:$4 sm:$0xff]  }
 0x2c4   : > { %v1371_v8 = vrot.slane %v7836_v0, 4  ;;  %6589 = vmatprep.subr.bf16.mxu1 %v6825_v26  ;;  %v6291_v54 = vcombine.high %v1517_v27, %v1520_v19  ;;  %v6290_v20 = vcombine.low %v1517_v27, %v1520_v19  ;;  %v1436_v61 = vrot.slane %v1423_v5, 4  ;;  %v6833_v19 = vld [vmem:[#allocation4 + $0x38] ss:$12 sps:$4 sm:$0xff]  }
 0x2c6   : > { %v1382_v7 = vsel %vm528_vm4, %v7836_v0, %v1371_v8  ;;  %2027 = vmatprep.subr.bf16.mxu0 %v6291_v54  ;;  %v6827_v55 = vld [vmem:[#allocation4 + $0x128] ss:$12 sps:$4 sm:$0xff]   ;;  %6300 = vmatmul.mubr.msk.bf16.gmra.mxu1 %vm2004_vm14, %v7829_v52  ;;  %v1445_v57 = vsel %vm378_vm1, %v1436_v61, %v1437_v33  ;;  %v6835_v54 = vld [vmem:[#allocation4 + $0x20] ss:$12 sps:$4 sm:$0xff]   ;;  %v6845_v61 = vld [vmem:[#allocation4 + $0xc4] ss:$12 sps:$4 sm:$0xff]  }
 0x2c7   : > { %1399 = vst [vmem:[#allocation4 + $0x110] sm:$0xf] %v1382_v7  ;;  %v1431_v39 = vpop.permute.xlu1 %1430  ;;  %v1419_v41 = vpop.permute.xlu0 %1418  ;;  %2028 = vmatpush2.bf16.msra.mxu0 %v6290_v20  ;;  %6590 = vmatpush3.bf16.msra.mxu1 %v6826_v4  ;;  %v6836_v20 = vld [vmem:[#allocation4 + $0xc8] ss:$12 sps:$4 sm:$0xff]   ;;  %v6840_v7 = vld [vmem:[#allocation4 + $0x1a0] ss:$12 sps:$4 sm:$0xff]  }
 0x2c8   : > { %v1440_v22 = vrot.slane %v1431_v39, 4  ;;  %v1434_v53 = vrot.slane %v1419_v41, 4  ;;  %2029 = vmatprep.subr.bf16.mxu0 %v6288_v10  ;;  %6591 = vmatprep.subr.bf16.mxu1 %v6827_v55  ;;  %v6837_v4 = vld [vmem:[#allocation4 + $0x8] ss:$12 sps:$4 sm:$0xff]   ;;  %v6841_v10 = vld [vmem:[%s9532_s2] ss:$12 sps:$4 sm:$0xff]  }
 0x2c9   : > { %2149 = vmatprep.mubr.bf16.mxu1 %v7509_v6  ;;  %v6848_v55 = vld [vmem:[#allocation4 + $0xc0] ss:$12 sps:$4 sm:$0xff]  }
 0x2ca   : > { %v1451_v51 = vsel %vm378_vm1, %v1440_v22, %v1441_v58  ;;  %v1442_v12 = vsel %vm378_vm1, %v1434_v53, %v1435_v40  ;;  %v1446_v58 = vsel %vm563_vm3, %v1423_v5, %v1445_v57  ;;  %v6834_v5 = vld [vmem:[#allocation4 + $0xe0] ss:$12 sps:$4 sm:$0xff]  }
 0x2cb   : > { %v1452_v63 = vsel %vm563_vm3, %v1431_v39, %v1451_v51  ;;  %v1443_v38 = vsel %vm563_vm3, %v1419_v41, %v1442_v12  ;;  %v1357_v28 = vpop.permute.xlu1 %1356  ;;  %v1353_v6 = vpop.permute.xlu0 %1352  ;;  %2030 = vmatpush2.bf16.msra.mxu0 %v6287_v15  ;;  %6592 = vmatpush3.bf16.msra.mxu1 %v6828_v25  ;;  %v6849_v39 = vld [vmem:[%s9532_s2 + $0x1c] ss:$12 sps:$4 sm:$0xff]  }
 0x2cc   : > { %v1369_v11 = vrot.slane %v1357_v28, 4  ;;  %v1367_v33 = vrot.slane %v1353_v6, 4  ;;  %v6285_v31 = vcombine.high %v1449_v60, %v1452_v63  ;;  %v6284_v18 = vcombine.low %v1449_v60, %v1452_v63  ;;  %v6847_v41 = vld [vmem:[#allocation4 + $0x188] ss:$12 sps:$4 sm:$0xff]  }
 0x2cd   : > { %v6282_v23 = vcombine.high %v1443_v38, %v1446_v58  ;;  %v6281_v17 = vcombine.low %v1443_v38, %v1446_v58 }
 0x2ce   : > { %v1379_v59 = vsel %vm528_vm4, %v1357_v28, %v1369_v11  ;;  %v1376_v40 = vsel %vm528_vm4, %v1353_v6, %v1367_v33  ;;  %v6829_v42 = vld [vmem:[#allocation4 + $0x110] ss:$12 sps:$4 sm:$0xff]   ;;  %2031 = vmatprep.subr.bf16.mxu0 %v6285_v31 }
 0x2cf   : > { %1397 = vst [vmem:[#allocation4 + $0x104] sm:$0xf] %v1379_v59  ;;  %1395 = vst [vmem:[#allocation4 + $0xf8] sm:$0xf] %v1376_v40  ;;  %v1363_v44 = vpop.permute.xlu1 %1362  ;;  %v1359_v46 = vpop.permute.xlu0 %1358  ;;  %2032 = vmatpush2.bf16.msra.mxu0 %v6284_v18  ;;  %6593 = vmatprep.subr.bf16.mxu1 %v6829_v42 }
 0x2d0   : > { %v1372_v16 = vrot.slane %v1363_v44, 4  ;;  %v1370_v48 = vrot.slane %v1359_v46, 4  ;;  %2033 = vmatprep.subr.bf16.mxu0 %v6282_v23  ;;  %6594 = vmatpush3.bf16.msra.mxu1 %v6830_v2 }
 0x2d2   : > { %v1383_v34 = vsel %vm378_vm1, %v1372_v16, %v1373_v24  ;;  %v1380_v37 = vsel %vm378_vm1, %v1370_v48, %v1371_v8  ;;  %v6838_v8 = vld [vmem:[#allocation4 + $0xdc] ss:$12 sps:$4 sm:$0xff]  }
 0x2d3   : > { %v1384_v50 = vsel %vm528_vm4, %v1363_v44, %v1383_v34  ;;  %v1381_v29 = vsel %vm528_vm4, %v1359_v46, %v1380_v37  ;;  %v1355_v9 = vpop.permute.xlu1 %1354  ;;  %v1351_v36 = vpop.permute.xlu0 %1350  ;;  %2034 = vmatpush2.bf16.msra.mxu0 %v6281_v17 }
 0x2d4   : > { %v1368_v3 = vrot.slane %v1355_v9, 4  ;;  %v1366_v30 = vrot.slane %v1351_v36, 4  ;;  %v6279_v35 = vcombine.high %v1381_v29, %v1384_v50  ;;  %v6278_v49 = vcombine.low %v1381_v29, %v1384_v50 }
 0x2d6   : > { %v1377_v26 = vsel %vm378_vm1, %v1368_v3, %v1369_v11  ;;  %v1374_v27 = vsel %vm378_vm1, %v1366_v30, %v1367_v33  ;;  %v6832_v13 = vld [vmem:[#allocation4 + $0xf8] ss:$12 sps:$4 sm:$0xff]   ;;  %2035 = vmatprep.subr.bf16.mxu0 %v6279_v35 }
 0x2d7   : > { %v1378_v24 = vsel %vm528_vm4, %v1355_v9, %v1377_v26  ;;  %v1375_v62 = vsel %vm528_vm4, %v1351_v36, %v1374_v27  ;;  %2036 = vmatpush2.bf16.msra.mxu0 %v6278_v49  ;;  %6595 = vmatprep.subr.bf16.mxu1 %v6832_v13 }
 0x2d8   : > { %v6276_v0 = vcombine.high %v1375_v62, %v1378_v24  ;;  %v6275_v56 = vcombine.low %v1375_v62, %v1378_v24  ;;  %6596 = vmatpush3.bf16.msra.mxu1 %v6833_v19 }
 0x2d9   : > { %6597 = vmatprep.subr.bf16.mxu1 %v6834_v5 }
 0x2da   : > { %2037 = vmatprep.subr.bf16.mxu0 %v6276_v0 }
 0x2db   : > { %2038 = vmatpush2.bf16.msra.mxu0 %v6275_v56 }
 0x2dc   : > { %2039 = vmatprep.subr.bf16.mxu0 %v6838_v8  ;;  %6598 = vmatpush3.bf16.msra.mxu1 %v6835_v54 }
 0x2dd   : > { %6599 = vmatprep.subr.bf16.mxu1 %v6836_v20 }
 0x2df   : > { %2040 = vmatpush2.bf16.msra.mxu0 %v6844_v21 }
 0x2e0   : > { %2041 = vmatprep.subr.bf16.mxu0 %v6845_v61  ;;  %6600 = vmatpush3.bf16.msra.mxu1 %v6837_v4  ;;  %v7888_v57 = vpop.permute.xlu1 %2236  ;;  %v2232_v63 = vpop.permute.xlu0 %2231 }
 0x2e1   : > { %6706 = vmatprep.subr.bf16.mxu1 %v6840_v7 }
 0x2e3   : > { %2042 = vmatpush2.bf16.msra.mxu0 %v6848_v55  ;;  %2150 = vmatmul.mubr.bf16.vlgmr.msra.gmra.mxu1 %v6841_v10 }
 0x2e4   : > { %6707 = vmatpush3.bf16.msra.mxu1 %v6840_v7  ;;  %2157 = vmatprep.mubr.bf16.mxu1 %v6849_v39  ;;  %v7890_v60 = vpop.permute.xlu1 %2267 }
 0x2e5   : > { %6708 = vmatprep.subr.bf16.mxu1 %v6847_v41 }
 0x2e6   : > { %2044 = vmatmul.mubr.bf16.vlgmr.msra.gmra.mxu0 %v6841_v10 }
 0x2e7   : > { %2053 = vmatprep.mubr.bf16.mxu0 %v6849_v39 }
 0x2e8   : > { %6709 = vmatpush3.bf16.msra.mxu1 %v6847_v41  ;;  %v7892_v28 = vpop.permute.xlu1 %2221 }
 0x2eb   : > { %2158 = vmatmul.mubr.bf16.gmra.mxu1 %v6851_v32 }
 0x2ec   : > { %6710 = vmatprep.mubr.msk.bf16.mxu1 %vm2004_vm14, %v7784_v14  ;;  %v7894_v14 = vpop.permute.xlu0 %2272  ;;  %v7896_v18 = vpop.permute.xlu1 %2257 }
 0x2ee   : > { %2054 = vmatmul.mubr.bf16.gmra.mxu0 %v6851_v32 }
 0x2f0   : > { %v7898_v58 = vpop.permute.xlu0 %2226 }
 0x2f3   : > { %6711 = vmatmul.mubr.msk.bf16.vlgmr.msra.gmra.mxu1 %vm2004_vm14, %v7829_v52 }
 0x2f4   : > { %3409 = vmatprep.mubr.bf16.mxu1 %v9591_v1  ;;  %v7905_v36 = vpop.permute.xlu0 %2262 }
 0x37e   : > { %v2098_v22 = vpop.f32.mrf.mxu1 }
 0x380   : > { %v2100_v53 = vpop.f32.mrf.mxu1 }
 0x382   : > { %v2102_v15 = vpop.f32.mrf.mxu1 }
 0x384   : > { %v2104_v25 = vpop.f32.mrf.mxu1 }
 0x386   : > { %v2108_v51 = vpop.f32.mrf.mxu1 }
 0x388   : > { %v2110_v12 = vpop.f32.mrf.mxu1 }
 0x38a   : > { %v2112_v38 = vpop.f32.mrf.mxu1 }
 0x38c   : > { %v2114_v6 = vpop.f32.mrf.mxu1 }
 0x3a3   : > { %v6601_v52 = vpop.f32.mrf.mxu1 }
 0x3a5   : > { %v6602_v11 = vpop.f32.mrf.mxu1 }
 0x3a6   : > { %v2045_v33 = vpop.f32.mrf.mxu0  ;;  %v6603_v55 = vadd.f32 %v6602_v11, %v6601_v52 }
 0x3a7   : > { %v2099_v31 = vadd.f32 %v2098_v22, %v2045_v33  ;;  %v6604_v59 = vpop.f32.mrf.mxu1 }
 0x3a8   : > { %v2047_v40 = vpop.f32.mrf.mxu0 }
 0x3a9   : > { %v2239_v42 = vmul.f32 %v7892_v28, %v2099_v31  ;;  %v2101_v23 = vadd.f32 %v2100_v53, %v2047_v40  ;;  %v6605_v44 = vpop.f32.mrf.mxu1 }
 0x3aa   : > { %v2049_v46 = vpop.f32.mrf.mxu0 }
 0x3ab   : > { %v2240_v2 = vmul.f32 %v7892_v28, %v2101_v23  ;;  %v2275_v16 = vadd.f32 %v7896_v18, %v2239_v42  ;;  %v2103_v48 = vadd.f32 %v2102_v15, %v2049_v46  ;;  %v6607_v17 = vpop.f32.mrf.mxu1  ;;  %v6606_v23 = vadd.f32 %v6605_v44, %v6604_v59 }
 0x3ac   : > { %v2051_v34 = vpop.f32.mrf.mxu0 }
 0x3ad   : > { %v2276_v37 = vadd.f32 %v7896_v18, %v2240_v2  ;;  %v2287_v50 = vmax.f32 %v2275_v16, 0.0  ;;  %v2242_v29 = vmul.f32 %v7898_v58, %v2103_v48  ;;  %v2105_v9 = vadd.f32 %v2104_v25, %v2051_v34  ;;  %v6608_v3 = vpop.f32.mrf.mxu1 }
 0x3ae   : > { %v2055_v30 = vpop.f32.mrf.mxu0  ;;  %v6609_v61 = vadd.f32 %v6608_v3, %v6607_v17 }
 0x3af   : > { %v2288_v35 = vmax.f32 %v2276_v37, 0.0  ;;  %v2243_v49 = vmul.f32 %v7898_v58, %v2105_v9  ;;  %v6610_v26 = vpop.f32.mrf.mxu1  ;;  %v2109_v27 = vadd.f32 %v2108_v51, %v2055_v30  ;;  %v2278_v13 = vadd.f32 %v7905_v36, %v2242_v29 }
 0x3b0   : > { %v2057_v24 = vpop.f32.mrf.mxu0  ;;  %v2299_v62 = vsel %vm983_vm11, %v2287_v50, 0.0 }
 0x3b1   : > { %v2300_v19 = vsel %vm984_vm12, %v2288_v35, 0.0  ;;  %v2279_v5 = vadd.f32 %v7905_v36, %v2243_v49  ;;  %v2111_v0 = vadd.f32 %v2110_v12, %v2057_v24  ;;  %v6611_v8 = vpop.f32.mrf.mxu1  ;;  %v2245_v54 = vmul.f32 %v2232_v63, %v2109_v27 }
 0x3b2   : > { %v7914_v56 = vpack.c.bf16 %v2300_v19, %v2299_v62  ;;  %v2290_v20 = vmax.f32 %v2278_v13, 0.0  ;;  %v2059_v21 = vpop.f32.mrf.mxu0  ;;  %v6612_v46 = vadd.f32 %v6611_v8, %v6610_v26 }
 0x3b3   : > { %v2291_v4 = vmax.f32 %v2279_v5, 0.0  ;;  %v2246_v7 = vmul.f32 %v2232_v63, %v2111_v0  ;;  %v2113_v10 = vadd.f32 %v2112_v38, %v2059_v21  ;;  %v2281_v39 = vadd.f32 %v7890_v60, %v2245_v54  ;;  %v6712_v41 = vpop.f32.mrf.mxu1 }
 0x3b4   : > { %2351 = vst [vmem:[#allocation2 + $0x4] sm:$0xff] %v7914_v56  ;;  %v2302_v32 = vsel %vm983_vm11, %v2290_v20, 0.0  ;;  %v2061_v22 = vpop.f32.mrf.mxu0  ;;  %v2209_v53 = vadd.f32 %v6712_v41, %v6609_v61 }
 0x3b5   : > { %v2303_v15 = vsel %vm984_vm12, %v2291_v4, 0.0  ;;  %v2282_v25 = vadd.f32 %v7890_v60, %v2246_v7  ;;  %v2248_v51 = vmul.f32 %v7888_v57, %v2113_v10  ;;  %v2293_v12 = vmax.f32 %v2281_v39, 0.0  ;;  %v2200_v52 = vpop.f32.mrf.mxu1 }
 0x3b6   : > { %v7924_v38 = vpack.c.bf16 %v2303_v15, %v2302_v32  ;;  %v2115_v11 = vadd.f32 %v2114_v6, %v2061_v22  ;;  %v2247_v33 = vmul.f32 %v2232_v63, %v2209_v53  ;;  %v2201_v40 = vadd.f32 %v6603_v55, %v2200_v52 }
 0x3b7   : > { %v2294_v31 = vmax.f32 %v2282_v25, 0.0  ;;  %v2284_v42 = vadd.f32 %v7894_v14, %v2248_v51  ;;  %v6713_v2 = vpop.f32.mrf.mxu1  ;;  %v2305_v48 = vsel %vm983_vm11, %v2293_v12, 0.0 }
 0x3b8   : > { %2353 = vst [vmem:[#allocation2 + $0x18] sm:$0xff] %v7924_v38  ;;  %v2249_v16 = vmul.f32 %v7888_v57, %v2115_v11  ;;  %v2283_v17 = vadd.f32 %v7890_v60, %v2247_v33  ;;  %v2241_v63 = vmul.f32 %v7892_v28, %v2201_v40  ;;  %v2212_v59 = vadd.f32 %v6713_v2, %v6612_v46 }
 0x3b9   : > { %v2306_v6 = vsel %vm984_vm12, %v2294_v31, 0.0  ;;  %v2296_v37 = vmax.f32 %v2284_v42, 0.0  ;;  %v2203_v50 = vpop.f32.mrf.mxu1 }
 0x3ba   : > { %v7935_v34 = vpack.c.bf16 %v2306_v6, %v2305_v48  ;;  %v2285_v44 = vadd.f32 %v7894_v14, %v2249_v16  ;;  %v2295_v29 = vmax.f32 %v2283_v17, 0.0  ;;  %v2277_v9 = vadd.f32 %v7896_v18, %v2241_v63 }
 0x3bb   : > { %v2204_v3 = vadd.f32 %v6606_v23, %v2203_v50  ;;  %v2250_v60 = vmul.f32 %v7888_v57, %v2212_v59  ;;  %v2308_v27 = vsel %vm983_vm11, %v2296_v37, 0.0  ;;  %v2563_v10 = vld [vmem:[#allocation2] sm:$0xff]  ;;  %v6385_v59 = vld [vmem:[%s9534_s4 + $0x30] sm:$0xff] }
 0x3bc   : > { %2355 = vst [vmem:[#allocation2 + $0x2c] sm:$0xff] %v7935_v34  ;;  %v2297_v30 = vmax.f32 %v2285_v44, 0.0  ;;  %v2307_v35 = vsel %vm985_vm13, %v2295_v29, 0.0  ;;  %v2289_v28 = vmax.f32 %v2277_v9, 0.0  ;;  %v8102_v50 = vld [vmem:[%s9532_s2 + $0x34] ss:$12 sps:$4 sm:$0xff]  }
 0x3bd   : > { %v2244_v49 = vmul.f32 %v7898_v58, %v2204_v3  ;;  %v6566_v26 = vpack.c.bf16 %v2307_v35, %v2307_v35  ;;  %v2286_v13 = vadd.f32 %v7894_v14, %v2250_v60  ;;  %v6390_v29 = vld [vmem:[%s9535_s5 + $0x38] sm:$0xff]  ;;  %v6389_v3 = vld [vmem:[%s9535_s5 + $0x30] sm:$0xff]  ;;  %3356 = vmatprep.mubr.bf16.mxu0 %v8102_v50 }
 0x3be   : > { %v2309_v18 = vsel %vm984_vm12, %v2297_v30, 0.0  ;;  %v2301_v24 = vsel %vm985_vm13, %v2289_v28, 0.0 }
 0x3bf   : > { %v7951_v57 = vpack.c.bf16 %v2309_v18, %v2308_v27  ;;  %v2280_v62 = vadd.f32 %v7905_v36, %v2244_v49  ;;  %2356 = vst [vmem:[#allocation2 + $0x34] sm:$0xf] %v6566_v26  ;;  %v6562_v19 = vpack.c.bf16 %v2301_v24, %v2301_v24  ;;  %v2298_v5 = vmax.f32 %v2286_v13, 0.0  ;;  %v2565_v32 = vld [vmem:[#allocation2 + $0x14] sm:$0xff]  ;;  %v6384_v49 = vld [vmem:[%s9534_s4 + $0x28] sm:$0xff]  ;;  %v6383_v26 = vld [vmem:[%s9534_s4 + $0x20] sm:$0xff] }
 0x3c1   : > { %2357 = vst [vmem:[#allocation2 + $0x40] sm:$0xff] %v7951_v57  ;;  %v2292_v58 = vmax.f32 %v2280_v62, 0.0  ;;  %2352 = vst [vmem:[#allocation2 + $0xc] sm:$0xf] %v6562_v19  ;;  %v2310_v14 = vsel %vm985_vm13, %v2298_v5, 0.0  ;;  %v6387_v62 = vld [vmem:[%s9535_s5 + $0x20] sm:$0xff] }
 0x3c2   : > { %v6568_v0 = vpack.c.bf16 %v2310_v14, %v2310_v14 }
 0x3c3   : > { %v2304_v8 = vsel %vm985_vm13, %v2292_v58, 0.0  ;;  %v2567_v53 = vld [vmem:[#allocation2 + $0x28] sm:$0xff] }
 0x3c4   : > { %v6564_v54 = vpack.c.bf16 %v2304_v8, %v2304_v8  ;;  %2358 = vst [vmem:[#allocation2 + $0x48] sm:$0xf] %v6568_v0 }
 0x3c6   : > { %2354 = vst [vmem:[#allocation2 + $0x20] sm:$0xf] %v6564_v54  ;;  %v2636_v20 = vld [vmem:[#allocation2 + $0x34] sm:$0xf] }
 0x3c7   : > { %v7959_v21 = vld [vmem:[#allocation2 + $0x34] sm:$0xff]  ;;  %2644 = vst [vmem:[#allocation4 + $0xe0] sm:$0xf] %v2636_v20 }
 0x3c8   : > { %2877 = vrot.lane.b32.xlu0 %v7959_v21, %s9594_s11  ;;  %2809 = vrot.lane.b32.xlu1 %v7959_v21, %s9595_s8  ;;  %v2632_v36 = vld [vmem:[#allocation2 + $0xc] sm:$0xf]  ;;  %v2568_v15 = vld [vmem:[#allocation2 + $0x30] sm:$0xff]  ;;  %v2569_v51 = vld [vmem:[#allocation2 + $0x3c] sm:$0xff] }
 0x3c9   : > { %2640 = vst [vmem:[#allocation4 + $0xc8] sm:$0xf] %v2632_v36  ;;  %v7965_v61 = vld [vmem:[#allocation2 + $0xc] sm:$0xff] }
 0x3ca   : > { %v2564_v41 = vld [vmem:[#allocation2 + $0x8] sm:$0xff] }
 0x3cb   : > { %v2638_v4 = vld [vmem:[#allocation2 + $0x48] sm:$0xf] }
 0x3cc   : > { %2869 = vrot.lane.b32.xlu0 %v7965_v61, %s9594_s11  ;;  %2801 = vrot.lane.b32.xlu1 %v7965_v61, %s9595_s8  ;;  %2646 = vst [vmem:[#allocation4 + $0xec] sm:$0xf] %v2638_v4  ;;  %v2858_v55 = vld [vmem:[#allocation2 + $0x48] sm:$0xff] }
 0x3cd   : > { %v2634_v7 = vld [vmem:[#allocation2 + $0x20] sm:$0xf]  ;;  %v2570_v25 = vld [vmem:[#allocation2 + $0x44] sm:$0xff] }
 0x3ce   : > { %2642 = vst [vmem:[#allocation4 + $0xd4] sm:$0xf] %v2634_v7  ;;  %v2854_v39 = vld [vmem:[#allocation2 + $0x20] sm:$0xff] }
 0x3cf   : > { %v2566_v22 = vld [vmem:[#allocation2 + $0x1c] sm:$0xff] }
 0x3d0   : > { %2579 = vrot.lane.b32.xlu1 %v2563_v10, %s9596_s18  ;;  %2881 = vrot.lane.b32.xlu0 %v2858_v55, %s9594_s11 }
 0x3d4   : > { %2511 = vrot.lane.b32.xlu1 %v2563_v10, %s9597_s23  ;;  %2813 = vrot.lane.b32.xlu0 %v2858_v55, %s9595_s8 }
 0x3d8   : > { %2443 = vrot.lane.b32.xlu1 %v2563_v10, %s9598_s17  ;;  %2873 = vrot.lane.b32.xlu0 %v2854_v39, %s9594_s11 }
 0x3dc   : > { %2867 = vrot.lane.b32.xlu1 %v7914_v56, %s9594_s11  ;;  %2805 = vrot.lane.b32.xlu0 %v2854_v39, %s9595_s8 }
 0x3e0   : > { %2375 = vrot.lane.b32.xlu1 %v2563_v10, %s9584_s22  ;;  %2581 = vrot.lane.b32.xlu0 %v2564_v41, %s9596_s18 }
 0x3e4   : > { %2513 = vrot.lane.b32.xlu0 %v2564_v41, %s9597_s23  ;;  %2583 = vrot.lane.b32.xlu1 %v2565_v32, %s9596_s18 }
 0x3e8   : > { %2445 = vrot.lane.b32.xlu0 %v2564_v41, %s9598_s17  ;;  %2515 = vrot.lane.b32.xlu1 %v2565_v32, %s9597_s23 }
 0x3ec   : > { %2377 = vrot.lane.b32.xlu0 %v2564_v41, %s9584_s22  ;;  %2447 = vrot.lane.b32.xlu1 %v2565_v32, %s9598_s17 }
 0x3f0   : > { %2585 = vrot.lane.b32.xlu0 %v2566_v22, %s9596_s18  ;;  %2871 = vrot.lane.b32.xlu1 %v7924_v38, %s9594_s11 }
 0x3f4   : > { %2517 = vrot.lane.b32.xlu0 %v2566_v22, %s9597_s23  ;;  %2379 = vrot.lane.b32.xlu1 %v2565_v32, %s9584_s22 }
 0x3f8   : > { %2449 = vrot.lane.b32.xlu0 %v2566_v22, %s9598_s17  ;;  %2587 = vrot.lane.b32.xlu1 %v2567_v53, %s9596_s18 }
 0x3fc   : > { %2381 = vrot.lane.b32.xlu0 %v2566_v22, %s9584_s22  ;;  %2519 = vrot.lane.b32.xlu1 %v2567_v53, %s9597_s23 }
 0x400   : > { %2589 = vrot.lane.b32.xlu0 %v2568_v15, %s9596_s18  ;;  %2451 = vrot.lane.b32.xlu1 %v2567_v53, %s9598_s17 }
 0x404   : > { %2521 = vrot.lane.b32.xlu0 %v2568_v15, %s9597_s23  ;;  %2875 = vrot.lane.b32.xlu1 %v7935_v34, %s9594_s11 }
 0x408   : > { %2453 = vrot.lane.b32.xlu0 %v2568_v15, %s9598_s17  ;;  %2383 = vrot.lane.b32.xlu1 %v2567_v53, %s9584_s22 }
 0x40c   : > { %2385 = vrot.lane.b32.xlu0 %v2568_v15, %s9584_s22  ;;  %2807 = vrot.lane.b32.xlu1 %v7935_v34, %s9595_s8 }
 0x410   : > { %2593 = vrot.lane.b32.xlu0 %v2570_v25, %s9596_s18  ;;  %2591 = vrot.lane.b32.xlu1 %v2569_v51, %s9596_s18 }
 0x414   : > { %2745 = vrot.lane.b32.xlu0 %v2858_v55, %s9585_s29  ;;  %2741 = vrot.lane.b32.xlu1 %v7959_v21, %s9585_s29 }
 0x418   : > { %2525 = vrot.lane.b32.xlu0 %v2570_v25, %s9597_s23  ;;  %2523 = vrot.lane.b32.xlu1 %v2569_v51, %s9597_s23 }
 0x41c   : > { %2457 = vrot.lane.b32.xlu0 %v2570_v25, %s9598_s17  ;;  %2455 = vrot.lane.b32.xlu1 %v2569_v51, %s9598_s17 }
 0x420   : > { %2803 = vrot.lane.b32.xlu0 %v7924_v38, %s9595_s8  ;;  %2879 = vrot.lane.b32.xlu1 %v7951_v57, %s9594_s11 }
 0x424   : > { %2737 = vrot.lane.b32.xlu0 %v2854_v39, %s9585_s29  ;;  %2799 = vrot.lane.b32.xlu1 %v7914_v56, %s9595_s8 }
 0x428   : > { %2389 = vrot.lane.b32.xlu0 %v2570_v25, %s9584_s22  ;;  %2387 = vrot.lane.b32.xlu1 %v2569_v51, %s9584_s22 }
 0x42c   : > { %2677 = vrot.lane.b32.xlu0 %v2858_v55, %s9586_s9  ;;  %2733 = vrot.lane.b32.xlu1 %v7965_v61, %s9585_s29 }
 0x430   : > { %2811 = vrot.lane.b32.xlu0 %v7951_v57, %s9595_s8  ;;  %2739 = vrot.lane.b32.xlu1 %v7935_v34, %s9585_s29 }
 0x434   : > { %2735 = vrot.lane.b32.xlu0 %v7924_v38, %s9585_s29  ;;  %2673 = vrot.lane.b32.xlu1 %v7959_v21, %s9586_s9 }
 0x438   : > { %2743 = vrot.lane.b32.xlu0 %v7951_v57, %s9585_s29  ;;  %2731 = vrot.lane.b32.xlu1 %v7914_v56, %s9585_s29 }
 0x43a   : > { %v8040_v12 = vpop.permute.xlu1 %2809  ;;  %v8042_v52 = vpop.permute.xlu0 %2877 }
 0x43b   : > { %v9566_v11 = vrot.slane %v8040_v12, 4  ;;  %v2888_v33 = vrot.slane %v8042_v52, 4 }
 0x43c   : > { %2669 = vrot.lane.b32.xlu0 %v2854_v39, %s9586_s9  ;;  %2665 = vrot.lane.b32.xlu1 %v7965_v61, %s9586_s9 }
 0x43d   : > { %v2831_v31 = vsel %vm598_vm2, %v8040_v12, %v9566_v11  ;;  %v2899_v40 = vsel %vm633_vm9, %v8042_v52, %v2888_v33 }
 0x43e   : > { %2848 = vst [vmem:[#allocation4 + $0x170] sm:$0xf] %v2831_v31  ;;  %2916 = vst [vmem:[#allocation4 + $0x1a0] sm:$0xf] %v2899_v40  ;;  %v8057_v42 = vpop.permute.xlu1 %2801  ;;  %v8059_v23 = vpop.permute.xlu0 %2869 }
 0x43f   : > { %v9565_v46 = vrot.slane %v8057_v42, 4  ;;  %v2884_v2 = vrot.slane %v8059_v23, 4 }
 0x440   : > { %2675 = vrot.lane.b32.xlu0 %v7951_v57, %s9586_s9  ;;  %2671 = vrot.lane.b32.xlu1 %v7935_v34, %s9586_s9  ;;  %v6386_v34 = vld [vmem:[%s9534_s4 + $0x38] sm:$0xff]  ;;  %v6388_v57 = vld [vmem:[%s9535_s5 + $0x28] sm:$0xff] }
 0x441   : > { %v2825_v16 = vsel %vm598_vm2, %v8057_v42, %v9565_v46  ;;  %v2893_v48 = vsel %vm633_vm9, %v8059_v23, %v2884_v2 }
 0x442   : > { %2844 = vst [vmem:[#allocation4 + $0x158] sm:$0xf] %v2825_v16  ;;  %2912 = vst [vmem:[#allocation4 + $0x188] sm:$0xf] %v2893_v48  ;;  %v8075_v17 = vpop.permute.xlu1 %2579  ;;  %v8077_v6 = vpop.permute.xlu0 %2881 }
 0x443   : > { %v2890_v63 = vrot.slane %v8077_v6, 4 }
 0x444   : > { %2667 = vrot.lane.b32.xlu0 %v7924_v38, %s9586_s9  ;;  %2663 = vrot.lane.b32.xlu1 %v7914_v56, %s9586_s9 }
 0x445   : > { %v2902_v37 = vsel %vm633_vm9, %v8077_v6, %v2890_v63 }
 0x446   : > { %2918 = vst [vmem:[#allocation4 + $0x1ac] sm:$0xf] %v2902_v37  ;;  %v8094_v44 = vpop.permute.xlu1 %2511  ;;  %v8096_v38 = vpop.permute.xlu0 %2813 }
 0x447   : > { %v9563_v56 = vrot.slane %v8096_v38, 4 }
 0x448   : > { %3550 = vperm.xlu0 %6803, %v6386_v34   ;;  %3545 = vperm.xlu1 %6804, %v6385_v59  }
 0x449   : > { %v2834_v9 = vsel %vm598_vm2, %v8096_v38, %v9563_v56 }
 0x44a   : > { %2850 = vst [vmem:[#allocation4 + $0x17c] sm:$0xf] %v2834_v9  ;;  %v8115_v60 = vpop.permute.xlu1 %2443  ;;  %v2874_v30 = vpop.permute.xlu0 %2873 }
 0x44b   : > { %v2886_v35 = vrot.slane %v2874_v30, 4 }
 0x44c   : > { %3587 = vperm.xlu0 %6803, %v6390_v29   ;;  %3582 = vperm.xlu1 %6804, %v6389_v3  }
 0x44d   : > { %v2896_v28 = vsel %vm633_vm9, %v2874_v30, %v2886_v35 }
 0x44e   : > { %2914 = vst [vmem:[#allocation4 + $0x194] sm:$0xf] %v2896_v28  ;;  %v2868_v27 = vpop.permute.xlu1 %2867  ;;  %v8124_v13 = vpop.permute.xlu0 %2805 }
 0x44f   : > { %v9564_v18 = vrot.slane %v8124_v13, 4  ;;  %v2883_v39 = vrot.slane %v2868_v27, 4 }
 0x450   : > { %3540 = vperm.xlu0 %6803, %v6384_v49   ;;  %3535 = vperm.xlu1 %6804, %v6383_v26  }
 0x451   : > { %v2828_v24 = vsel %vm598_vm2, %v8124_v13, %v9564_v18  ;;  %v2891_v25 = vsel %vm378_vm1, %v2883_v39, %v2884_v2 }
 0x452   : > { %2846 = vst [vmem:[#allocation4 + $0x164] sm:$0xf] %v2828_v24  ;;  %v8137_v19 = vpop.permute.xlu1 %2375  ;;  %v8139_v5 = vpop.permute.xlu0 %2581  ;;  %v8186_v34 = vsel %vm633_vm9, %v2868_v27, %v2891_v25 }
 0x453   : > { %v2596_v58 = vrot.slane %v8139_v5, 4 }
 0x454   : > { %3577 = vperm.xlu0 %6803, %v6388_v57   ;;  %3572 = vperm.xlu1 %6804, %v6387_v62  }
 0x455   : > { %v2605_v14 = vsel %vm485_vm5, %v8139_v5, %v2596_v58 }
 0x456   : > { %2624 = vst [vmem:[#allocation4 + $0x98] sm:$0xf] %v2605_v14  ;;  %v8146_v0 = vpop.permute.xlu1 %2583  ;;  %v8148_v8 = vpop.permute.xlu0 %2513 }
 0x457   : > { %v2528_v54 = vrot.slane %v8148_v8, 4 }
 0x459   : > { %v2537_v20 = vsel %vm450_vm6, %v8148_v8, %v2528_v54 }
 0x45a   : > { %2556 = vst [vmem:[#allocation4 + $0x68] sm:$0xf] %v2537_v20  ;;  %v8155_v21 = vpop.permute.xlu1 %2515  ;;  %v8157_v36 = vpop.permute.xlu0 %2445 }
 0x45b   : > { %v2460_v61 = vrot.slane %v8157_v36, 4 }
 0x45d   : > { %v2469_v4 = vsel %vm415_vm7, %v8157_v36, %v2460_v61 }
 0x45e   : > { %2488 = vst [vmem:[#allocation4 + $0x38] sm:$0xf] %v2469_v4  ;;  %v8164_v7 = vpop.permute.xlu1 %2447  ;;  %v8166_v10 = vpop.permute.xlu0 %2377 }
 0x45f   : > { %v9567_v55 = vrot.slane %v8166_v10, 4 }
 0x461   : > { %v2401_v41 = vsel %vm380_vm8, %v8166_v10, %v9567_v55 }
 0x462   : > { %2420 = vst [vmem:[#allocation4 + $0x8] sm:$0xf] %v2401_v41  ;;  %v2872_v32 = vpop.permute.xlu1 %2871  ;;  %v2586_v22 = vpop.permute.xlu0 %2585 }
 0x463   : > { %v2885_v53 = vrot.slane %v2872_v32, 4  ;;  %v2598_v15 = vrot.slane %v2586_v22, 4 }
 0x465   : > { %v2894_v51 = vsel %vm378_vm1, %v2885_v53, %v2886_v35  ;;  %v2608_v31 = vsel %vm485_vm5, %v2586_v22, %v2598_v15 }
 0x466   : > { %v8179_v40 = vsel %vm633_vm9, %v2872_v32, %v2894_v51  ;;  %2626 = vst [vmem:[#allocation4 + $0xa4] sm:$0xf] %v2608_v31  ;;  %v8181_v16 = vpop.permute.xlu1 %2379  ;;  %v8183_v48 = vpop.permute.xlu0 %2517 }
 0x467   : > { %v2530_v37 = vrot.slane %v8183_v48, 4 }
 0x469   : > { %v2540_v59 = vsel %vm450_vm6, %v8183_v48, %v2530_v37 }
 0x46a   : > { %2558 = vst [vmem:[#allocation4 + $0x74] sm:$0xf] %v2540_v59  ;;  %v2588_v29 = vpop.permute.xlu1 %2587  ;;  %v8197_v9 = vpop.permute.xlu0 %2449  ;;  %v2597_v59 = vrot.slane %v8146_v0, 4 }
 0x46b   : > { %v2462_v3 = vrot.slane %v8197_v9, 4 }
 0x46d   : > { %v2472_v30 = vsel %vm415_vm7, %v8197_v9, %v2462_v3 }
 0x46e   : > { %2490 = vst [vmem:[#allocation4 + $0x44] sm:$0xf] %v2472_v30  ;;  %v8204_v35 = vpop.permute.xlu1 %2519  ;;  %v8206_v28 = vpop.permute.xlu0 %2381  ;;  %v2599_v30 = vrot.slane %v2588_v29, 4 }
 0x46f   : > { %v2394_v49 = vrot.slane %v8206_v28, 4 }
 0x471   : > { %v2404_v26 = vsel %vm380_vm8, %v8206_v28, %v2394_v49 }
 0x472   : > { %2422 = vst [vmem:[#allocation4 + $0x14] sm:$0xf] %v2404_v26  ;;  %v8213_v27 = vpop.permute.xlu1 %2451  ;;  %v2590_v24 = vpop.permute.xlu0 %2589 }
 0x473   : > { %v2600_v57 = vrot.slane %v2590_v24, 4 }
 0x475   : > { %v2611_v62 = vsel %vm485_vm5, %v2590_v24, %v2600_v57  ;;  %v2595_v24 = vrot.slane %v8075_v17, 4 }
 0x476   : > { %2628 = vst [vmem:[#allocation4 + $0xb0] sm:$0xf] %v2611_v62  ;;  %v8216_v14 = vpop.permute.xlu1 %2875  ;;  %v2522_v20 = vpop.permute.xlu0 %2521 }
 0x477   : > { %v2532_v4 = vrot.slane %v2522_v20, 4  ;;  %v2603_v46 = vsel %vm378_vm1, %v2595_v24, %v2596_v58  ;;  %v2527_v24 = vrot.slane %v8094_v44, 4 }
 0x479   : > { %v2543_v39 = vsel %vm450_vm6, %v2522_v20, %v2532_v4 }
 0x47a   : > { %2560 = vst [vmem:[#allocation4 + $0x80] sm:$0xf] %v2543_v39  ;;  %v8219_v41 = vpop.permute.xlu1 %2383  ;;  %v8221_v32 = vpop.permute.xlu0 %2453  ;;  %v2606_v39 = vsel %vm378_vm1, %v2597_v59, %v2598_v15 }
 0x47b   : > { %v2464_v22 = vrot.slane %v8221_v32, 4  ;;  %v2607_v55 = vsel %vm485_vm5, %v8146_v0, %v2606_v39  ;;  %v2529_v0 = vrot.slane %v8155_v21, 4 }
 0x47d   : > { %v2475_v53 = vsel %vm415_vm7, %v8221_v32, %v2464_v22 }
 0x47e   : > { %2492 = vst [vmem:[#allocation4 + $0x50] sm:$0xf] %v2475_v53  ;;  %v8228_v25 = vpop.permute.xlu1 %2807  ;;  %v8230_v51 = vpop.permute.xlu0 %2385  ;;  %v2609_v53 = vsel %vm378_vm1, %v2599_v30, %v2600_v57 }
 0x47f   : > { %v2396_v31 = vrot.slane %v8230_v51, 4 }
 0x481   : > { %v2407_v26 = vsel %vm380_vm8, %v8230_v51, %v2396_v31 }
 0x482   : > { %2424 = vst [vmem:[#allocation4 + $0x20] sm:$0xf] %v2407_v26  ;;  %v2592_v62 = vpop.permute.xlu1 %2591  ;;  %v2594_v20 = vpop.permute.xlu0 %2593  ;;  %v2610_v26 = vsel %vm485_vm5, %v2588_v29, %v2609_v53  ;;  %v2531_v29 = vrot.slane %v8204_v35, 4 }
 0x483   : > { %v2601_v56 = vrot.slane %v2592_v62, 4  ;;  %v2602_v18 = vrot.slane %v2594_v20, 4 }
 0x485   : > { %v2612_v11 = vsel %vm378_vm1, %v2601_v56, %v2602_v18  ;;  %v2614_v2 = vsel %vm485_vm5, %v2594_v20, %v2602_v18  ;;  %v2604_v18 = vsel %vm485_vm5, %v8075_v17, %v2603_v46  ;;  %v2538_v46 = vsel %vm378_vm1, %v2529_v0, %v2530_v37 }
 0x486   : > { %v2613_v23 = vsel %vm485_vm5, %v2592_v62, %v2612_v11  ;;  %2630 = vst [vmem:[#allocation4 + $0xbc] sm:$0xf] %v2614_v2  ;;  %v8250_v15 = vpop.permute.xlu1 %2741  ;;  %v8252_v57 = vpop.permute.xlu0 %2745  ;;  %v6344_v30 = vcombine.high %v2604_v18, %v2607_v55  ;;  %v2541_v62 = vsel %vm378_vm1, %v2531_v29, %v2532_v4  ;;  %v6343_v53 = vcombine.low %v2604_v18, %v2607_v55 }
 0x487   : > { %v2752_v5 = vrot.slane %v8250_v15, 4  ;;  %v2754_v58 = vrot.slane %v8252_v57, 4  ;;  %v6347_v59 = vcombine.high %v2610_v26, %v2613_v23  ;;  %v6346_v56 = vcombine.low %v2610_v26, %v2613_v23 }
 0x488   : > { %v2535_v26 = vsel %vm378_vm1, %v2527_v24, %v2528_v54  ;;  %v2539_v48 = vsel %vm450_vm6, %v8155_v21, %v2538_v46  ;;  %v2887_v0 = vrot.slane %v8216_v14, 4  ;;  %v2542_v4 = vsel %vm450_vm6, %v8204_v35, %v2541_v62 }
 0x489   : > { %v2763_v11 = vsel %vm563_vm3, %v8250_v15, %v2752_v5  ;;  %v2766_v2 = vsel %vm563_vm3, %v8252_v57, %v2754_v58  ;;  %3324 = vmatprep.subr.bf16.mxu0 %v6347_v59 }
 0x48a   : > { %2780 = vst [vmem:[#allocation4 + $0x140] sm:$0xf] %v2763_v11  ;;  %2782 = vst [vmem:[#allocation4 + $0x14c] sm:$0xf] %v2766_v2  ;;  %v2524_v17 = vpop.permute.xlu1 %2523  ;;  %v2526_v23 = vpop.permute.xlu0 %2525  ;;  %3325 = vmatpush1.bf16.msra.mxu0 %v6346_v56  ;;  %v2463_v56 = vrot.slane %v8213_v27, 4  ;;  %v2536_v2 = vsel %vm450_vm6, %v8094_v44, %v2535_v26  ;;  %v2459_v44 = vrot.slane %v8115_v60, 4 }
 0x48b   : > { %v2533_v20 = vrot.slane %v2524_v17, 4  ;;  %v2534_v39 = vrot.slane %v2526_v23, 4  ;;  %3326 = vmatprep.subr.bf16.mxu0 %v6344_v30  ;;  %v2461_v30 = vrot.slane %v8164_v7, 4  ;;  %v6337_v26 = vcombine.low %v2536_v2, %v2539_v48 }
 0x48c   : > { %v2473_v46 = vsel %vm378_vm1, %v2463_v56, %v2464_v22  ;;  %v2897_v22 = vsel %vm378_vm1, %v2887_v0, %v2888_v33 }
 0x48d   : > { %v2544_v37 = vsel %vm378_vm1, %v2533_v20, %v2534_v39  ;;  %v2546_v59 = vsel %vm450_vm6, %v2526_v23, %v2534_v39  ;;  %v6338_v23 = vcombine.high %v2536_v2, %v2539_v48  ;;  %v2470_v32 = vsel %vm378_vm1, %v2461_v30, %v2462_v3 }
 0x48e   : > { %v2545_v55 = vsel %vm450_vm6, %v2524_v17, %v2544_v37  ;;  %2562 = vst [vmem:[#allocation4 + $0x8c] sm:$0xf] %v2546_v59  ;;  %v2456_v8 = vpop.permute.xlu1 %2455  ;;  %v2458_v18 = vpop.permute.xlu0 %2457  ;;  %3327 = vmatpush1.bf16.msra.mxu0 %v6343_v53  ;;  %v2474_v53 = vsel %vm415_vm7, %v8213_v27, %v2473_v46  ;;  %v2467_v37 = vsel %vm378_vm1, %v2459_v44, %v2460_v61 }
 0x48f   : > { %v2465_v54 = vrot.slane %v2456_v8, 4  ;;  %v2466_v29 = vrot.slane %v2458_v18, 4  ;;  %v6341_v21 = vcombine.high %v2542_v4, %v2545_v55  ;;  %v6340_v11 = vcombine.low %v2542_v4, %v2545_v55 }
 0x490   : > { %v2471_v52 = vsel %vm415_vm7, %v8164_v7, %v2470_v32  ;;  %v2898_v33 = vsel %vm633_vm9, %v8216_v14, %v2897_v22  ;;  %v2393_v7 = vrot.slane %v8181_v16, 4  ;;  %v2395_v14 = vrot.slane %v8219_v41, 4 }
 0x491   : > { %v2476_v35 = vsel %vm378_vm1, %v2465_v54, %v2466_v29  ;;  %v2478_v17 = vsel %vm415_vm7, %v2458_v18, %v2466_v29  ;;  %3328 = vmatprep.subr.bf16.mxu0 %v6341_v21  ;;  %v9601_v44 = vcombine.low %v8186_v34, %v8179_v40 }
 0x492   : > { %v2477_v24 = vsel %vm415_vm7, %v2456_v8, %v2476_v35  ;;  %2494 = vst [vmem:[#allocation4 + $0x5c] sm:$0xf] %v2478_v17  ;;  %v2880_v62 = vpop.permute.xlu1 %2879  ;;  %v8294_v20 = vpop.permute.xlu0 %2803  ;;  %3329 = vmatpush1.bf16.msra.mxu0 %v6340_v11  ;;  %v2402_v55 = vsel %vm378_vm1, %v2393_v7, %v2394_v49  ;;  %v2405_v54 = vsel %vm378_vm1, %v2395_v14, %v2396_v31  ;;  %v9600_v49 = vrot.slane %v8166_v10, 4  ;;  %v6852_v31 = vld [vmem:[#allocation4 + $0x170] ss:$12 sps:$4 sm:$0xff]  }
 0x493   : > { %v2889_v39 = vrot.slane %v2880_v62, 4  ;;  %3330 = vmatprep.subr.bf16.mxu0 %v6338_v23  ;;  %v6335_v59 = vcombine.high %v2474_v53, %v2477_v24  ;;  %v6334_v48 = vcombine.low %v2474_v53, %v2477_v24  ;;  %v9599_v11 = vcombine.high %v8186_v34, %v8179_v40  ;;  %v8349_v35 = vld [vmem:[%s9532_s2 + $0x38] ss:$12 sps:$4 sm:$0xff]  }
 0x494   : > { %v2403_v30 = vsel %vm380_vm8, %v8181_v16, %v2402_v55  ;;  %v2819_v17 = vrot.slane %v8228_v25, 4  ;;  %v2406_v10 = vsel %vm380_vm8, %v8219_v41, %v2405_v54  ;;  %v9604_v14 = vrot.slane %v8124_v13, 4  ;;  %v6857_v55 = vld [vmem:[#allocation4 + $0x140] ss:$12 sps:$4 sm:$0xff]  }
 0x495   : > { %v2900_v9 = vsel %vm378_vm1, %v2889_v39, %v2890_v63  ;;  %v2468_v63 = vsel %vm415_vm7, %v8115_v60, %v2467_v37  ;;  %v2391_v60 = vrot.slane %v8137_v19, 4  ;;  %v2817_v37 = vrot.slane %v8294_v20, 4 }
 0x496   : > { %v2901_v3 = vsel %vm633_vm9, %v2880_v62, %v2900_v9  ;;  %v8316_v56 = vpop.permute.xlu1 %2799  ;;  %v8318_v27 = vpop.permute.xlu0 %2737  ;;  %3331 = vmatpush1.bf16.msra.mxu0 %v6337_v26  ;;  %v6332_v4 = vcombine.high %v2468_v63, %v2471_v52  ;;  %v6331_v28 = vcombine.low %v2468_v63, %v2471_v52  ;;  %v6854_v26 = vld [vmem:[#allocation4 + $0xb0] ss:$12 sps:$4 sm:$0xff]  }
 0x497   : > { %v2750_v36 = vrot.slane %v8318_v27, 4  ;;  %3332 = vmatprep.subr.bf16.mxu0 %v6335_v59  ;;  %v6377_v6 = vcombine.high %v2898_v33, %v2901_v3  ;;  %v6376_v61 = vcombine.low %v2898_v33, %v2901_v3  ;;  %v2399_v2 = vsel %vm378_vm1, %v2391_v60, %v9600_v49  ;;  %v6855_v59 = vld [vmem:[#allocation4 + $0x158] ss:$12 sps:$4 sm:$0xff]   ;;  %v6858_v49 = vld [vmem:[#allocation4 + $0x80] ss:$12 sps:$4 sm:$0xff]  }
 0x498   : > { %v2815_v23 = vrot.slane %v8316_v56, 4  ;;  %v2400_v53 = vsel %vm380_vm8, %v8137_v19, %v2399_v2  ;;  %v9602_v33 = vrot.slane %v8040_v12, 4 }
 0x499   : > { %v2760_v0 = vsel %vm563_vm3, %v8318_v27, %v2750_v36  ;;  %3389 = vmatprep.subr.bf16.mxu1 %v6377_v6  ;;  %v6326_v34 = vcombine.high %v2400_v53, %v2403_v30  ;;  %v9603_v6 = vrot.slane %v8057_v42, 4  ;;  %v6325_v7 = vcombine.low %v2400_v53, %v2403_v30  ;;  %v8394_v42 = vld [vmem:[%s9532_s2 + $0x50] ss:$12 sps:$4 sm:$0xff]  }
 0x49a   : > { %2778 = vst [vmem:[#allocation4 + $0x134] sm:$0xf] %v2760_v0  ;;  %v2388_v8 = vpop.permute.xlu1 %2387  ;;  %v2390_v18 = vpop.permute.xlu0 %2389  ;;  %3333 = vmatpush1.bf16.msra.mxu0 %v6334_v48  ;;  %3390 = vmatpush1.bf16.msra.mxu1 %v6376_v61  ;;  %v2829_v3 = vsel %vm378_vm1, %v2819_v17, %v9602_v33  ;;  %v6856_v48 = vld [vmem:[#allocation4 + $0x98] ss:$12 sps:$4 sm:$0xff]   ;;  %v2826_v0 = vsel %vm378_vm1, %v2817_v37, %v9604_v14 }
 0x49b   : > { %v2397_v29 = vrot.slane %v2388_v8, 4  ;;  %v2398_v21 = vrot.slane %v2390_v18, 4  ;;  %3334 = vmatprep.subr.bf16.mxu0 %v6332_v4  ;;  %3391 = vmatprep.subr.bf16.mxu1 %v9599_v11  ;;  %v2823_v61 = vsel %vm378_vm1, %v2815_v23, %v9603_v6  ;;  %v9605_v4 = vrot.slane %v8096_v38, 4  ;;  %v6860_v23 = vld [vmem:[#allocation4 + $0x68] ss:$12 sps:$4 sm:$0xff]  }
 0x49d   : > { %v2408_v46 = vsel %vm378_vm1, %v2397_v29, %v2398_v21  ;;  %v2410_v51 = vsel %vm380_vm8, %v2390_v18, %v2398_v21  ;;  %v2824_v18 = vsel %vm598_vm2, %v8316_v56, %v2823_v61 }
 0x49e   : > { %v2409_v24 = vsel %vm380_vm8, %v2388_v8, %v2408_v46  ;;  %2426 = vst [vmem:[#allocation4 + $0x2c] sm:$0xf] %v2410_v51  ;;  %v8356_v16 = vpop.permute.xlu1 %2733  ;;  %v8358_v62 = vpop.permute.xlu0 %2677  ;;  %3335 = vmatpush1.bf16.msra.mxu0 %v6331_v28  ;;  %3392 = vmatpush1.bf16.msra.mxu1 %v9601_v44  ;;  %v2830_v8 = vsel %vm598_vm2, %v8228_v25, %v2829_v3 }
 0x49f   : > { %v2748_v32 = vrot.slane %v8356_v16, 4  ;;  %v2686_v22 = vrot.slane %v8358_v62, 4  ;;  %6617 = vmatprep.subr.bf16.mxu1 %v6852_v31  ;;  %v6329_v41 = vcombine.high %v2406_v10, %v2409_v24  ;;  %v6328_v39 = vcombine.low %v2406_v10, %v2409_v24 }
 0x4a0   : > { %v2827_v28 = vsel %vm598_vm2, %v8294_v20, %v2826_v0 }
 0x4a1   : > { %v2757_v9 = vsel %vm563_vm3, %v8356_v16, %v2748_v32  ;;  %v2698_v40 = vsel %vm528_vm4, %v8358_v62, %v2686_v22  ;;  %3336 = vmatprep.subr.bf16.mxu0 %v6329_v41  ;;  %6379 = vmatmul.mubr.msk.bf16.vlgmr.msra.gmra.mxu1 %vm2004_vm14, %v8349_v35  ;;  %v6368_v2 = vcombine.high %v2824_v18, %v2827_v28 }
 0x4a2   : > { %2776 = vst [vmem:[#allocation4 + $0x128] sm:$0xf] %v2757_v9  ;;  %2714 = vst [vmem:[#allocation4 + $0x11c] sm:$0xf] %v2698_v40  ;;  %v2740_v19 = vpop.permute.xlu1 %2739  ;;  %v2812_v52 = vpop.permute.xlu0 %2811  ;;  %3337 = vmatpush1.bf16.msra.mxu0 %v6328_v39  ;;  %6618 = vmatpush3.bf16.msra.mxu1 %v6854_v26  ;;  %v6367_v10 = vcombine.low %v2824_v18, %v2827_v28  ;;  %v6876_v28 = vld [vmem:[#allocation2 + $0x2c] ss:$20 sps:$4 sm:$0xff]  }
 0x4a3   : > { %v2821_v63 = vrot.slane %v2812_v52, 4  ;;  %3338 = vmatprep.subr.bf16.mxu0 %v6326_v34  ;;  %6619 = vmatprep.subr.bf16.mxu1 %v6855_v59  ;;  %v2751_v38 = vrot.slane %v2740_v19, 4  ;;  %v6862_v59 = vld [vmem:[#allocation4 + $0x50] ss:$12 sps:$4 sm:$0xff]  }
 0x4a4   : > { %3419 = vmatprep.mubr.bf16.mxu1 %v9591_v1 }
 0x4a5   : > { %v2832_v12 = vsel %vm378_vm1, %v2821_v63, %v9605_v4  ;;  %v2761_v20 = vsel %vm378_vm1, %v2751_v38, %v2752_v5 }
 0x4a6   : > { %v2833_v13 = vsel %vm598_vm2, %v2812_v52, %v2832_v12  ;;  %v8401_v60 = vpop.permute.xlu1 %2673  ;;  %v2736_v54 = vpop.permute.xlu0 %2735  ;;  %3339 = vmatpush1.bf16.msra.mxu0 %v6325_v7  ;;  %6620 = vmatpush3.bf16.msra.mxu1 %v6856_v48  ;;  %v2762_v5 = vsel %vm563_vm3, %v2740_v19, %v2761_v20  ;;  %v6883_v20 = vld [vmem:[%s9532_s2 + $0x48] ss:$12 sps:$4 sm:$0xff]  }
 0x4a7   : > { %v2684_v29 = vrot.slane %v8401_v60, 4  ;;  %6621 = vmatprep.subr.bf16.mxu1 %v6857_v55  ;;  %v6371_v21 = vcombine.high %v2830_v8, %v2833_v13  ;;  %v6370_v11 = vcombine.low %v2830_v8, %v2833_v13  ;;  %v2749_v25 = vrot.slane %v2736_v54, 4  ;;  %v6865_v13 = vld [vmem:[#allocation4 + $0x38] ss:$12 sps:$4 sm:$0xff]  }
 0x4a9   : > { %v2695_v56 = vsel %vm528_vm4, %v8401_v60, %v2684_v29  ;;  %3340 = vmatprep.subr.bf16.mxu0 %v6371_v21  ;;  %v6859_v30 = vld [vmem:[#allocation4 + $0x128] ss:$12 sps:$4 sm:$0xff]   ;;  %6380 = vmatmul.mubr.msk.bf16.gmra.mxu1 %vm2004_vm14, %v8394_v42  ;;  %v2758_v24 = vsel %vm378_vm1, %v2749_v25, %v2750_v36  ;;  %v6866_v60 = vld [vmem:[#allocation4 + $0xe0] ss:$12 sps:$4 sm:$0xff]  }
 0x4aa   : > { %2712 = vst [vmem:[#allocation4 + $0x110] sm:$0xf] %v2695_v56  ;;  %v2732_v46 = vpop.permute.xlu1 %2731  ;;  %v2744_v51 = vpop.permute.xlu0 %2743  ;;  %3341 = vmatpush2.bf16.msra.mxu0 %v6370_v11  ;;  %6622 = vmatpush3.bf16.msra.mxu1 %v6858_v49  ;;  %v6867_v21 = vld [vmem:[#allocation4 + $0x20] ss:$12 sps:$4 sm:$0xff]   ;;  %v6868_v11 = vld [vmem:[#allocation4 + $0xc8] ss:$12 sps:$4 sm:$0xff]  }
 0x4ab   : > { %v2747_v31 = vrot.slane %v2732_v46, 4  ;;  %v2753_v17 = vrot.slane %v2744_v51, 4  ;;  %3342 = vmatprep.subr.bf16.mxu0 %v6368_v2  ;;  %6623 = vmatprep.subr.bf16.mxu1 %v6859_v30  ;;  %v6877_v25 = vld [vmem:[#allocation2 + $0x8] ss:$20 sps:$4 sm:$0xff]   ;;  %v6872_v56 = vld [vmem:[#allocation4 + $0x1a0] ss:$12 sps:$4 sm:$0xff]  }
 0x4ac   : > { %3462 = vmatprep.mubr.bf16.mxu1 %v8102_v50  ;;  %v6869_v49 = vld [vmem:[#allocation4 + $0x8] ss:$12 sps:$4 sm:$0xff]   ;;  %v6873_v2 = vld [vmem:[%s9532_s2 + $0x30] ss:$12 sps:$4 sm:$0xff]   ;;  %v6880_v30 = vld [vmem:[#allocation2 + $0x4] ss:$20 sps:$4 sm:$0xff]  }
 0x4ad   : > { %v2755_v44 = vsel %vm378_vm1, %v2747_v31, %v2748_v32  ;;  %v2764_v15 = vsel %vm378_vm1, %v2753_v17, %v2754_v58  ;;  %v2759_v32 = vsel %vm563_vm3, %v2736_v54, %v2758_v24 }
 0x4ae   : > { %v2756_v41 = vsel %vm563_vm3, %v2732_v46, %v2755_v44  ;;  %v2765_v39 = vsel %vm563_vm3, %v2744_v51, %v2764_v15  ;;  %v2666_v53 = vpop.permute.xlu1 %2665  ;;  %v2670_v50 = vpop.permute.xlu0 %2669  ;;  %3343 = vmatpush2.bf16.msra.mxu0 %v6367_v10  ;;  %6624 = vmatpush3.bf16.msra.mxu1 %v6860_v23  ;;  %v6881_v46 = vld [vmem:[%s9532_s2 + $0x4c] ss:$12 sps:$4 sm:$0xff]   ;;  %v6879_v51 = vld [vmem:[#allocation4 + $0x188] ss:$12 sps:$4 sm:$0xff]  }
 0x4af   : > { %v2680_v27 = vrot.slane %v2666_v53, 4  ;;  %v2682_v36 = vrot.slane %v2670_v50, 4  ;;  %v6365_v26 = vcombine.high %v2762_v5, %v2765_v39  ;;  %v6364_v16 = vcombine.low %v2762_v5, %v2765_v39 }
 0x4b0   : > { %v6362_v9 = vcombine.high %v2756_v41, %v2759_v32  ;;  %v6361_v33 = vcombine.low %v2756_v41, %v2759_v32 }
 0x4b1   : > { %v2689_v57 = vsel %vm528_vm4, %v2666_v53, %v2680_v27  ;;  %v2692_v58 = vsel %vm528_vm4, %v2670_v50, %v2682_v36  ;;  %v6861_v37 = vld [vmem:[#allocation4 + $0x110] ss:$12 sps:$4 sm:$0xff]   ;;  %3344 = vmatprep.subr.bf16.mxu0 %v6365_v26 }
 0x4b2   : > { %2708 = vst [vmem:[#allocation4 + $0xf8] sm:$0xf] %v2689_v57  ;;  %2710 = vst [vmem:[#allocation4 + $0x104] sm:$0xf] %v2692_v58  ;;  %v2672_v40 = vpop.permute.xlu1 %2671  ;;  %v2676_v34 = vpop.permute.xlu0 %2675  ;;  %3345 = vmatpush2.bf16.msra.mxu0 %v6364_v16  ;;  %6625 = vmatprep.subr.bf16.mxu1 %v6861_v37 }
 0x4b3   : > { %v2683_v19 = vrot.slane %v2672_v40, 4  ;;  %v2685_v52 = vrot.slane %v2676_v34, 4  ;;  %3346 = vmatprep.subr.bf16.mxu0 %v6362_v9  ;;  %6626 = vmatpush3.bf16.msra.mxu1 %v6862_v59 }
 0x4b5   : > { %v2693_v3 = vsel %vm378_vm1, %v2683_v19, %v2684_v29  ;;  %v2696_v6 = vsel %vm378_vm1, %v2685_v52, %v2686_v22  ;;  %v6870_v29 = vld [vmem:[#allocation2 + $0x30] ss:$20 sps:$4 sm:$0xff]  }
 0x4b6   : > { %v2694_v61 = vsel %vm528_vm4, %v2672_v40, %v2693_v3  ;;  %v2697_v63 = vsel %vm528_vm4, %v2676_v34, %v2696_v6  ;;  %v2664_v7 = vpop.permute.xlu1 %2663  ;;  %v2668_v48 = vpop.permute.xlu0 %2667  ;;  %3347 = vmatpush2.bf16.msra.mxu0 %v6361_v33 }
 0x4b7   : > { %v2679_v14 = vrot.slane %v2664_v7, 4  ;;  %v2681_v0 = vrot.slane %v2668_v48, 4  ;;  %v6359_v4 = vcombine.high %v2694_v61, %v2697_v63  ;;  %v6358_v12 = vcombine.low %v2694_v61, %v2697_v63 }
 0x4b9   : > { %v2687_v55 = vsel %vm378_vm1, %v2679_v14, %v2680_v27  ;;  %v2690_v8 = vsel %vm378_vm1, %v2681_v0, %v2682_v36  ;;  %v6864_v18 = vld [vmem:[#allocation4 + $0xf8] ss:$12 sps:$4 sm:$0xff]   ;;  %3348 = vmatprep.subr.bf16.mxu0 %v6359_v4 }
 0x4ba   : > { %v2688_v62 = vsel %vm528_vm4, %v2664_v7, %v2687_v55  ;;  %v2691_v22 = vsel %vm528_vm4, %v2668_v48, %v2690_v8  ;;  %3349 = vmatpush2.bf16.msra.mxu0 %v6358_v12  ;;  %6627 = vmatprep.subr.bf16.mxu1 %v6864_v18 }
 0x4bb   : > { %v6356_v54 = vcombine.high %v2688_v62, %v2691_v22  ;;  %v6355_v38 = vcombine.low %v2688_v62, %v2691_v22  ;;  %6628 = vmatpush3.bf16.msra.mxu1 %v6865_v13 }
 0x4bc   : > { %6629 = vmatprep.subr.bf16.mxu1 %v6866_v60 }
 0x4bd   : > { %3350 = vmatprep.subr.bf16.mxu0 %v6356_v54 }
 0x4be   : > { %3351 = vmatpush2.bf16.msra.mxu0 %v6355_v38 }
 0x4bf   : > { %3352 = vmatprep.subr.bf16.mxu0 %v6870_v29  ;;  %6630 = vmatpush3.bf16.msra.mxu1 %v6867_v21 }
 0x4c0   : > { %6631 = vmatprep.subr.bf16.mxu1 %v6868_v11 }
 0x4c2   : > { %3353 = vmatpush2.bf16.msra.mxu0 %v6876_v28 }
 0x4c3   : > { %3354 = vmatprep.subr.bf16.mxu0 %v6877_v25  ;;  %6632 = vmatpush3.bf16.msra.mxu1 %v6869_v49  ;;  %v8453_v44 = vpop.permute.xlu1 %3545  ;;  %v8455_v5 = vpop.permute.xlu0 %3550 }
 0x4c4   : > { %6714 = vmatprep.subr.bf16.mxu1 %v6872_v56 }
 0x4c6   : > { %3355 = vmatpush2.bf16.msra.mxu0 %v6880_v30  ;;  %3463 = vmatmul.mubr.bf16.vlgmr.msra.gmra.mxu1 %v6873_v2 }
 0x4c7   : > { %6715 = vmatpush3.bf16.msra.mxu1 %v6872_v56  ;;  %3470 = vmatprep.mubr.bf16.mxu1 %v6881_v46  ;;  %v8457_v41 = vpop.permute.xlu1 %3582 }
 0x4c8   : > { %6716 = vmatprep.subr.bf16.mxu1 %v6879_v51 }
 0x4c9   : > { %3357 = vmatmul.mubr.bf16.vlgmr.msra.gmra.mxu0 %v6873_v2 }
 0x4ca   : > { %3366 = vmatprep.mubr.bf16.mxu0 %v6881_v46 }
 0x4cb   : > { %6717 = vmatpush3.bf16.msra.mxu1 %v6879_v51  ;;  %v8461_v50 = vpop.permute.xlu1 %3535 }
 0x4ce   : > { %3471 = vmatmul.mubr.bf16.gmra.mxu1 %v6883_v20 }
 0x4cf   : > { %6718 = vmatprep.mubr.msk.bf16.mxu1 %vm2004_vm14, %v8349_v35  ;;  %v8459_v35 = vpop.permute.xlu0 %3587  ;;  %v8465_v58 = vpop.permute.xlu1 %3572 }
 0x4d1   : > { %3367 = vmatmul.mubr.bf16.gmra.mxu0 %v6883_v20 }
 0x4d2   : > { %4724 = vmatprep.mubr.bf16.mxu0 %v9591_v1 }
 0x4d3   : > { %v8463_v26 = vpop.permute.xlu0 %3540 }
 0x4d6   : > { %6719 = vmatmul.mubr.msk.bf16.vlgmr.msra.gmra.mxu1 %vm2004_vm14, %v8394_v42 }
 0x4d7   : > { %v8470_v6 = vpop.permute.xlu0 %3577 }
 0x561   : > { %v3411_v31 = vpop.f32.mrf.mxu1 }
 0x563   : > { %v3413_v17 = vpop.f32.mrf.mxu1 }
 0x565   : > { %v3415_v10 = vpop.f32.mrf.mxu1 }
 0x567   : > { %v3417_v23 = vpop.f32.mrf.mxu1 }
 0x569   : > { %v3421_v24 = vpop.f32.mrf.mxu1 }
 0x56b   : > { %v3423_v15 = vpop.f32.mrf.mxu1 }
 0x56d   : > { %v3425_v39 = vpop.f32.mrf.mxu1 }
 0x56f   : > { %v3427_v53 = vpop.f32.mrf.mxu1 }
 0x586   : > { %v6633_v27 = vpop.f32.mrf.mxu1 }
 0x588   : > { %v6634_v42 = vpop.f32.mrf.mxu1 }
 0x589   : > { %v3358_v36 = vpop.f32.mrf.mxu0  ;;  %v6635_v2 = vadd.f32 %v6634_v42, %v6633_v27 }
 0x58a   : > { %v3412_v16 = vadd.f32 %v3411_v31, %v3358_v36  ;;  %v6636_v32 = vpop.f32.mrf.mxu1 }
 0x58b   : > { %v3360_v57 = vpop.f32.mrf.mxu0 }
 0x58c   : > { %v3553_v37 = vmul.f32 %v8461_v50, %v3412_v16  ;;  %v3414_v9 = vadd.f32 %v3413_v17, %v3360_v57  ;;  %v6637_v40 = vpop.f32.mrf.mxu1 }
 0x58d   : > { %v3362_v34 = vpop.f32.mrf.mxu0 }
 0x58e   : > { %v3590_v59 = vadd.f32 %v8465_v58, %v3553_v37  ;;  %v3554_v19 = vmul.f32 %v8461_v50, %v3414_v9  ;;  %v3416_v52 = vadd.f32 %v3415_v10, %v3362_v34  ;;  %v6639_v33 = vpop.f32.mrf.mxu1  ;;  %v6638_v9 = vadd.f32 %v6637_v40, %v6636_v32 }
 0x58f   : > { %v3364_v3 = vpop.f32.mrf.mxu0 }
 0x590   : > { %v3602_v61 = vmax.f32 %v3590_v59, 0.0  ;;  %v3591_v63 = vadd.f32 %v8465_v58, %v3554_v19  ;;  %v3556_v7 = vmul.f32 %v8463_v26, %v3416_v52  ;;  %v3418_v48 = vadd.f32 %v3417_v23, %v3364_v3  ;;  %v6640_v14 = vpop.f32.mrf.mxu1 }
 0x591   : > { %v3368_v0 = vpop.f32.mrf.mxu0  ;;  %v6641_v25 = vadd.f32 %v6640_v14, %v6639_v33 }
 0x592   : > { %v3603_v4 = vmax.f32 %v3591_v63, 0.0  ;;  %v3593_v12 = vadd.f32 %v8470_v6, %v3556_v7  ;;  %v6642_v55 = vpop.f32.mrf.mxu1  ;;  %v3557_v8 = vmul.f32 %v8463_v26, %v3418_v48  ;;  %v3422_v18 = vadd.f32 %v3421_v24, %v3368_v0 }
 0x593   : > { %v3370_v62 = vpop.f32.mrf.mxu0  ;;  %v3614_v22 = vsel %vm983_vm11, %v3602_v61, 0.0 }
 0x594   : > { %v3615_v13 = vsel %vm984_vm12, %v3603_v4, 0.0  ;;  %v3424_v60 = vadd.f32 %v3423_v15, %v3370_v62  ;;  %v3605_v38 = vmax.f32 %v3593_v12, 0.0  ;;  %v3594_v29 = vadd.f32 %v8470_v6, %v3557_v8  ;;  %v6643_v21 = vpop.f32.mrf.mxu1 }
 0x595   : > { %v8480_v54 = vpack.c.bf16 %v3615_v13, %v3614_v22  ;;  %v3559_v11 = vmul.f32 %v8453_v44, %v3422_v18  ;;  %v3372_v28 = vpop.f32.mrf.mxu0 }
 0x596   : > { %v3560_v49 = vmul.f32 %v8453_v44, %v3424_v60  ;;  %v3426_v56 = vadd.f32 %v3425_v39, %v3372_v28  ;;  %v3606_v30 = vmax.f32 %v3594_v29, 0.0  ;;  %v6720_v51 = vpop.f32.mrf.mxu1  ;;  %v3617_v24 = vsel %vm983_vm11, %v3605_v38, 0.0 }
 0x597   : > { %3666 = vst [vmem:[#allocation3 + $0x4] sm:$0xff] %v8480_v54  ;;  %v3596_v46 = vadd.f32 %v8457_v41, %v3559_v11  ;;  %v3374_v20 = vpop.f32.mrf.mxu0  ;;  %v3522_v31 = vadd.f32 %v6720_v51, %v6641_v25  ;;  %v6644_v39 = vadd.f32 %v6643_v21, %v6642_v55 }
 0x598   : > { %v3597_v17 = vadd.f32 %v8457_v41, %v3560_v49  ;;  %v3562_v10 = vmul.f32 %v8455_v5, %v3426_v56  ;;  %v3428_v23 = vadd.f32 %v3427_v53, %v3374_v20  ;;  %v3618_v15 = vsel %vm984_vm12, %v3606_v30, 0.0  ;;  %v3513_v42 = vpop.f32.mrf.mxu1 }
 0x599   : > { %v3608_v27 = vmax.f32 %v3596_v46, 0.0  ;;  %v8493_v36 = vpack.c.bf16 %v3618_v15, %v3617_v24  ;;  %v3561_v16 = vmul.f32 %v8453_v44, %v3522_v31  ;;  %v3514_v37 = vadd.f32 %v6635_v2, %v3513_v42 }
 0x59a   : > { %v3609_v57 = vmax.f32 %v3597_v17, 0.0  ;;  %v3599_v53 = vadd.f32 %v8459_v35, %v3562_v10  ;;  %v6721_v59 = vpop.f32.mrf.mxu1  ;;  %v3563_v19 = vmul.f32 %v8455_v5, %v3428_v23 }
 0x59b   : > { %v3620_v34 = vsel %vm983_vm11, %v3608_v27, 0.0  ;;  %3668 = vst [vmem:[#allocation3 + $0x18] sm:$0xff] %v8493_v36  ;;  %v3598_v52 = vadd.f32 %v8457_v41, %v3561_v16  ;;  %v3555_v44 = vmul.f32 %v8461_v50, %v3514_v37  ;;  %v3525_v3 = vadd.f32 %v6721_v59, %v6644_v39 }
 0x59c   : > { %v3621_v33 = vsel %vm984_vm12, %v3609_v57, 0.0  ;;  %v3611_v32 = vmax.f32 %v3599_v53, 0.0  ;;  %v3600_v40 = vadd.f32 %v8459_v35, %v3563_v19  ;;  %v3516_v63 = vpop.f32.mrf.mxu1 }
 0x59d   : > { %v8505_v61 = vpack.c.bf16 %v3621_v33, %v3620_v34  ;;  %v3610_v7 = vmax.f32 %v3598_v52, 0.0  ;;  %v3592_v48 = vadd.f32 %v8465_v58, %v3555_v44  ;;  %v3564_v14 = vmul.f32 %v8455_v5, %v3525_v3  ;;  %v6474_v3 = vld [vmem:[%s9534_s4 + $0x58] sm:$0xff] }
 0x59e   : > { %v3517_v0 = vadd.f32 %v6638_v9, %v3516_v63  ;;  %v3612_v41 = vmax.f32 %v3600_v40, 0.0  ;;  %v3623_v18 = vsel %vm983_vm11, %v3611_v32, 0.0  ;;  %v3878_v2 = vld [vmem:[#allocation3] sm:$0xff] }
 0x59f   : > { %3670 = vst [vmem:[#allocation3 + $0x2c] sm:$0xff] %v8505_v61  ;;  %v3622_v4 = vsel %vm985_vm13, %v3610_v7, 0.0  ;;  %v3604_v50 = vmax.f32 %v3592_v48, 0.0  ;;  %v3601_v12 = vadd.f32 %v8459_v35, %v3564_v14  ;;  %v6473_v32 = vld [vmem:[%s9534_s4 + $0x50] sm:$0xff]  ;;  %v6478_v7 = vld [vmem:[%s9535_s5 + $0x58] sm:$0xff] }
 0x5a0   : > { %v3558_v55 = vmul.f32 %v8463_v26, %v3517_v0  ;;  %v6574_v8 = vpack.c.bf16 %v3622_v4, %v3622_v4  ;;  %v3624_v58 = vsel %vm984_vm12, %v3612_v41, 0.0  ;;  %v8672_v63 = vld [vmem:[%s9532_s2 + $0x64] ss:$12 sps:$4 sm:$0xff]  }
 0x5a1   : > { %v3616_v5 = vsel %vm985_vm13, %v3604_v50, 0.0  ;;  %v3613_v62 = vmax.f32 %v3601_v12, 0.0  ;;  %v8521_v22 = vpack.c.bf16 %v3624_v58, %v3623_v18  ;;  %v6477_v14 = vld [vmem:[%s9535_s5 + $0x50] sm:$0xff]  ;;  %4671 = vmatprep.mubr.bf16.mxu1 %v8672_v63  ;;  %v6472_v12 = vld [vmem:[%s9534_s4 + $0x48] sm:$0xff] }
 0x5a2   : > { %v3595_v13 = vadd.f32 %v8470_v6, %v3558_v55  ;;  %3671 = vst [vmem:[#allocation3 + $0x34] sm:$0xf] %v6574_v8  ;;  %v6570_v60 = vpack.c.bf16 %v3616_v5, %v3616_v5  ;;  %v3880_v20 = vld [vmem:[#allocation3 + $0x14] sm:$0xff] }
 0x5a3   : > { %v3625_v35 = vsel %vm985_vm13, %v3613_v62, 0.0  ;;  %3672 = vst [vmem:[#allocation3 + $0x40] sm:$0xff] %v8521_v22  ;;  %v6471_v55 = vld [vmem:[%s9534_s4 + $0x40] sm:$0xff]  ;;  %v6476_v62 = vld [vmem:[%s9535_s5 + $0x48] sm:$0xff] }
 0x5a4   : > { %v3607_v26 = vmax.f32 %v3595_v13, 0.0  ;;  %3667 = vst [vmem:[#allocation3 + $0xc] sm:$0xf] %v6570_v60  ;;  %v6576_v38 = vpack.c.bf16 %v3625_v35, %v3625_v35 }
 0x5a6   : > { %v3619_v29 = vsel %vm985_vm13, %v3607_v26, 0.0  ;;  %3673 = vst [vmem:[#allocation3 + $0x48] sm:$0xf] %v6576_v38  ;;  %v3882_v17 = vld [vmem:[#allocation3 + $0x28] sm:$0xff] }
 0x5a7   : > { %v6572_v21 = vpack.c.bf16 %v3619_v29, %v3619_v29 }
 0x5a9   : > { %3669 = vst [vmem:[#allocation3 + $0x20] sm:$0xf] %v6572_v21  ;;  %v8529_v11 = vld [vmem:[#allocation3 + $0x34] sm:$0xff] }
 0x5aa   : > { %v3951_v28 = vld [vmem:[#allocation3 + $0x34] sm:$0xf]  ;;  %4192 = vrot.lane.b32.xlu0 %v8529_v11, %s9594_s11  ;;  %4124 = vrot.lane.b32.xlu1 %v8529_v11, %s9595_s8  ;;  %v3884_v24 = vld [vmem:[#allocation3 + $0x3c] sm:$0xff] }
 0x5ab   : > { %3959 = vst [vmem:[#allocation4 + $0xe0] sm:$0xf] %v3951_v28  ;;  %v3947_v6 = vld [vmem:[#allocation3 + $0xc] sm:$0xf]  ;;  %v3883_v10 = vld [vmem:[#allocation3 + $0x30] sm:$0xff] }
 0x5ac   : > { %3955 = vst [vmem:[#allocation4 + $0xc8] sm:$0xf] %v3947_v6  ;;  %v8535_v25 = vld [vmem:[#allocation3 + $0xc] sm:$0xff] }
 0x5ad   : > { %v3953_v49 = vld [vmem:[#allocation3 + $0x48] sm:$0xf] }
 0x5ae   : > { %4184 = vrot.lane.b32.xlu0 %v8535_v25, %s9594_s11  ;;  %4116 = vrot.lane.b32.xlu1 %v8535_v25, %s9595_s8  ;;  %3961 = vst [vmem:[#allocation4 + $0xec] sm:$0xf] %v3953_v49  ;;  %v4173_v30 = vld [vmem:[#allocation3 + $0x48] sm:$0xff] }
 0x5af   : > { %v3879_v51 = vld [vmem:[#allocation3 + $0x8] sm:$0xff] }
 0x5b0   : > { %v3949_v56 = vld [vmem:[#allocation3 + $0x20] sm:$0xf]  ;;  %v3885_v23 = vld [vmem:[#allocation3 + $0x44] sm:$0xff] }
 0x5b1   : > { %3957 = vst [vmem:[#allocation4 + $0xd4] sm:$0xf] %v3949_v56  ;;  %v4169_v46 = vld [vmem:[#allocation3 + $0x20] sm:$0xff] }
 0x5b2   : > { %3894 = vrot.lane.b32.xlu1 %v3878_v2, %s9596_s18  ;;  %4196 = vrot.lane.b32.xlu0 %v4173_v30, %s9594_s11  ;;  %v3881_v31 = vld [vmem:[#allocation3 + $0x1c] sm:$0xff] }
 0x5b6   : > { %3826 = vrot.lane.b32.xlu1 %v3878_v2, %s9597_s23  ;;  %4128 = vrot.lane.b32.xlu0 %v4173_v30, %s9595_s8 }
 0x5ba   : > { %3758 = vrot.lane.b32.xlu1 %v3878_v2, %s9598_s17  ;;  %4188 = vrot.lane.b32.xlu0 %v4169_v46, %s9594_s11 }
 0x5be   : > { %4182 = vrot.lane.b32.xlu1 %v8480_v54, %s9594_s11  ;;  %4120 = vrot.lane.b32.xlu0 %v4169_v46, %s9595_s8 }
 0x5c2   : > { %3690 = vrot.lane.b32.xlu1 %v3878_v2, %s9584_s22  ;;  %3896 = vrot.lane.b32.xlu0 %v3879_v51, %s9596_s18 }
 0x5c6   : > { %3828 = vrot.lane.b32.xlu0 %v3879_v51, %s9597_s23  ;;  %3898 = vrot.lane.b32.xlu1 %v3880_v20, %s9596_s18 }
 0x5ca   : > { %3760 = vrot.lane.b32.xlu0 %v3879_v51, %s9598_s17  ;;  %3830 = vrot.lane.b32.xlu1 %v3880_v20, %s9597_s23 }
 0x5ce   : > { %3692 = vrot.lane.b32.xlu0 %v3879_v51, %s9584_s22  ;;  %3762 = vrot.lane.b32.xlu1 %v3880_v20, %s9598_s17 }
 0x5d2   : > { %3900 = vrot.lane.b32.xlu0 %v3881_v31, %s9596_s18  ;;  %4186 = vrot.lane.b32.xlu1 %v8493_v36, %s9594_s11 }
 0x5d6   : > { %3832 = vrot.lane.b32.xlu0 %v3881_v31, %s9597_s23  ;;  %3694 = vrot.lane.b32.xlu1 %v3880_v20, %s9584_s22 }
 0x5da   : > { %3764 = vrot.lane.b32.xlu0 %v3881_v31, %s9598_s17  ;;  %3902 = vrot.lane.b32.xlu1 %v3882_v17, %s9596_s18 }
 0x5de   : > { %3696 = vrot.lane.b32.xlu0 %v3881_v31, %s9584_s22  ;;  %3834 = vrot.lane.b32.xlu1 %v3882_v17, %s9597_s23 }
 0x5e2   : > { %3904 = vrot.lane.b32.xlu0 %v3883_v10, %s9596_s18  ;;  %3766 = vrot.lane.b32.xlu1 %v3882_v17, %s9598_s17 }
 0x5e6   : > { %3836 = vrot.lane.b32.xlu0 %v3883_v10, %s9597_s23  ;;  %4190 = vrot.lane.b32.xlu1 %v8505_v61, %s9594_s11 }
 0x5ea   : > { %3768 = vrot.lane.b32.xlu0 %v3883_v10, %s9598_s17  ;;  %3698 = vrot.lane.b32.xlu1 %v3882_v17, %s9584_s22 }
 0x5ee   : > { %3700 = vrot.lane.b32.xlu0 %v3883_v10, %s9584_s22  ;;  %4122 = vrot.lane.b32.xlu1 %v8505_v61, %s9595_s8 }
 0x5f2   : > { %3908 = vrot.lane.b32.xlu0 %v3885_v23, %s9596_s18  ;;  %3906 = vrot.lane.b32.xlu1 %v3884_v24, %s9596_s18 }
 0x5f6   : > { %4060 = vrot.lane.b32.xlu0 %v4173_v30, %s9585_s29  ;;  %4056 = vrot.lane.b32.xlu1 %v8529_v11, %s9585_s29 }
 0x5fa   : > { %3840 = vrot.lane.b32.xlu0 %v3885_v23, %s9597_s23  ;;  %3838 = vrot.lane.b32.xlu1 %v3884_v24, %s9597_s23 }
 0x5fe   : > { %3772 = vrot.lane.b32.xlu0 %v3885_v23, %s9598_s17  ;;  %3770 = vrot.lane.b32.xlu1 %v3884_v24, %s9598_s17 }
 0x602   : > { %4118 = vrot.lane.b32.xlu0 %v8493_v36, %s9595_s8  ;;  %4194 = vrot.lane.b32.xlu1 %v8521_v22, %s9594_s11 }
 0x606   : > { %4052 = vrot.lane.b32.xlu0 %v4169_v46, %s9585_s29  ;;  %4114 = vrot.lane.b32.xlu1 %v8480_v54, %s9595_s8 }
 0x60a   : > { %3704 = vrot.lane.b32.xlu0 %v3885_v23, %s9584_s22  ;;  %3702 = vrot.lane.b32.xlu1 %v3884_v24, %s9584_s22 }
 0x60e   : > { %3992 = vrot.lane.b32.xlu0 %v4173_v30, %s9586_s9  ;;  %4048 = vrot.lane.b32.xlu1 %v8535_v25, %s9585_s29 }
 0x612   : > { %4126 = vrot.lane.b32.xlu0 %v8521_v22, %s9595_s8  ;;  %4054 = vrot.lane.b32.xlu1 %v8505_v61, %s9585_s29 }
 0x616   : > { %4050 = vrot.lane.b32.xlu0 %v8493_v36, %s9585_s29  ;;  %3988 = vrot.lane.b32.xlu1 %v8529_v11, %s9586_s9 }
 0x61a   : > { %4058 = vrot.lane.b32.xlu0 %v8521_v22, %s9585_s29  ;;  %4046 = vrot.lane.b32.xlu1 %v8480_v54, %s9585_s29 }
 0x61c   : > { %v8610_v15 = vpop.permute.xlu1 %4124  ;;  %v8612_v39 = vpop.permute.xlu0 %4192 }
 0x61d   : > { %v9571_v27 = vrot.slane %v8610_v15, 4  ;;  %v4203_v42 = vrot.slane %v8612_v39, 4 }
 0x61e   : > { %3984 = vrot.lane.b32.xlu0 %v4169_v46, %s9586_s9  ;;  %3980 = vrot.lane.b32.xlu1 %v8535_v25, %s9586_s9 }
 0x61f   : > { %v4146_v16 = vsel %vm598_vm2, %v8610_v15, %v9571_v27  ;;  %v4214_v57 = vsel %vm633_vm9, %v8612_v39, %v4203_v42 }
 0x620   : > { %4163 = vst [vmem:[#allocation4 + $0x170] sm:$0xf] %v4146_v16  ;;  %4231 = vst [vmem:[#allocation4 + $0x1a0] sm:$0xf] %v4214_v57  ;;  %v8627_v37 = vpop.permute.xlu1 %4116  ;;  %v8629_v9 = vpop.permute.xlu0 %4184 }
 0x621   : > { %v9570_v34 = vrot.slane %v8627_v37, 4  ;;  %v4199_v53 = vrot.slane %v8629_v9, 4 }
 0x622   : > { %3990 = vrot.lane.b32.xlu0 %v8521_v22, %s9586_s9  ;;  %3986 = vrot.lane.b32.xlu1 %v8505_v61, %s9586_s9  ;;  %v6475_v22 = vld [vmem:[%s9535_s5 + $0x40] sm:$0xff] }
 0x623   : > { %v4140_v59 = vsel %vm598_vm2, %v8627_v37, %v9570_v34  ;;  %v4208_v19 = vsel %vm633_vm9, %v8629_v9, %v4199_v53 }
 0x624   : > { %4159 = vst [vmem:[#allocation4 + $0x158] sm:$0xf] %v4140_v59  ;;  %4227 = vst [vmem:[#allocation4 + $0x188] sm:$0xf] %v4208_v19  ;;  %v8645_v52 = vpop.permute.xlu1 %3894  ;;  %v8647_v33 = vpop.permute.xlu0 %4196 }
 0x625   : > { %v4205_v44 = vrot.slane %v8647_v33, 4 }
 0x626   : > { %3982 = vrot.lane.b32.xlu0 %v8493_v36, %s9586_s9  ;;  %3978 = vrot.lane.b32.xlu1 %v8480_v54, %s9586_s9 }
 0x627   : > { %v4217_v61 = vsel %vm633_vm9, %v8647_v33, %v4205_v44 }
 0x628   : > { %4233 = vst [vmem:[#allocation4 + $0x1ac] sm:$0xf] %v4217_v61  ;;  %v8664_v40 = vpop.permute.xlu1 %3826  ;;  %v8666_v36 = vpop.permute.xlu0 %4128 }
 0x629   : > { %v9568_v54 = vrot.slane %v8666_v36, 4 }
 0x62a   : > { %4865 = vperm.xlu0 %6803, %v6474_v3   ;;  %4860 = vperm.xlu1 %6804, %v6473_v32  }
 0x62b   : > { %v4149_v48 = vsel %vm598_vm2, %v8666_v36, %v9568_v54 }
 0x62c   : > { %4165 = vst [vmem:[#allocation4 + $0x17c] sm:$0xf] %v4149_v48  ;;  %v8685_v0 = vpop.permute.xlu1 %3758  ;;  %v4189_v41 = vpop.permute.xlu0 %4188 }
 0x62d   : > { %v4201_v4 = vrot.slane %v4189_v41, 4 }
 0x62e   : > { %4902 = vperm.xlu0 %6803, %v6478_v7   ;;  %4897 = vperm.xlu1 %6804, %v6477_v14  }
 0x62f   : > { %v4211_v50 = vsel %vm633_vm9, %v4189_v41, %v4201_v4 }
 0x630   : > { %4229 = vst [vmem:[#allocation4 + $0x194] sm:$0xf] %v4211_v50  ;;  %v4183_v8 = vpop.permute.xlu1 %4182  ;;  %v8694_v18 = vpop.permute.xlu0 %4120 }
 0x631   : > { %v9569_v58 = vrot.slane %v8694_v18, 4  ;;  %v4198_v46 = vrot.slane %v4183_v8, 4 }
 0x632   : > { %4855 = vperm.xlu0 %6803, %v6472_v12   ;;  %4850 = vperm.xlu1 %6804, %v6471_v55  }
 0x633   : > { %v4143_v5 = vsel %vm598_vm2, %v8694_v18, %v9569_v58  ;;  %v4206_v23 = vsel %vm378_vm1, %v4198_v46, %v4199_v53 }
 0x634   : > { %4161 = vst [vmem:[#allocation4 + $0x164] sm:$0xf] %v4143_v5  ;;  %v8707_v13 = vpop.permute.xlu1 %3690  ;;  %v8709_v60 = vpop.permute.xlu0 %3896  ;;  %v8756_v3 = vsel %vm633_vm9, %v4183_v8, %v4206_v23 }
 0x635   : > { %v3911_v35 = vrot.slane %v8709_v60, 4 }
 0x636   : > { %4892 = vperm.xlu0 %6803, %v6476_v62   ;;  %4887 = vperm.xlu1 %6804, %v6475_v22  }
 0x637   : > { %v3920_v26 = vsel %vm485_vm5, %v8709_v60, %v3911_v35 }
 0x638   : > { %3939 = vst [vmem:[#allocation4 + $0x98] sm:$0xf] %v3920_v26  ;;  %v8716_v38 = vpop.permute.xlu1 %3898  ;;  %v8718_v29 = vpop.permute.xlu0 %3828 }
 0x639   : > { %v3843_v21 = vrot.slane %v8718_v29, 4 }
 0x63b   : > { %v3852_v11 = vsel %vm450_vm6, %v8718_v29, %v3843_v21 }
 0x63c   : > { %3871 = vst [vmem:[#allocation4 + $0x68] sm:$0xf] %v3852_v11  ;;  %v8725_v28 = vpop.permute.xlu1 %3830  ;;  %v8727_v6 = vpop.permute.xlu0 %3760 }
 0x63d   : > { %v3775_v25 = vrot.slane %v8727_v6, 4 }
 0x63f   : > { %v3784_v49 = vsel %vm415_vm7, %v8727_v6, %v3775_v25 }
 0x640   : > { %3803 = vst [vmem:[#allocation4 + $0x38] sm:$0xf] %v3784_v49  ;;  %v8734_v56 = vpop.permute.xlu1 %3762  ;;  %v8736_v2 = vpop.permute.xlu0 %3692 }
 0x641   : > { %v9572_v30 = vrot.slane %v8736_v2, 4 }
 0x643   : > { %v3716_v51 = vsel %vm380_vm8, %v8736_v2, %v9572_v30 }
 0x644   : > { %3735 = vst [vmem:[#allocation4 + $0x8] sm:$0xf] %v3716_v51  ;;  %v4187_v20 = vpop.permute.xlu1 %4186  ;;  %v3901_v31 = vpop.permute.xlu0 %3900 }
 0x645   : > { %v4200_v17 = vrot.slane %v4187_v20, 4  ;;  %v3913_v10 = vrot.slane %v3901_v31, 4 }
 0x647   : > { %v4209_v24 = vsel %vm378_vm1, %v4200_v17, %v4201_v4  ;;  %v3923_v16 = vsel %vm485_vm5, %v3901_v31, %v3913_v10 }
 0x648   : > { %v8749_v57 = vsel %vm633_vm9, %v4187_v20, %v4209_v24  ;;  %3941 = vst [vmem:[#allocation4 + $0xa4] sm:$0xf] %v3923_v16  ;;  %v8751_v59 = vpop.permute.xlu1 %3694  ;;  %v8753_v19 = vpop.permute.xlu0 %3832 }
 0x649   : > { %v3845_v61 = vrot.slane %v8753_v19, 4 }
 0x64b   : > { %v3855_v32 = vsel %vm450_vm6, %v8753_v19, %v3845_v61 }
 0x64c   : > { %3873 = vst [vmem:[#allocation4 + $0x74] sm:$0xf] %v3855_v32  ;;  %v3903_v7 = vpop.permute.xlu1 %3902  ;;  %v8767_v48 = vpop.permute.xlu0 %3764  ;;  %v3912_v32 = vrot.slane %v8716_v38, 4 }
 0x64d   : > { %v3777_v14 = vrot.slane %v8767_v48, 4 }
 0x64f   : > { %v3787_v41 = vsel %vm415_vm7, %v8767_v48, %v3777_v14 }
 0x650   : > { %3805 = vst [vmem:[#allocation4 + $0x44] sm:$0xf] %v3787_v41  ;;  %v8774_v4 = vpop.permute.xlu1 %3834  ;;  %v8776_v50 = vpop.permute.xlu0 %3696  ;;  %v3914_v41 = vrot.slane %v3903_v7, 4 }
 0x651   : > { %v3709_v12 = vrot.slane %v8776_v50, 4 }
 0x653   : > { %v3719_v55 = vsel %vm380_vm8, %v8776_v50, %v3709_v12 }
 0x654   : > { %3737 = vst [vmem:[#allocation4 + $0x14] sm:$0xf] %v3719_v55  ;;  %v8783_v8 = vpop.permute.xlu1 %3766  ;;  %v3905_v5 = vpop.permute.xlu0 %3904 }
 0x655   : > { %v3915_v62 = vrot.slane %v3905_v5, 4 }
 0x657   : > { %v3926_v22 = vsel %vm485_vm5, %v3905_v5, %v3915_v62  ;;  %v3910_v5 = vrot.slane %v8645_v52, 4 }
 0x658   : > { %3943 = vst [vmem:[#allocation4 + $0xb0] sm:$0xf] %v3926_v22  ;;  %v8786_v26 = vpop.permute.xlu1 %4190  ;;  %v3837_v11 = vpop.permute.xlu0 %3836 }
 0x659   : > { %v3847_v49 = vrot.slane %v3837_v11, 4  ;;  %v3918_v34 = vsel %vm378_vm1, %v3910_v5, %v3911_v35  ;;  %v3842_v5 = vrot.slane %v8664_v40, 4 }
 0x65b   : > { %v3858_v46 = vsel %vm450_vm6, %v3837_v11, %v3847_v49 }
 0x65c   : > { %3875 = vst [vmem:[#allocation4 + $0x80] sm:$0xf] %v3858_v46  ;;  %v8789_v51 = vpop.permute.xlu1 %3698  ;;  %v8791_v20 = vpop.permute.xlu0 %3768  ;;  %v3921_v46 = vsel %vm378_vm1, %v3912_v32, %v3913_v10 }
 0x65d   : > { %v3779_v31 = vrot.slane %v8791_v20, 4  ;;  %v3922_v30 = vsel %vm485_vm5, %v8716_v38, %v3921_v46  ;;  %v3844_v38 = vrot.slane %v8725_v28, 4 }
 0x65f   : > { %v3790_v17 = vsel %vm415_vm7, %v8791_v20, %v3779_v31 }
 0x660   : > { %3807 = vst [vmem:[#allocation4 + $0x50] sm:$0xf] %v3790_v17  ;;  %v8798_v23 = vpop.permute.xlu1 %4122  ;;  %v8800_v24 = vpop.permute.xlu0 %3700  ;;  %v3924_v17 = vsel %vm378_vm1, %v3914_v41, %v3915_v62 }
 0x661   : > { %v3711_v16 = vrot.slane %v8800_v24, 4 }
 0x663   : > { %v3722_v55 = vsel %vm380_vm8, %v8800_v24, %v3711_v16 }
 0x664   : > { %3739 = vst [vmem:[#allocation4 + $0x20] sm:$0xf] %v3722_v55  ;;  %v3907_v22 = vpop.permute.xlu1 %3906  ;;  %v3909_v11 = vpop.permute.xlu0 %3908  ;;  %v3925_v55 = vsel %vm485_vm5, %v3903_v7, %v3924_v17  ;;  %v3846_v7 = vrot.slane %v8774_v4, 4 }
 0x665   : > { %v3916_v54 = vrot.slane %v3907_v22, 4  ;;  %v3917_v58 = vrot.slane %v3909_v11, 4 }
 0x667   : > { %v3927_v27 = vsel %vm378_vm1, %v3916_v54, %v3917_v58  ;;  %v3929_v53 = vsel %vm485_vm5, %v3909_v11, %v3917_v58  ;;  %v3919_v58 = vsel %vm485_vm5, %v8645_v52, %v3918_v34  ;;  %v3853_v34 = vsel %vm378_vm1, %v3844_v38, %v3845_v61 }
 0x668   : > { %v3928_v9 = vsel %vm485_vm5, %v3907_v22, %v3927_v27  ;;  %3945 = vst [vmem:[#allocation4 + $0xbc] sm:$0xf] %v3929_v53  ;;  %v8820_v10 = vpop.permute.xlu1 %4056  ;;  %v8822_v62 = vpop.permute.xlu0 %4060  ;;  %v6432_v41 = vcombine.high %v3919_v58, %v3922_v30  ;;  %v3856_v22 = vsel %vm378_vm1, %v3846_v7, %v3847_v49  ;;  %v6431_v17 = vcombine.low %v3919_v58, %v3922_v30 }
 0x669   : > { %v4067_v60 = vrot.slane %v8820_v10, 4  ;;  %v4069_v35 = vrot.slane %v8822_v62, 4  ;;  %v6435_v32 = vcombine.high %v3925_v55, %v3928_v9  ;;  %v6434_v54 = vcombine.low %v3925_v55, %v3928_v9 }
 0x66a   : > { %v3850_v55 = vsel %vm378_vm1, %v3842_v5, %v3843_v21  ;;  %v3854_v19 = vsel %vm450_vm6, %v8725_v28, %v3853_v34  ;;  %v4202_v38 = vrot.slane %v8786_v26, 4  ;;  %v3857_v49 = vsel %vm450_vm6, %v8774_v4, %v3856_v22 }
 0x66b   : > { %v4078_v27 = vsel %vm563_vm3, %v8820_v10, %v4067_v60  ;;  %v4081_v53 = vsel %vm563_vm3, %v8822_v62, %v4069_v35  ;;  %4639 = vmatprep.subr.bf16.mxu1 %v6435_v32 }
 0x66c   : > { %4095 = vst [vmem:[#allocation4 + $0x140] sm:$0xf] %v4078_v27  ;;  %4097 = vst [vmem:[#allocation4 + $0x14c] sm:$0xf] %v4081_v53  ;;  %v3839_v52 = vpop.permute.xlu1 %3838  ;;  %v3841_v9 = vpop.permute.xlu0 %3840  ;;  %4640 = vmatpush1.bf16.msra.mxu1 %v6434_v54  ;;  %v3778_v54 = vrot.slane %v8783_v8, 4  ;;  %v3851_v53 = vsel %vm450_vm6, %v8664_v40, %v3850_v55  ;;  %v3774_v40 = vrot.slane %v8685_v0, 4 }
 0x66d   : > { %v3848_v11 = vrot.slane %v3839_v52, 4  ;;  %v3849_v46 = vrot.slane %v3841_v9, 4  ;;  %4641 = vmatprep.subr.bf16.mxu1 %v6432_v41  ;;  %v3776_v41 = vrot.slane %v8734_v56, 4  ;;  %v6425_v55 = vcombine.low %v3851_v53, %v3854_v19 }
 0x66e   : > { %v3788_v34 = vsel %vm378_vm1, %v3778_v54, %v3779_v31  ;;  %v4212_v31 = vsel %vm378_vm1, %v4202_v38, %v4203_v42 }
 0x66f   : > { %v3859_v61 = vsel %vm378_vm1, %v3848_v11, %v3849_v46  ;;  %v3861_v32 = vsel %vm450_vm6, %v3841_v9, %v3849_v46  ;;  %v6426_v9 = vcombine.high %v3851_v53, %v3854_v19  ;;  %v3785_v20 = vsel %vm378_vm1, %v3776_v41, %v3777_v14 }
 0x670   : > { %v3860_v30 = vsel %vm450_vm6, %v3839_v52, %v3859_v61  ;;  %3877 = vst [vmem:[#allocation4 + $0x8c] sm:$0xf] %v3861_v32  ;;  %v3771_v29 = vpop.permute.xlu1 %3770  ;;  %v3773_v58 = vpop.permute.xlu0 %3772  ;;  %4642 = vmatpush1.bf16.msra.mxu1 %v6431_v17  ;;  %v3789_v17 = vsel %vm415_vm7, %v8783_v8, %v3788_v34  ;;  %v3782_v61 = vsel %vm378_vm1, %v3774_v40, %v3775_v25 }
 0x671   : > { %v3780_v21 = vrot.slane %v3771_v29, 4  ;;  %v3781_v7 = vrot.slane %v3773_v58, 4  ;;  %v6429_v28 = vcombine.high %v3857_v49, %v3860_v30  ;;  %v6428_v27 = vcombine.low %v3857_v49, %v3860_v30 }
 0x672   : > { %v3786_v39 = vsel %vm415_vm7, %v8734_v56, %v3785_v20  ;;  %v4213_v42 = vsel %vm633_vm9, %v8786_v26, %v4212_v31  ;;  %v3708_v56 = vrot.slane %v8751_v59, 4  ;;  %v3710_v26 = vrot.slane %v8789_v51, 4 }
 0x673   : > { %v3791_v4 = vsel %vm378_vm1, %v3780_v21, %v3781_v7  ;;  %v3793_v52 = vsel %vm415_vm7, %v3773_v58, %v3781_v7  ;;  %4643 = vmatprep.subr.bf16.mxu1 %v6429_v28  ;;  %v9608_v40 = vcombine.low %v8756_v3, %v8749_v57 }
 0x674   : > { %v3792_v5 = vsel %vm415_vm7, %v3771_v29, %v3791_v4  ;;  %3809 = vst [vmem:[#allocation4 + $0x5c] sm:$0xf] %v3793_v52  ;;  %v4195_v22 = vpop.permute.xlu1 %4194  ;;  %v8864_v11 = vpop.permute.xlu0 %4118  ;;  %4644 = vmatpush1.bf16.msra.mxu1 %v6428_v27  ;;  %v3717_v30 = vsel %vm378_vm1, %v3708_v56, %v3709_v12  ;;  %v3720_v21 = vsel %vm378_vm1, %v3710_v26, %v3711_v16  ;;  %v9607_v12 = vrot.slane %v8736_v2, 4  ;;  %v6884_v16 = vld [vmem:[#allocation4 + $0x170] ss:$12 sps:$4 sm:$0xff]  }
 0x675   : > { %v4204_v46 = vrot.slane %v4195_v22, 4  ;;  %4645 = vmatprep.subr.bf16.mxu1 %v6426_v9  ;;  %v6423_v32 = vcombine.high %v3789_v17, %v3792_v5  ;;  %v6422_v19 = vcombine.low %v3789_v17, %v3792_v5  ;;  %v9606_v27 = vcombine.high %v8756_v3, %v8749_v57  ;;  %v8919_v4 = vld [vmem:[%s9532_s2 + $0x68] ss:$12 sps:$4 sm:$0xff]  }
 0x676   : > { %v3718_v41 = vsel %vm380_vm8, %v8751_v59, %v3717_v30  ;;  %v4134_v52 = vrot.slane %v8798_v23, 4  ;;  %v3721_v2 = vsel %vm380_vm8, %v8789_v51, %v3720_v21  ;;  %v9611_v26 = vrot.slane %v8694_v18, 4  ;;  %v6889_v30 = vld [vmem:[#allocation4 + $0x140] ss:$12 sps:$4 sm:$0xff]  }
 0x677   : > { %v4215_v48 = vsel %vm378_vm1, %v4204_v46, %v4205_v44  ;;  %v3783_v44 = vsel %vm415_vm7, %v8685_v0, %v3782_v61  ;;  %v3706_v0 = vrot.slane %v8707_v13, 4  ;;  %v4132_v61 = vrot.slane %v8864_v11, 4 }
 0x678   : > { %v4216_v14 = vsel %vm633_vm9, %v4195_v22, %v4215_v48  ;;  %v8886_v54 = vpop.permute.xlu1 %4114  ;;  %v8888_v8 = vpop.permute.xlu0 %4052  ;;  %4646 = vmatpush1.bf16.msra.mxu1 %v6425_v55  ;;  %v6420_v49 = vcombine.high %v3783_v44, %v3786_v39  ;;  %v6419_v50 = vcombine.low %v3783_v44, %v3786_v39  ;;  %v6886_v55 = vld [vmem:[#allocation4 + $0xb0] ss:$12 sps:$4 sm:$0xff]  }
 0x679   : > { %v4065_v6 = vrot.slane %v8888_v8, 4  ;;  %4647 = vmatprep.subr.bf16.mxu1 %v6423_v32  ;;  %v6465_v33 = vcombine.high %v4213_v42, %v4216_v14  ;;  %v6464_v25 = vcombine.low %v4213_v42, %v4216_v14  ;;  %v3714_v53 = vsel %vm378_vm1, %v3706_v0, %v9607_v12  ;;  %v6887_v32 = vld [vmem:[#allocation4 + $0x158] ss:$12 sps:$4 sm:$0xff]   ;;  %v6890_v12 = vld [vmem:[#allocation4 + $0x80] ss:$12 sps:$4 sm:$0xff]  }
 0x67a   : > { %v4130_v9 = vrot.slane %v8886_v54, 4  ;;  %v3715_v17 = vsel %vm380_vm8, %v8707_v13, %v3714_v53  ;;  %v9609_v42 = vrot.slane %v8610_v15, 4 }
 0x67b   : > { %v4075_v38 = vsel %vm563_vm3, %v8888_v8, %v4065_v6  ;;  %4704 = vmatprep.subr.bf16.mxu0 %v6465_v33  ;;  %v6414_v3 = vcombine.high %v3715_v17, %v3718_v41  ;;  %v9610_v33 = vrot.slane %v8627_v37, 4  ;;  %v6413_v56 = vcombine.low %v3715_v17, %v3718_v41  ;;  %v8964_v37 = vld [vmem:[%s9532_s2 + $0x80] ss:$12 sps:$4 sm:$0xff]  }
 0x67c   : > { %4093 = vst [vmem:[#allocation4 + $0x134] sm:$0xf] %v4075_v38  ;;  %v3703_v29 = vpop.permute.xlu1 %3702  ;;  %v3705_v58 = vpop.permute.xlu0 %3704  ;;  %4648 = vmatpush1.bf16.msra.mxu1 %v6422_v19  ;;  %4705 = vmatpush1.bf16.msra.mxu0 %v6464_v25  ;;  %v4144_v14 = vsel %vm378_vm1, %v4134_v52, %v9609_v42  ;;  %v6888_v19 = vld [vmem:[#allocation4 + $0x98] ss:$12 sps:$4 sm:$0xff]   ;;  %v4141_v38 = vsel %vm378_vm1, %v4132_v61, %v9611_v26 }
 0x67d   : > { %v3712_v7 = vrot.slane %v3703_v29, 4  ;;  %v3713_v28 = vrot.slane %v3705_v58, 4  ;;  %4649 = vmatprep.subr.bf16.mxu1 %v6420_v49  ;;  %4706 = vmatprep.subr.bf16.mxu0 %v9606_v27  ;;  %v4138_v25 = vsel %vm378_vm1, %v4130_v9, %v9610_v33  ;;  %v9612_v49 = vrot.slane %v8666_v36, 4  ;;  %v6892_v9 = vld [vmem:[#allocation4 + $0x68] ss:$12 sps:$4 sm:$0xff]  }
 0x67f   : > { %v3723_v34 = vsel %vm378_vm1, %v3712_v7, %v3713_v28  ;;  %v3725_v24 = vsel %vm380_vm8, %v3705_v58, %v3713_v28  ;;  %v4139_v58 = vsel %vm598_vm2, %v8886_v54, %v4138_v25 }
 0x680   : > { %v3724_v5 = vsel %vm380_vm8, %v3703_v29, %v3723_v34  ;;  %3741 = vst [vmem:[#allocation4 + $0x2c] sm:$0xf] %v3725_v24  ;;  %v8926_v59 = vpop.permute.xlu1 %4048  ;;  %v8928_v22 = vpop.permute.xlu0 %3992  ;;  %4650 = vmatpush1.bf16.msra.mxu1 %v6419_v50  ;;  %4707 = vmatpush1.bf16.msra.mxu0 %v9608_v40  ;;  %v4145_v29 = vsel %vm598_vm2, %v8798_v23, %v4144_v14 }
 0x681   : > { %v4063_v20 = vrot.slane %v8926_v59, 4  ;;  %v4001_v31 = vrot.slane %v8928_v22, 4  ;;  %6649 = vmatprep.subr.bf16.mxu0 %v6884_v16  ;;  %v6417_v51 = vcombine.high %v3721_v2, %v3724_v5  ;;  %v6416_v46 = vcombine.low %v3721_v2, %v3724_v5 }
 0x682   : > { %v4142_v50 = vsel %vm598_vm2, %v8864_v11, %v4141_v38 }
 0x683   : > { %v4072_v48 = vsel %vm563_vm3, %v8926_v59, %v4063_v20  ;;  %v4013_v57 = vsel %vm528_vm4, %v8928_v22, %v4001_v31  ;;  %4651 = vmatprep.subr.bf16.mxu1 %v6417_v51  ;;  %6467 = vmatmul.mubr.msk.bf16.vlgmr.msra.gmra.mxu0 %vm2004_vm14, %v8919_v4  ;;  %v6456_v53 = vcombine.high %v4139_v58, %v4142_v50 }
 0x684   : > { %4091 = vst [vmem:[#allocation4 + $0x128] sm:$0xf] %v4072_v48  ;;  %4029 = vst [vmem:[#allocation4 + $0x11c] sm:$0xf] %v4013_v57  ;;  %v4055_v13 = vpop.permute.xlu1 %4054  ;;  %v4127_v39 = vpop.permute.xlu0 %4126  ;;  %4652 = vmatpush1.bf16.msra.mxu1 %v6416_v46  ;;  %6650 = vmatpush3.bf16.msra.mxu0 %v6886_v55  ;;  %v6455_v2 = vcombine.low %v4139_v58, %v4142_v50  ;;  %v6908_v50 = vld [vmem:[#allocation3 + $0x2c] ss:$20 sps:$4 sm:$0xff]  }
 0x685   : > { %v4136_v44 = vrot.slane %v4127_v39, 4  ;;  %4653 = vmatprep.subr.bf16.mxu1 %v6414_v3  ;;  %6651 = vmatprep.subr.bf16.mxu0 %v6887_v32  ;;  %v4066_v36 = vrot.slane %v4055_v13, 4  ;;  %v6894_v32 = vld [vmem:[#allocation4 + $0x50] ss:$12 sps:$4 sm:$0xff]  }
 0x686   : > { %4734 = vmatprep.mubr.bf16.mxu0 %v9591_v1 }
 0x687   : > { %v4147_v15 = vsel %vm378_vm1, %v4136_v44, %v9612_v49  ;;  %v4076_v11 = vsel %vm378_vm1, %v4066_v36, %v4067_v60 }
 0x688   : > { %v4148_v18 = vsel %vm598_vm2, %v4127_v39, %v4147_v15  ;;  %v8971_v0 = vpop.permute.xlu1 %3988  ;;  %v4051_v21 = vpop.permute.xlu0 %4050  ;;  %4654 = vmatpush1.bf16.msra.mxu1 %v6413_v56  ;;  %6652 = vmatpush3.bf16.msra.mxu0 %v6888_v19  ;;  %v4077_v60 = vsel %vm563_vm3, %v4055_v13, %v4076_v11  ;;  %v6915_v11 = vld [vmem:[%s9532_s2 + $0x78] ss:$12 sps:$4 sm:$0xff]  }
 0x689   : > { %v3999_v7 = vrot.slane %v8971_v0, 4  ;;  %6653 = vmatprep.subr.bf16.mxu0 %v6889_v30  ;;  %v6459_v28 = vcombine.high %v4145_v29, %v4148_v18  ;;  %v6458_v27 = vcombine.low %v4145_v29, %v4148_v18  ;;  %v4064_v23 = vrot.slane %v4051_v21, 4  ;;  %v6896_v18 = vld [vmem:[#allocation4 + $0x38] ss:$12 sps:$4 sm:$0xff]  }
 0x68b   : > { %v4010_v54 = vsel %vm528_vm4, %v8971_v0, %v3999_v7  ;;  %4655 = vmatprep.subr.bf16.mxu1 %v6459_v28  ;;  %v6891_v41 = vld [vmem:[#allocation4 + $0x128] ss:$12 sps:$4 sm:$0xff]   ;;  %6468 = vmatmul.mubr.msk.bf16.gmra.mxu0 %vm2004_vm14, %v8964_v37  ;;  %v4073_v5 = vsel %vm378_vm1, %v4064_v23, %v4065_v6  ;;  %v6897_v0 = vld [vmem:[#allocation4 + $0xe0] ss:$12 sps:$4 sm:$0xff]  }
 0x68c   : > { %4027 = vst [vmem:[#allocation4 + $0x110] sm:$0xf] %v4010_v54  ;;  %v4047_v34 = vpop.permute.xlu1 %4046  ;;  %v4059_v24 = vpop.permute.xlu0 %4058  ;;  %4656 = vmatpush2.bf16.msra.mxu1 %v6458_v27  ;;  %6654 = vmatpush3.bf16.msra.mxu0 %v6890_v12  ;;  %v6899_v28 = vld [vmem:[#allocation4 + $0x20] ss:$12 sps:$4 sm:$0xff]   ;;  %v6900_v27 = vld [vmem:[#allocation4 + $0xc8] ss:$12 sps:$4 sm:$0xff]  }
 0x68d   : > { %v4062_v16 = vrot.slane %v4047_v34, 4  ;;  %v4068_v52 = vrot.slane %v4059_v24, 4  ;;  %4657 = vmatprep.subr.bf16.mxu1 %v6456_v53  ;;  %6655 = vmatprep.subr.bf16.mxu0 %v6891_v41  ;;  %v6909_v23 = vld [vmem:[#allocation3 + $0x8] ss:$20 sps:$4 sm:$0xff]   ;;  %v6901_v12 = vld [vmem:[#allocation4 + $0x8] ss:$12 sps:$4 sm:$0xff]  }
 0x68e   : > { %4777 = vmatprep.mubr.bf16.mxu0 %v8672_v63  ;;  %v6904_v54 = vld [vmem:[#allocation4 + $0x1a0] ss:$12 sps:$4 sm:$0xff]   ;;  %v6912_v41 = vld [vmem:[#allocation3 + $0x4] ss:$20 sps:$4 sm:$0xff]  }
 0x68f   : > { %v4070_v40 = vsel %vm378_vm1, %v4062_v16, %v4063_v20  ;;  %v4079_v10 = vsel %vm378_vm1, %v4068_v52, %v4069_v35  ;;  %v4074_v20 = vsel %vm563_vm3, %v4051_v21, %v4073_v5  ;;  %v6905_v53 = vld [vmem:[%s9532_s2 + $0x60] ss:$12 sps:$4 sm:$0xff]  }
 0x690   : > { %v4071_v51 = vsel %vm563_vm3, %v4047_v34, %v4070_v40  ;;  %v4080_v46 = vsel %vm563_vm3, %v4059_v24, %v4079_v10  ;;  %v3981_v17 = vpop.permute.xlu1 %3980  ;;  %v3985_v63 = vpop.permute.xlu0 %3984  ;;  %4658 = vmatpush2.bf16.msra.mxu1 %v6455_v2  ;;  %6656 = vmatpush3.bf16.msra.mxu0 %v6892_v9  ;;  %v6913_v34 = vld [vmem:[%s9532_s2 + $0x7c] ss:$12 sps:$4 sm:$0xff]  }
 0x691   : > { %v3995_v8 = vrot.slane %v3981_v17, 4  ;;  %v3997_v6 = vrot.slane %v3985_v63, 4  ;;  %v6453_v55 = vcombine.high %v4077_v60, %v4080_v46  ;;  %v6452_v59 = vcombine.low %v4077_v60, %v4080_v46  ;;  %v6911_v24 = vld [vmem:[#allocation4 + $0x188] ss:$12 sps:$4 sm:$0xff]  }
 0x692   : > { %v6450_v48 = vcombine.high %v4071_v51, %v4074_v20  ;;  %v6449_v42 = vcombine.low %v4071_v51, %v4074_v20 }
 0x693   : > { %v4004_v62 = vsel %vm528_vm4, %v3981_v17, %v3995_v8  ;;  %v4007_v35 = vsel %vm528_vm4, %v3985_v63, %v3997_v6  ;;  %v6893_v61 = vld [vmem:[#allocation4 + $0x110] ss:$12 sps:$4 sm:$0xff]   ;;  %4659 = vmatprep.subr.bf16.mxu1 %v6453_v55 }
 0x694   : > { %4023 = vst [vmem:[#allocation4 + $0xf8] sm:$0xf] %v4004_v62  ;;  %4025 = vst [vmem:[#allocation4 + $0x104] sm:$0xf] %v4007_v35  ;;  %v3987_v57 = vpop.permute.xlu1 %3986  ;;  %v3991_v3 = vpop.permute.xlu0 %3990  ;;  %4660 = vmatpush2.bf16.msra.mxu1 %v6452_v59  ;;  %6657 = vmatprep.subr.bf16.mxu0 %v6893_v61 }
 0x695   : > { %v3998_v13 = vrot.slane %v3987_v57, 4  ;;  %v4000_v39 = vrot.slane %v3991_v3, 4  ;;  %4661 = vmatprep.subr.bf16.mxu1 %v6450_v48  ;;  %6658 = vmatpush3.bf16.msra.mxu0 %v6894_v32 }
 0x697   : > { %v4008_v14 = vsel %vm378_vm1, %v3998_v13, %v3999_v7  ;;  %v4011_v33 = vsel %vm378_vm1, %v4000_v39, %v4001_v31  ;;  %v6902_v7 = vld [vmem:[#allocation3 + $0x30] ss:$20 sps:$4 sm:$0xff]  }
 0x698   : > { %v4009_v25 = vsel %vm528_vm4, %v3987_v57, %v4008_v14  ;;  %v4012_v44 = vsel %vm528_vm4, %v3991_v3, %v4011_v33  ;;  %v3979_v56 = vpop.permute.xlu1 %3978  ;;  %v3983_v19 = vpop.permute.xlu0 %3982  ;;  %4662 = vmatpush2.bf16.msra.mxu1 %v6449_v42 }
 0x699   : > { %v3994_v26 = vrot.slane %v3979_v56, 4  ;;  %v3996_v38 = vrot.slane %v3983_v19, 4  ;;  %v6447_v49 = vcombine.high %v4009_v25, %v4012_v44  ;;  %v6446_v15 = vcombine.low %v4009_v25, %v4012_v44 }
 0x69b   : > { %v4002_v30 = vsel %vm378_vm1, %v3994_v26, %v3995_v8  ;;  %v4005_v29 = vsel %vm378_vm1, %v3996_v38, %v3997_v6  ;;  %v6895_v58 = vld [vmem:[#allocation4 + $0xf8] ss:$12 sps:$4 sm:$0xff]   ;;  %4663 = vmatprep.subr.bf16.mxu1 %v6447_v49 }
 0x69c   : > { %v4003_v22 = vsel %vm528_vm4, %v3979_v56, %v4002_v30  ;;  %v4006_v31 = vsel %vm528_vm4, %v3983_v19, %v4005_v29  ;;  %4664 = vmatpush2.bf16.msra.mxu1 %v6446_v15  ;;  %6659 = vmatprep.subr.bf16.mxu0 %v6895_v58 }
 0x69d   : > { %v6444_v21 = vcombine.high %v4003_v22, %v4006_v31  ;;  %v6443_v36 = vcombine.low %v4003_v22, %v4006_v31  ;;  %6660 = vmatpush3.bf16.msra.mxu0 %v6896_v18 }
 0x69e   : > { %6661 = vmatprep.subr.bf16.mxu0 %v6897_v0 }
 0x69f   : > { %4665 = vmatprep.subr.bf16.mxu1 %v6444_v21 }
 0x6a0   : > { %4666 = vmatpush2.bf16.msra.mxu1 %v6443_v36 }
 0x6a1   : > { %4667 = vmatprep.subr.bf16.mxu1 %v6902_v7  ;;  %6662 = vmatpush3.bf16.msra.mxu0 %v6899_v28 }
 0x6a2   : > { %6663 = vmatprep.subr.bf16.mxu0 %v6900_v27 }
 0x6a4   : > { %4668 = vmatpush2.bf16.msra.mxu1 %v6908_v50 }
 0x6a5   : > { %4669 = vmatprep.subr.bf16.mxu1 %v6909_v23  ;;  %6664 = vmatpush3.bf16.msra.mxu0 %v6901_v12  ;;  %v9023_v40 = vpop.permute.xlu1 %4860  ;;  %v9025_v60 = vpop.permute.xlu0 %4865 }
 0x6a6   : > { %6722 = vmatprep.subr.bf16.mxu0 %v6904_v54 }
 0x6a8   : > { %4670 = vmatpush2.bf16.msra.mxu1 %v6912_v41  ;;  %4778 = vmatmul.mubr.bf16.vlgmr.msra.gmra.mxu0 %v6905_v53 }
 0x6a9   : > { %6723 = vmatpush3.bf16.msra.mxu0 %v6904_v54  ;;  %4785 = vmatprep.mubr.bf16.mxu0 %v6913_v34  ;;  %v9027_v51 = vpop.permute.xlu1 %4897 }
 0x6aa   : > { %6724 = vmatprep.subr.bf16.mxu0 %v6911_v24 }
 0x6ab   : > { %4672 = vmatmul.mubr.bf16.vlgmr.msra.gmra.mxu1 %v6905_v53 }
 0x6ac   : > { %4681 = vmatprep.mubr.bf16.mxu1 %v6913_v34 }
 0x6ad   : > { %6725 = vmatpush3.bf16.msra.mxu0 %v6911_v24  ;;  %v9031_v63 = vpop.permute.xlu1 %4850 }
 0x6b0   : > { %4786 = vmatmul.mubr.bf16.gmra.mxu0 %v6915_v11 }
 0x6b1   : > { %6726 = vmatprep.mubr.msk.bf16.mxu0 %vm2004_vm14, %v8919_v4  ;;  %v9029_v4 = vpop.permute.xlu0 %4902  ;;  %v9035_v62 = vpop.permute.xlu1 %4887 }
 0x6b3   : > { %4682 = vmatmul.mubr.bf16.gmra.mxu1 %v6915_v11 }
 0x6b5   : > { %v9033_v6 = vpop.permute.xlu0 %4855 }
 0x6b8   : > { %6727 = vmatmul.mubr.msk.bf16.vlgmr.msra.gmra.mxu0 %vm2004_vm14, %v8964_v37 }
 0x6b9   : > { %5997 = vmatprep.mubr.bf16.mxu0 %v9591_v1  ;;  %v9040_v14 = vpop.permute.xlu0 %4892 }
 0x743   : > { %v4726_v16 = vpop.f32.mrf.mxu0 }
 0x745   : > { %v4728_v52 = vpop.f32.mrf.mxu0 }
 0x747   : > { %v4730_v2 = vpop.f32.mrf.mxu0 }
 0x749   : > { %v4732_v9 = vpop.f32.mrf.mxu0 }
 0x74b   : > { %v4736_v5 = vpop.f32.mrf.mxu0 }
 0x74d   : > { %v4738_v10 = vpop.f32.mrf.mxu0 }
 0x74f   : > { %v4740_v46 = vpop.f32.mrf.mxu0 }
 0x751   : > { %v4742_v17 = vpop.f32.mrf.mxu0 }
 0x768   : > { %v6665_v37 = vpop.f32.mrf.mxu0 }
 0x76a   : > { %v6666_v1 = vpop.f32.mrf.mxu0 }
 0x76b   : > { %v4673_v8 = vpop.f32.mrf.mxu1  ;;  %v6667_v54 = vadd.f32 %v6666_v1, %v6665_v37 }
 0x76c   : > { %v4727_v55 = vadd.f32 %v4726_v16, %v4673_v8  ;;  %v6668_v59 = vpop.f32.mrf.mxu0 }
 0x76d   : > { %v4675_v20 = vpop.f32.mrf.mxu1 }
 0x76e   : > { %v4868_v35 = vmul.f32 %v9031_v63, %v4727_v55  ;;  %v4729_v61 = vadd.f32 %v4728_v52, %v4675_v20  ;;  %v6669_v48 = vpop.f32.mrf.mxu0 }
 0x76f   : > { %v4677_v57 = vpop.f32.mrf.mxu1 }
 0x770   : > { %v4905_v3 = vadd.f32 %v9035_v62, %v4868_v35  ;;  %v4869_v32 = vmul.f32 %v9031_v63, %v4729_v61  ;;  %v4731_v13 = vadd.f32 %v4730_v2, %v4677_v57  ;;  %v6671_v39 = vpop.f32.mrf.mxu0  ;;  %v6670_v35 = vadd.f32 %v6669_v48, %v6668_v59 }
 0x771   : > { %v4679_v42 = vpop.f32.mrf.mxu1 }
 0x772   : > { %v4917_v33 = vmax.f32 %v4905_v3, 0.0  ;;  %v4906_v25 = vadd.f32 %v9035_v62, %v4869_v32  ;;  %v4871_v44 = vmul.f32 %v9033_v6, %v4731_v13  ;;  %v4733_v56 = vadd.f32 %v4732_v9, %v4679_v42  ;;  %v6672_v19 = vpop.f32.mrf.mxu0 }
 0x773   : > { %v4683_v26 = vpop.f32.mrf.mxu1  ;;  %v6673_v50 = vadd.f32 %v6672_v19, %v6671_v39 }
 0x774   : > { %v4918_v38 = vmax.f32 %v4906_v25, 0.0  ;;  %v4908_v49 = vadd.f32 %v9040_v14, %v4871_v44  ;;  %v6674_v15 = vpop.f32.mrf.mxu0  ;;  %v4872_v30 = vmul.f32 %v9033_v6, %v4733_v56  ;;  %v4737_v29 = vadd.f32 %v4736_v5, %v4683_v26 }
 0x775   : > { %v4685_v58 = vpop.f32.mrf.mxu1  ;;  %v4929_v22 = vsel %vm983_vm11, %v4917_v33, 0.0 }
 0x776   : > { %v4930_v31 = vsel %vm984_vm12, %v4918_v38, 0.0  ;;  %v4739_v18 = vadd.f32 %v4738_v10, %v4685_v58  ;;  %v4920_v21 = vmax.f32 %v4908_v49, 0.0  ;;  %v4909_v36 = vadd.f32 %v9040_v14, %v4872_v30  ;;  %v6675_v7 = vpop.f32.mrf.mxu0 }
 0x777   : > { %v9050_v0 = vpack.c.bf16 %v4930_v31, %v4929_v22  ;;  %v4874_v28 = vmul.f32 %v9023_v40, %v4737_v29  ;;  %v4687_v27 = vpop.f32.mrf.mxu1  ;;  %v6676_v10 = vadd.f32 %v6675_v7, %v6674_v15 }
 0x778   : > { %v4875_v23 = vmul.f32 %v9023_v40, %v4739_v18  ;;  %v4741_v12 = vadd.f32 %v4740_v46, %v4687_v27  ;;  %v4921_v53 = vmax.f32 %v4909_v36, 0.0  ;;  %v6728_v34 = vpop.f32.mrf.mxu0  ;;  %v4932_v9 = vsel %vm983_vm11, %v4920_v21, 0.0 }
 0x779   : > { %4981 = vst [vmem:[#allocation2 + $0x4] sm:$0xff] %v9050_v0  ;;  %v4911_v41 = vadd.f32 %v9027_v51, %v4874_v28  ;;  %v4689_v24 = vpop.f32.mrf.mxu1  ;;  %v4837_v11 = vadd.f32 %v6728_v34, %v6673_v50 }
 0x77a   : > { %v4912_v16 = vadd.f32 %v9027_v51, %v4875_v23  ;;  %v4877_v52 = vmul.f32 %v9025_v60, %v4741_v12  ;;  %v4743_v2 = vadd.f32 %v4742_v17, %v4689_v24  ;;  %v4933_v5 = vsel %vm984_vm12, %v4921_v53, 0.0  ;;  %v4828_v37 = vpop.f32.mrf.mxu0 }
 0x77b   : > { %v4923_v46 = vmax.f32 %v4911_v41, 0.0  ;;  %v9063_v1 = vpack.c.bf16 %v4933_v5, %v4932_v9  ;;  %v4876_v8 = vmul.f32 %v9023_v40, %v4837_v11  ;;  %v4829_v20 = vadd.f32 %v6667_v54, %v4828_v37 }
 0x77c   : > { %v4924_v55 = vmax.f32 %v4912_v16, 0.0  ;;  %v4914_v17 = vadd.f32 %v9029_v4, %v4877_v52  ;;  %v6729_v57 = vpop.f32.mrf.mxu0  ;;  %v4878_v3 = vmul.f32 %v9025_v60, %v4743_v2 }
 0x77d   : > { %v4935_v61 = vsel %vm983_vm11, %v4923_v46, 0.0  ;;  %4983 = vst [vmem:[#allocation2 + $0x18] sm:$0xff] %v9063_v1  ;;  %v4913_v32 = vadd.f32 %v9027_v51, %v4876_v8  ;;  %v4870_v40 = vmul.f32 %v9031_v63, %v4829_v20  ;;  %v4840_v39 = vadd.f32 %v6729_v57, %v6676_v10 }
 0x77e   : > { %v4936_v13 = vsel %vm984_vm12, %v4924_v55, 0.0  ;;  %v4926_v59 = vmax.f32 %v4914_v17, 0.0  ;;  %v4915_v48 = vadd.f32 %v9029_v4, %v4878_v3  ;;  %v4831_v33 = vpop.f32.mrf.mxu0 }
 0x77f   : > { %v9075_v42 = vpack.c.bf16 %v4936_v13, %v4935_v61  ;;  %v4925_v25 = vmax.f32 %v4913_v32, 0.0  ;;  %v4907_v44 = vadd.f32 %v9035_v62, %v4870_v40  ;;  %v4879_v56 = vmul.f32 %v9025_v60, %v4840_v39 }
 0x780   : > { %v4832_v19 = vadd.f32 %v6670_v35, %v4831_v33  ;;  %v9080_v26 = vld [vmem:[#allocation2 + $0x4] sm:$0xff]  ;;  %v4927_v51 = vmax.f32 %v4915_v48, 0.0  ;;  %v4938_v60 = vsel %vm983_vm11, %v4926_v59, 0.0 }
 0x781   : > { %4985 = vst [vmem:[#allocation2 + $0x2c] sm:$0xff] %v9075_v42  ;;  %5269 = vst [vmem:[#allocation4 + $0xc0] sm:$0xff] %v9080_v26  ;;  %v4937_v63 = vsel %vm985_vm13, %v4925_v25, 0.0  ;;  %v4919_v38 = vmax.f32 %v4907_v44, 0.0  ;;  %v4916_v49 = vadd.f32 %v9029_v4, %v4879_v56  ;;  %v5193_v52 = vld [vmem:[#allocation2] sm:$0xff] }
 0x782   : > { %v4873_v15 = vmul.f32 %v9033_v6, %v4832_v19  ;;  %v6582_v30 = vpack.c.bf16 %v4937_v63, %v4937_v63  ;;  %v4939_v62 = vsel %vm984_vm12, %v4927_v51, 0.0 }
 0x783   : > { %v4931_v29 = vsel %vm985_vm13, %v4919_v38, 0.0  ;;  %v4928_v58 = vmax.f32 %v4916_v49, 0.0  ;;  %v9094_v22 = vpack.c.bf16 %v4939_v62, %v4938_v60  ;;  %v9246_v38 = vld [vmem:[%s9533_s3] sm:$0xff] }
 0x784   : > { %v4910_v31 = vadd.f32 %v9040_v14, %v4873_v15  ;;  %4986 = vst [vmem:[#allocation2 + $0x34] sm:$0xf] %v6582_v30  ;;  %v6578_v18 = vpack.c.bf16 %v4931_v29, %v4931_v29  ;;  %v9097_v4 = vld [vmem:[#allocation2 + $0x18] sm:$0xff] }
 0x785   : > { %v4940_v6 = vsel %vm985_vm13, %v4928_v58, 0.0  ;;  %4987 = vst [vmem:[#allocation2 + $0x40] sm:$0xff] %v9094_v22  ;;  %5271 = vst [vmem:[#allocation4 + $0xcc] sm:$0xff] %v9097_v4  ;;  %v6514_v36 = vcombine.low %v9080_v26, %v9097_v4  ;;  %v6515_v7 = vcombine.high %v9080_v26, %v9097_v4  ;;  %v5195_v10 = vld [vmem:[#allocation2 + $0x14] sm:$0xff] }
 0x786   : > { %v4922_v21 = vmax.f32 %v4910_v31, 0.0  ;;  %4982 = vst [vmem:[#allocation2 + $0xc] sm:$0xf] %v6578_v18  ;;  %v6584_v14 = vpack.c.bf16 %v4940_v6, %v4940_v6 }
 0x788   : > { %v4934_v28 = vsel %vm985_vm13, %v4922_v21, 0.0  ;;  %v9109_v27 = vld [vmem:[#allocation2 + $0x2c] sm:$0xff]  ;;  %4988 = vst [vmem:[#allocation2 + $0x48] sm:$0xf] %v6584_v14 }
 0x789   : > { %v6580_v50 = vpack.c.bf16 %v4934_v28, %v4934_v28  ;;  %5273 = vst [vmem:[#allocation4 + $0xd8] sm:$0xff] %v9109_v27  ;;  %v5197_v37 = vld [vmem:[#allocation2 + $0x28] sm:$0xff] }
 0x78b   : > { %4984 = vst [vmem:[#allocation2 + $0x20] sm:$0xf] %v6580_v50  ;;  %v9112_v23 = vld [vmem:[#allocation2 + $0x34] sm:$0xff] }
 0x78c   : > { %v5266_v12 = vld [vmem:[#allocation2 + $0x34] sm:$0xf]  ;;  %5507 = vrot.lane.b32.xlu0 %v9112_v23, %s9594_s11  ;;  %5439 = vrot.lane.b32.xlu1 %v9112_v23, %s9595_s8  ;;  %v9118_v54 = vld [vmem:[#allocation2 + $0x40] sm:$0xff] }
 0x78d   : > { %5274 = vst [vmem:[#allocation4 + $0xe0] sm:$0xf] %v5266_v12  ;;  %5275 = vst [vmem:[#allocation4 + $0xe4] sm:$0xff] %v9118_v54  ;;  %v6517_v53 = vcombine.low %v9109_v27, %v9118_v54  ;;  %v6518_v41 = vcombine.high %v9109_v27, %v9118_v54  ;;  %v5262_v34 = vld [vmem:[#allocation2 + $0xc] sm:$0xf]  ;;  %v5198_v8 = vld [vmem:[#allocation2 + $0x30] sm:$0xff] }
 0x78e   : > { %5270 = vst [vmem:[#allocation4 + $0xc8] sm:$0xf] %v5262_v34  ;;  %v9125_v24 = vld [vmem:[#allocation2 + $0xc] sm:$0xff]  ;;  %v5199_v20 = vld [vmem:[#allocation2 + $0x3c] sm:$0xff] }
 0x78f   : > { %v5268_v11 = vld [vmem:[#allocation2 + $0x48] sm:$0xf] }
 0x790   : > { %5499 = vrot.lane.b32.xlu0 %v9125_v24, %s9594_s11  ;;  %5431 = vrot.lane.b32.xlu1 %v9125_v24, %s9595_s8  ;;  %5276 = vst [vmem:[#allocation4 + $0xec] sm:$0xf] %v5268_v11  ;;  %v5488_v2 = vld [vmem:[#allocation2 + $0x48] sm:$0xff] }
 0x791   : > { %v5194_v5 = vld [vmem:[#allocation2 + $0x8] sm:$0xff] }
 0x792   : > { %v5264_v16 = vld [vmem:[#allocation2 + $0x20] sm:$0xf]  ;;  %v5200_v55 = vld [vmem:[#allocation2 + $0x44] sm:$0xff] }
 0x793   : > { %5272 = vst [vmem:[#allocation4 + $0xd4] sm:$0xf] %v5264_v16  ;;  %v5484_v9 = vld [vmem:[#allocation2 + $0x20] sm:$0xff] }
 0x794   : > { %5209 = vrot.lane.b32.xlu1 %v5193_v52, %s9596_s18  ;;  %5511 = vrot.lane.b32.xlu0 %v5488_v2, %s9594_s11  ;;  %v5196_v46 = vld [vmem:[#allocation2 + $0x1c] sm:$0xff] }
 0x798   : > { %5141 = vrot.lane.b32.xlu1 %v5193_v52, %s9597_s23  ;;  %5443 = vrot.lane.b32.xlu0 %v5488_v2, %s9595_s8 }
 0x79c   : > { %5073 = vrot.lane.b32.xlu1 %v5193_v52, %s9598_s17  ;;  %5503 = vrot.lane.b32.xlu0 %v5484_v9, %s9594_s11 }
 0x7a0   : > { %5497 = vrot.lane.b32.xlu1 %v9050_v0, %s9594_s11  ;;  %5435 = vrot.lane.b32.xlu0 %v5484_v9, %s9595_s8 }
 0x7a4   : > { %5005 = vrot.lane.b32.xlu1 %v5193_v52, %s9584_s22  ;;  %5211 = vrot.lane.b32.xlu0 %v5194_v5, %s9596_s18 }
 0x7a8   : > { %5143 = vrot.lane.b32.xlu0 %v5194_v5, %s9597_s23  ;;  %5213 = vrot.lane.b32.xlu1 %v5195_v10, %s9596_s18 }
 0x7ac   : > { %5075 = vrot.lane.b32.xlu0 %v5194_v5, %s9598_s17  ;;  %5145 = vrot.lane.b32.xlu1 %v5195_v10, %s9597_s23 }
 0x7b0   : > { %5007 = vrot.lane.b32.xlu0 %v5194_v5, %s9584_s22  ;;  %5077 = vrot.lane.b32.xlu1 %v5195_v10, %s9598_s17 }
 0x7b4   : > { %5215 = vrot.lane.b32.xlu0 %v5196_v46, %s9596_s18  ;;  %5501 = vrot.lane.b32.xlu1 %v9063_v1, %s9594_s11 }
 0x7b8   : > { %5147 = vrot.lane.b32.xlu0 %v5196_v46, %s9597_s23  ;;  %5009 = vrot.lane.b32.xlu1 %v5195_v10, %s9584_s22 }
 0x7bc   : > { %5079 = vrot.lane.b32.xlu0 %v5196_v46, %s9598_s17  ;;  %5217 = vrot.lane.b32.xlu1 %v5197_v37, %s9596_s18 }
 0x7c0   : > { %5011 = vrot.lane.b32.xlu0 %v5196_v46, %s9584_s22  ;;  %5149 = vrot.lane.b32.xlu1 %v5197_v37, %s9597_s23 }
 0x7c4   : > { %5219 = vrot.lane.b32.xlu0 %v5198_v8, %s9596_s18  ;;  %5081 = vrot.lane.b32.xlu1 %v5197_v37, %s9598_s17 }
 0x7c8   : > { %5151 = vrot.lane.b32.xlu0 %v5198_v8, %s9597_s23  ;;  %5505 = vrot.lane.b32.xlu1 %v9075_v42, %s9594_s11 }
 0x7cc   : > { %5083 = vrot.lane.b32.xlu0 %v5198_v8, %s9598_s17  ;;  %5013 = vrot.lane.b32.xlu1 %v5197_v37, %s9584_s22 }
 0x7d0   : > { %5015 = vrot.lane.b32.xlu0 %v5198_v8, %s9584_s22  ;;  %5437 = vrot.lane.b32.xlu1 %v9075_v42, %s9595_s8 }
 0x7d4   : > { %5223 = vrot.lane.b32.xlu0 %v5200_v55, %s9596_s18  ;;  %5221 = vrot.lane.b32.xlu1 %v5199_v20, %s9596_s18  ;;  %s6116_s18 = sshll.u32 %s7195_s20, 4  ;;  %s6117_s18 = int_to_ptr.vmem [resolvable:$true] %s6116_s18 }
 0x7d5   : > { %s6971_s1 = scalar_lea.vmem %s6117_s18, 192 }
 0x7d6   : > { %p6972_p12 = scmp.ne.s32.totalorder %s6117_s18, %s6971_s1 }
 0x7d8   : > { %5433 = vrot.lane.b32.xlu0 %v9063_v1, %s9595_s8  ;;  %5429 = vrot.lane.b32.xlu1 %v9050_v0, %s9595_s8  ;;  %p6973_p4 = pnand %p6972_p12, %p9613_p13 }
 0x7da   : > { %p6974_p5 = pneg %p6973_p4 }
 0x7dc   : > { %5155 = vrot.lane.b32.xlu0 %v5200_v55, %s9597_s23  ;;  %5153 = vrot.lane.b32.xlu1 %v5199_v20, %s9597_s23 }
 0x7e0   : > { %5375 = vrot.lane.b32.xlu0 %v5488_v2, %s9585_s29  ;;  %5371 = vrot.lane.b32.xlu1 %v9112_v23, %s9585_s29 }
 0x7e4   : > { %5087 = vrot.lane.b32.xlu0 %v5200_v55, %s9598_s17  ;;  %5085 = vrot.lane.b32.xlu1 %v5199_v20, %s9598_s17 }
 0x7e8   : > { %5367 = vrot.lane.b32.xlu0 %v5484_v9, %s9585_s29  ;;  %5509 = vrot.lane.b32.xlu1 %v9094_v22, %s9594_s11 }
 0x7ec   : > { %5019 = vrot.lane.b32.xlu0 %v5200_v55, %s9584_s22  ;;  %5017 = vrot.lane.b32.xlu1 %v5199_v20, %s9584_s22 }
 0x7f0   : > { %5365 = vrot.lane.b32.xlu0 %v9063_v1, %s9585_s29  ;;  %5369 = vrot.lane.b32.xlu1 %v9075_v42, %s9585_s29 }
 0x7f4   : > { %5441 = vrot.lane.b32.xlu0 %v9094_v22, %s9595_s8  ;;  %5363 = vrot.lane.b32.xlu1 %v9125_v24, %s9585_s29  ;;  %s6742_s8 = smul.u32 192, %s7114_s28  ;;  %s7052_s28 = smov [#allocation8]  }
 0x7f6   : > { %s9492_s0 = scalar_lea.hbm %s9537_s7, %s6742_s8 }
 0x7f8   : > { %5307 = vrot.lane.b32.xlu0 %v5488_v2, %s9586_s9  ;;  %5361 = vrot.lane.b32.xlu1 %v9050_v0, %s9585_s29 }
 0x7fc   : > { %5373 = vrot.lane.b32.xlu0 %v9094_v22, %s9585_s29  ;;  %5303 = vrot.lane.b32.xlu1 %v9112_v23, %s9586_s9 }
 0x7fe   : > { %v9200_v35 = vpop.permute.xlu1 %5439  ;;  %v9202_v61 = vpop.permute.xlu0 %5507 }
 0x7ff   : > { %v5450_v17 = vrot.slane %v9200_v35, 4  ;;  %v5518_v57 = vrot.slane %v9202_v61, 4 }
 0x800   : > { %5299 = vrot.lane.b32.xlu0 %v5484_v9, %s9586_s9  ;;  %5301 = vrot.lane.b32.xlu1 %v9075_v42, %s9586_s9 }
 0x801   : > { %v5461_v3 = vsel %vm598_vm2, %v9200_v35, %v5450_v17  ;;  %v5529_v32 = vsel %vm633_vm9, %v9202_v61, %v5518_v57 }
 0x802   : > { %5478 = vst [vmem:[#allocation4 + $0x170] sm:$0xf] %v5461_v3  ;;  %5546 = vst [vmem:[#allocation4 + $0x1a0] sm:$0xf] %v5529_v32  ;;  %v9217_v13 = vpop.permute.xlu1 %5431  ;;  %v5500_v40 = vpop.permute.xlu0 %5499 }
 0x803   : > { %v5446_v39 = vrot.slane %v9217_v13, 4  ;;  %v5514_v59 = vrot.slane %v5500_v40, 4 }
 0x804   : > { %5305 = vrot.lane.b32.xlu0 %v9094_v22, %s9586_s9  ;;  %5295 = vrot.lane.b32.xlu1 %v9125_v24, %s9586_s9 }
 0x805   : > { %v5455_v42 = vsel %vm598_vm2, %v9217_v13, %v5446_v39  ;;  %v5523_v48 = vsel %vm633_vm9, %v5500_v40, %v5514_v59 }
 0x806   : > { %5474 = vst [vmem:[#allocation4 + $0x158] sm:$0xf] %v5455_v42  ;;  %5542 = vst [vmem:[#allocation4 + $0x188] sm:$0xf] %v5523_v48  ;;  %v5210_v33 = vpop.permute.xlu1 %5209  ;;  %v9229_v25 = vpop.permute.xlu0 %5511 }
 0x807   : > { %v5520_v44 = vrot.slane %v9229_v25, 4  ;;  %v5225_v28 = vrot.slane %v5210_v33, 4 }
 0x808   : > { %5297 = vrot.lane.b32.xlu0 %v9063_v1, %s9586_s9  ;;  %5293 = vrot.lane.b32.xlu1 %v9050_v0, %s9586_s9  ;;  %v9254_v1 = vcombine.high %v9246_v38, %v9246_v38 }
 0x809   : > { %v5532_v56 = vsel %vm633_vm9, %v9229_v25, %v5520_v44 }
 0x80a   : > { %5548 = vst [vmem:[#allocation4 + $0x1ac] sm:$0xf] %v5532_v56  ;;  %v5142_v19 = vpop.permute.xlu1 %5141  ;;  %v9240_v51 = vpop.permute.xlu0 %5443  ;;  %5956 = vmatprep.mubr.bf16.mxu1 %v9254_v1 }
 0x80b   : > { %v5452_v63 = vrot.slane %v9240_v51, 4  ;;  %v5157_v16 = vrot.slane %v5142_v19, 4 }
 0x80d   : > { %v5464_v0 = vsel %vm598_vm2, %v9240_v51, %v5452_v63 }
 0x80e   : > { %5480 = vst [vmem:[#allocation4 + $0x17c] sm:$0xf] %v5464_v0  ;;  %v5074_v49 = vpop.permute.xlu1 %5073  ;;  %v5504_v15 = vpop.permute.xlu0 %5503 }
 0x80f   : > { %v5516_v30 = vrot.slane %v5504_v15, 4  ;;  %v5089_v37 = vrot.slane %v5074_v49, 4 }
 0x811   : > { %v5526_v60 = vsel %vm633_vm9, %v5504_v15, %v5516_v30  ;;  %v6939_v27 = vld [vmem:[#allocation4 + $0x1a0] ss:$12 sps:$4 sm:$0xff]  }
 0x812   : > { %5544 = vst [vmem:[#allocation4 + $0x194] sm:$0xf] %v5526_v60  ;;  %v5498_v62 = vpop.permute.xlu1 %5497  ;;  %v9258_v29 = vpop.permute.xlu0 %5435 }
 0x813   : > { %v5513_v58 = vrot.slane %v5498_v62, 4  ;;  %v5448_v22 = vrot.slane %v9258_v29, 4 }
 0x815   : > { %v5521_v31 = vsel %vm378_vm1, %v5513_v58, %v5514_v59  ;;  %v5458_v18 = vsel %vm598_vm2, %v9258_v29, %v5448_v22 }
 0x816   : > { %v9267_v6 = vsel %vm633_vm9, %v5498_v62, %v5521_v31  ;;  %5476 = vst [vmem:[#allocation4 + $0x164] sm:$0xf] %v5458_v18  ;;  %v5006_v21 = vpop.permute.xlu1 %5005  ;;  %v5212_v14 = vpop.permute.xlu0 %5211 }
 0x817   : > { %v5226_v50 = vrot.slane %v5212_v14, 4  ;;  %v5021_v59 = vrot.slane %v5006_v21, 4 }
 0x819   : > { %v5233_v23 = vsel %vm378_vm1, %v5225_v28, %v5226_v50  ;;  %v5235_v12 = vsel %vm485_vm5, %v5212_v14, %v5226_v50 }
 0x81a   : > { %v9272_v34 = vsel %vm485_vm5, %v5210_v33, %v5233_v23  ;;  %5254 = vst [vmem:[#allocation4 + $0x98] sm:$0xf] %v5235_v12  ;;  %v5214_v24 = vpop.permute.xlu1 %5213  ;;  %v5144_v11 = vpop.permute.xlu0 %5143 }
 0x81b   : > { %v5158_v52 = vrot.slane %v5144_v11, 4  ;;  %v5227_v15 = vrot.slane %v5214_v24, 4 }
 0x81d   : > { %v5165_v2 = vsel %vm378_vm1, %v5157_v16, %v5158_v52  ;;  %v5167_v9 = vsel %vm450_vm6, %v5144_v11, %v5158_v52 }
 0x81e   : > { %v9277_v5 = vsel %vm450_vm6, %v5142_v19, %v5165_v2  ;;  %5186 = vst [vmem:[#allocation4 + $0x68] sm:$0xf] %v5167_v9  ;;  %v5146_v10 = vpop.permute.xlu1 %5145  ;;  %v5076_v46 = vpop.permute.xlu0 %5075 }
 0x81f   : > { %v5090_v8 = vrot.slane %v5076_v46, 4  ;;  %v5159_v50 = vrot.slane %v5146_v10, 4 }
 0x821   : > { %v5097_v55 = vsel %vm378_vm1, %v5089_v37, %v5090_v8  ;;  %v5099_v20 = vsel %vm415_vm7, %v5076_v46, %v5090_v8 }
 0x822   : > { %v9282_v3 = vsel %vm415_vm7, %v5074_v49, %v5097_v55  ;;  %5118 = vst [vmem:[#allocation4 + $0x38] sm:$0xf] %v5099_v20  ;;  %v5078_v32 = vpop.permute.xlu1 %5077  ;;  %v5008_v40 = vpop.permute.xlu0 %5007 }
 0x823   : > { %v5022_v42 = vrot.slane %v5008_v40, 4  ;;  %v5091_v2 = vrot.slane %v5078_v32, 4 }
 0x825   : > { %v5029_v48 = vsel %vm378_vm1, %v5021_v59, %v5022_v42  ;;  %v5031_v33 = vsel %vm380_vm8, %v5008_v40, %v5022_v42 }
 0x826   : > { %v9287_v56 = vsel %vm380_vm8, %v5006_v21, %v5029_v48  ;;  %5050 = vst [vmem:[#allocation4 + $0x8] sm:$0xf] %v5031_v33  ;;  %v5502_v19 = vpop.permute.xlu1 %5501  ;;  %v5216_v0 = vpop.permute.xlu0 %5215 }
 0x827   : > { %v5515_v60 = vrot.slane %v5502_v19, 4  ;;  %v5228_v62 = vrot.slane %v5216_v0, 4 }
 0x829   : > { %v5524_v49 = vsel %vm378_vm1, %v5515_v60, %v5516_v30  ;;  %v5236_v58 = vsel %vm378_vm1, %v5227_v15, %v5228_v62  ;;  %v5238_v31 = vsel %vm485_vm5, %v5216_v0, %v5228_v62 }
 0x82a   : > { %v9293_v18 = vsel %vm633_vm9, %v5502_v19, %v5524_v49  ;;  %v9296_v14 = vsel %vm485_vm5, %v5214_v24, %v5236_v58  ;;  %5256 = vst [vmem:[#allocation4 + $0xa4] sm:$0xf] %v5238_v31  ;;  %v5010_v21 = vpop.permute.xlu1 %5009  ;;  %v5148_v28 = vpop.permute.xlu0 %5147 }
 0x82b   : > { %v5160_v23 = vrot.slane %v5148_v28, 4  ;;  %v5023_v20 = vrot.slane %v5010_v21, 4 }
 0x82d   : > { %v5168_v12 = vsel %vm378_vm1, %v5159_v50, %v5160_v23  ;;  %v5170_v11 = vsel %vm450_vm6, %v5148_v28, %v5160_v23 }
 0x82e   : > { %v9301_v30 = vsel %vm450_vm6, %v5146_v10, %v5168_v12  ;;  %5188 = vst [vmem:[#allocation4 + $0x74] sm:$0xf] %v5170_v11  ;;  %v5218_v16 = vpop.permute.xlu1 %5217  ;;  %v5080_v52 = vpop.permute.xlu0 %5079 }
 0x82f   : > { %v5092_v9 = vrot.slane %v5080_v52, 4  ;;  %v5229_v19 = vrot.slane %v5218_v16, 4 }
 0x831   : > { %v5100_v24 = vsel %vm378_vm1, %v5091_v2, %v5092_v9  ;;  %v5102_v46 = vsel %vm415_vm7, %v5080_v52, %v5092_v9 }
 0x832   : > { %v9306_v37 = vsel %vm415_vm7, %v5078_v32, %v5100_v24  ;;  %5120 = vst [vmem:[#allocation4 + $0x44] sm:$0xf] %v5102_v46  ;;  %v5150_v8 = vpop.permute.xlu1 %5149  ;;  %v5012_v55 = vpop.permute.xlu0 %5011 }
 0x833   : > { %v5024_v40 = vrot.slane %v5012_v55, 4  ;;  %v5161_v58 = vrot.slane %v5150_v8, 4 }
 0x835   : > { %v5032_v10 = vsel %vm378_vm1, %v5023_v20, %v5024_v40  ;;  %v5034_v59 = vsel %vm380_vm8, %v5012_v55, %v5024_v40 }
 0x836   : > { %v9311_v42 = vsel %vm380_vm8, %v5010_v21, %v5032_v10  ;;  %5052 = vst [vmem:[#allocation4 + $0x14] sm:$0xf] %v5034_v59  ;;  %v5082_v48 = vpop.permute.xlu1 %5081  ;;  %v5220_v33 = vpop.permute.xlu0 %5219 }
 0x837   : > { %v5230_v0 = vrot.slane %v5220_v33, 4  ;;  %v5093_v2 = vrot.slane %v5082_v48, 4 }
 0x839   : > { %v5239_v32 = vsel %vm378_vm1, %v5229_v19, %v5230_v0  ;;  %v5241_v15 = vsel %vm485_vm5, %v5220_v33, %v5230_v0 }
 0x83a   : > { %v5240_v60 = vsel %vm485_vm5, %v5218_v16, %v5239_v32  ;;  %5258 = vst [vmem:[#allocation4 + $0xb0] sm:$0xf] %v5241_v15  ;;  %v5506_v62 = vpop.permute.xlu1 %5505  ;;  %v5152_v49 = vpop.permute.xlu0 %5151 }
 0x83b   : > { %v5517_v31 = vrot.slane %v5506_v62, 4  ;;  %v5162_v28 = vrot.slane %v5152_v49, 4 }
 0x83d   : > { %v5527_v21 = vsel %vm378_vm1, %v5517_v31, %v5518_v57  ;;  %v5171_v50 = vsel %vm378_vm1, %v5161_v58, %v5162_v28  ;;  %v5173_v23 = vsel %vm450_vm6, %v5152_v49, %v5162_v28 }
 0x83e   : > { %v9322_v12 = vsel %vm633_vm9, %v5506_v62, %v5527_v21  ;;  %v9325_v11 = vsel %vm450_vm6, %v5150_v8, %v5171_v50  ;;  %5190 = vst [vmem:[#allocation4 + $0x80] sm:$0xf] %v5173_v23  ;;  %v5014_v16 = vpop.permute.xlu1 %5013  ;;  %v5084_v52 = vpop.permute.xlu0 %5083 }
 0x83f   : > { %v5094_v9 = vrot.slane %v5084_v52, 4  ;;  %v5025_v20 = vrot.slane %v5014_v16, 4 }
 0x841   : > { %v5103_v24 = vsel %vm378_vm1, %v5093_v2, %v5094_v9  ;;  %v5105_v61 = vsel %vm415_vm7, %v5084_v52, %v5094_v9  ;;  %v6509_v2 = vcombine.high %v9272_v34, %v9296_v14 }
 0x842   : > { %v9330_v57 = vsel %vm415_vm7, %v5082_v48, %v5103_v24  ;;  %5122 = vst [vmem:[#allocation4 + $0x50] sm:$0xf] %v5105_v61  ;;  %v5438_v46 = vpop.permute.xlu1 %5437  ;;  %v5016_v55 = vpop.permute.xlu0 %5015 }
 0x843   : > { %v5449_v40 = vrot.slane %v5438_v46, 4  ;;  %v5026_v10 = vrot.slane %v5016_v55, 4 }
 0x845   : > { %v5459_v8 = vsel %vm378_vm1, %v5449_v40, %v5450_v17  ;;  %v5035_v59 = vsel %vm378_vm1, %v5025_v20, %v5026_v10  ;;  %v5037_v33 = vsel %vm380_vm8, %v5016_v55, %v5026_v10 }
 0x846   : > { %v9338_v19 = vsel %vm598_vm2, %v5438_v46, %v5459_v8  ;;  %v9341_v48 = vsel %vm380_vm8, %v5014_v16, %v5035_v59  ;;  %5054 = vst [vmem:[#allocation4 + $0x20] sm:$0xf] %v5037_v33  ;;  %v5222_v0 = vpop.permute.xlu1 %5221  ;;  %v5224_v32 = vpop.permute.xlu0 %5223 }
 0x847   : > { %v5231_v15 = vrot.slane %v5222_v0, 4  ;;  %v5232_v62 = vrot.slane %v5224_v32, 4 }
 0x849   : > { %v5242_v49 = vsel %vm378_vm1, %v5231_v15, %v5232_v62  ;;  %v5244_v35 = vsel %vm485_vm5, %v5224_v32, %v5232_v62 }
 0x84a   : > { %v5243_v17 = vsel %vm485_vm5, %v5222_v0, %v5242_v49  ;;  %5260 = vst [vmem:[#allocation4 + $0xbc] sm:$0xf] %v5244_v35  ;;  %v5430_v58 = vpop.permute.xlu1 %5429  ;;  %v5434_v31 = vpop.permute.xlu0 %5433  ;;  %v6503_v0 = vcombine.high %v9277_v5, %v9301_v30 }
 0x84b   : > { %v5445_v28 = vrot.slane %v5430_v58, 4  ;;  %v5447_v21 = vrot.slane %v5434_v31, 4  ;;  %v6511_v50 = vcombine.low %v5240_v60, %v5243_v17  ;;  %v6512_v23 = vcombine.high %v5240_v60, %v5243_v17 }
 0x84d   : > { %v5453_v16 = vsel %vm378_vm1, %v5445_v28, %v5446_v39  ;;  %v5456_v52 = vsel %vm378_vm1, %v5447_v21, %v5448_v22  ;;  %5924 = vmatprep.subr.bf16.mxu1 %v6512_v23  ;;  %v6508_v39 = vcombine.low %v9272_v34, %v9296_v14 }
 0x84e   : > { %v9355_v9 = vsel %vm598_vm2, %v5430_v58, %v5453_v16  ;;  %v9358_v24 = vsel %vm598_vm2, %v5434_v31, %v5456_v52  ;;  %v5154_v61 = vpop.permute.xlu1 %5153  ;;  %v5156_v60 = vpop.permute.xlu0 %5155  ;;  %5925 = vmatpush1.bf16.msra.mxu1 %v6511_v50  ;;  %v6497_v52 = vcombine.high %v9282_v3, %v9306_v37 }
 0x84f   : > { %v5163_v13 = vrot.slane %v5154_v61, 4  ;;  %v5164_v46 = vrot.slane %v5156_v60, 4  ;;  %5926 = vmatprep.subr.bf16.mxu1 %v6509_v2 }
 0x851   : > { %v5174_v29 = vsel %vm378_vm1, %v5163_v13, %v5164_v46  ;;  %v5176_v22 = vsel %vm450_vm6, %v5156_v60, %v5164_v46 }
 0x852   : > { %v5175_v55 = vsel %vm450_vm6, %v5154_v61, %v5174_v29  ;;  %5192 = vst [vmem:[#allocation4 + $0x8c] sm:$0xf] %v5176_v22  ;;  %v9365_v20 = vpop.permute.xlu1 %5371  ;;  %v9367_v40 = vpop.permute.xlu0 %5375  ;;  %5927 = vmatpush1.bf16.msra.mxu1 %v6508_v39  ;;  %v6539_v22 = vcombine.high %v9267_v6, %v9293_v18 }
 0x853   : > { %v5382_v10 = vrot.slane %v9365_v20, 4  ;;  %v5384_v8 = vrot.slane %v9367_v40, 4  ;;  %v6505_v59 = vcombine.low %v9325_v11, %v5175_v55  ;;  %v6506_v34 = vcombine.high %v9325_v11, %v5175_v55 }
 0x854   : > { %v6502_v11 = vcombine.low %v9277_v5, %v9301_v30 }
 0x855   : > { %v5393_v14 = vsel %vm563_vm3, %v9365_v20, %v5382_v10  ;;  %v5396_v33 = vsel %vm563_vm3, %v9367_v40, %v5384_v8  ;;  %5928 = vmatprep.subr.bf16.mxu1 %v6506_v34 }
 0x856   : > { %5410 = vst [vmem:[#allocation4 + $0x140] sm:$0xf] %v5393_v14  ;;  %5412 = vst [vmem:[#allocation4 + $0x14c] sm:$0xf] %v5396_v33  ;;  %v5086_v32 = vpop.permute.xlu1 %5085  ;;  %v5088_v15 = vpop.permute.xlu0 %5087  ;;  %5929 = vmatpush1.bf16.msra.mxu1 %v6505_v59  ;;  %v6538_v14 = vcombine.low %v9267_v6, %v9293_v18 }
 0x857   : > { %v5095_v62 = vrot.slane %v5086_v32, 4  ;;  %v5096_v49 = vrot.slane %v5088_v15, 4  ;;  %5930 = vmatprep.subr.bf16.mxu1 %v6503_v0 }
 0x859   : > { %v5106_v35 = vsel %vm378_vm1, %v5095_v62, %v5096_v49  ;;  %v5108_v17 = vsel %vm415_vm7, %v5088_v15, %v5096_v49  ;;  %v6916_v15 = vld [vmem:[#allocation4 + $0x170] ss:$12 sps:$4 sm:$0xff]   ;;  %v9415_v62 = vld [vmem:[%s9533_s3 + $0x8] ss:$0 sps:$4 sm:$0xff]  }
 0x85a   : > { %v5107_v58 = vsel %vm415_vm7, %v5086_v32, %v5106_v35  ;;  %5124 = vst [vmem:[#allocation4 + $0x5c] sm:$0xf] %v5108_v17  ;;  %v5510_v31 = vpop.permute.xlu1 %5509  ;;  %v5368_v28 = vpop.permute.xlu0 %5367  ;;  %5931 = vmatpush1.bf16.msra.mxu1 %v6502_v11  ;;  %v6491_v32 = vcombine.high %v9287_v56, %v9311_v42  ;;  %v6490_v35 = vcombine.low %v9287_v56, %v9311_v42  ;;  %v6918_v17 = vld [vmem:[#allocation4 + $0xb0] ss:$12 sps:$4 sm:$0xff]  }
 0x85b   : > { %v5519_v21 = vrot.slane %v5510_v31, 4  ;;  %v5380_v50 = vrot.slane %v5368_v28, 4  ;;  %v6499_v23 = vcombine.low %v9330_v57, %v5107_v58  ;;  %v6500_v16 = vcombine.high %v9330_v57, %v5107_v58 }
 0x85d   : > { %v5530_v5 = vsel %vm378_vm1, %v5519_v21, %v5520_v44  ;;  %v5390_v30 = vsel %vm563_vm3, %v5368_v28, %v5380_v50  ;;  %5932 = vmatprep.subr.bf16.mxu1 %v6500_v16  ;;  %v6496_v44 = vcombine.low %v9282_v3, %v9306_v37  ;;  %v6919_v28 = vld [vmem:[#allocation4 + $0x158] ss:$12 sps:$4 sm:$0xff]  }
 0x85e   : > { %v5531_v2 = vsel %vm633_vm9, %v5510_v31, %v5530_v5  ;;  %5408 = vst [vmem:[#allocation4 + $0x134] sm:$0xf] %v5390_v30  ;;  %v5018_v61 = vpop.permute.xlu1 %5017  ;;  %v5020_v60 = vpop.permute.xlu0 %5019  ;;  %5933 = vmatpush1.bf16.msra.mxu1 %v6499_v23 }
 0x85f   : > { %v5027_v13 = vrot.slane %v5018_v61, 4  ;;  %v5028_v46 = vrot.slane %v5020_v60, 4  ;;  %5934 = vmatprep.subr.bf16.mxu1 %v6497_v52  ;;  %v6541_v57 = vcombine.low %v9322_v12, %v5531_v2  ;;  %v6542_v25 = vcombine.high %v9322_v12, %v5531_v2  ;;  %v6921_v2 = vld [vmem:[#allocation4 + $0x140] ss:$12 sps:$4 sm:$0xff]  }
 0x860   : > { %v6533_v52 = vcombine.high %v9355_v9, %v9358_v24 }
 0x861   : > { %v5038_v39 = vsel %vm378_vm1, %v5027_v13, %v5028_v46  ;;  %v5040_v29 = vsel %vm380_vm8, %v5020_v60, %v5028_v46  ;;  %5977 = vmatprep.subr.bf16.mxu0 %v6542_v25 }
 0x862   : > { %v5039_v55 = vsel %vm380_vm8, %v5018_v61, %v5038_v39  ;;  %5056 = vst [vmem:[#allocation4 + $0x2c] sm:$0xf] %v5040_v29  ;;  %v5370_v20 = vpop.permute.xlu1 %5369  ;;  %v5366_v59 = vpop.permute.xlu0 %5365  ;;  %5935 = vmatpush1.bf16.msra.mxu1 %v6496_v44  ;;  %5978 = vmatpush1.bf16.msra.mxu0 %v6541_v57  ;;  %v6922_v57 = vld [vmem:[#allocation4 + $0x80] ss:$12 sps:$4 sm:$0xff]  }
 0x863   : > { %v5381_v34 = vrot.slane %v5370_v20, 4  ;;  %v5379_v12 = vrot.slane %v5366_v59, 4  ;;  %5979 = vmatprep.subr.bf16.mxu0 %v6539_v22  ;;  %v6493_v3 = vcombine.low %v9341_v48, %v5039_v55  ;;  %v6494_v37 = vcombine.high %v9341_v48, %v5039_v55 }
 0x865   : > { %v5391_v33 = vsel %vm378_vm1, %v5381_v34, %v5382_v10  ;;  %v5388_v0 = vsel %vm378_vm1, %v5379_v12, %v5380_v50  ;;  %5936 = vmatprep.subr.bf16.mxu1 %v6494_v37  ;;  %v6924_v34 = vld [vmem:[#allocation4 + $0x68] ss:$12 sps:$4 sm:$0xff]  }
 0x866   : > { %v9418_v49 = vsel %vm563_vm3, %v5370_v20, %v5391_v33  ;;  %v9421_v48 = vsel %vm563_vm3, %v5366_v59, %v5388_v0  ;;  %v5364_v6 = vpop.permute.xlu1 %5363  ;;  %v5442_v18 = vpop.permute.xlu0 %5441  ;;  %5937 = vmatpush1.bf16.msra.mxu1 %v6493_v3  ;;  %5980 = vmatpush1.bf16.msra.mxu0 %v6538_v14 }
 0x867   : > { %v5378_v10 = vrot.slane %v5364_v6, 4  ;;  %v5451_v11 = vrot.slane %v5442_v18, 4  ;;  %5938 = vmatprep.subr.bf16.mxu1 %v6491_v32  ;;  %6681 = vmatprep.subr.bf16.mxu0 %v6916_v15 }
 0x869   : > { %v5387_v58 = vsel %vm563_vm3, %v5364_v6, %v5378_v10  ;;  %v5462_v31 = vsel %vm378_vm1, %v5451_v11, %v5452_v63  ;;  %6544 = vmatmul.mubr.msk.bf16.vlgmr.msra.gmra.mxu0 %vm2004_vm14, %v9415_v62  ;;  %v6920_v63 = vld [vmem:[#allocation4 + $0x98] ss:$12 sps:$4 sm:$0xff]  }
 0x86a   : > { %5406 = vst [vmem:[#allocation4 + $0x128] sm:$0xf] %v5387_v58  ;;  %v5463_v21 = vsel %vm598_vm2, %v5442_v18, %v5462_v31  ;;  %v5362_v50 = vpop.permute.xlu1 %5361  ;;  %v5308_v23 = vpop.permute.xlu0 %5307  ;;  %5939 = vmatpush1.bf16.msra.mxu1 %v6490_v35  ;;  %6682 = vmatpush3.bf16.msra.mxu0 %v6918_v17  ;;  %v6926_v35 = vld [vmem:[#allocation4 + $0x50] ss:$12 sps:$4 sm:$0xff]  }
 0x86b   : > { %v5377_v16 = vrot.slane %v5362_v50, 4  ;;  %v5316_v56 = vrot.slane %v5308_v23, 4  ;;  %6683 = vmatprep.subr.bf16.mxu0 %v6919_v28  ;;  %v6535_v42 = vcombine.low %v9338_v19, %v5463_v21  ;;  %v6536_v51 = vcombine.high %v9338_v19, %v5463_v21  ;;  %6038 = vmatprep.mubr.bf16.mxu0 %v9254_v1 }
 0x86c   : > { %v6532_v1 = vcombine.low %v9355_v9, %v9358_v24 }
 0x86d   : > { %v5385_v5 = vsel %vm378_vm1, %v5377_v16, %v5378_v10  ;;  %v5328_v30 = vsel %vm528_vm4, %v5308_v23, %v5316_v56  ;;  %5940 = vmatprep.subr.bf16.mxu1 %v6536_v51  ;;  %v6928_v51 = vld [vmem:[#allocation4 + $0x38] ss:$12 sps:$4 sm:$0xff]  }
 0x86e   : > { %v5386_v61 = vsel %vm563_vm3, %v5362_v50, %v5385_v5  ;;  %5344 = vst [vmem:[#allocation4 + $0x11c] sm:$0xf] %v5328_v30  ;;  %v5304_v60 = vpop.permute.xlu1 %5303  ;;  %v5374_v13 = vpop.permute.xlu0 %5373  ;;  %5941 = vmatpush2.bf16.msra.mxu1 %v6535_v42  ;;  %6684 = vmatpush3.bf16.msra.mxu0 %v6920_v63  ;;  %v6929_v63 = vld [vmem:[#allocation4 + $0xe0] ss:$12 sps:$4 sm:$0xff]   ;;  %v6933_v30 = vld [vmem:[#allocation4 + $0xc8] ss:$12 sps:$4 sm:$0xff]  }
 0x86f   : > { %v5314_v19 = vrot.slane %v5304_v60, 4  ;;  %v5383_v46 = vrot.slane %v5374_v13, 4  ;;  %5942 = vmatprep.subr.bf16.mxu1 %v6533_v52  ;;  %6685 = vmatprep.subr.bf16.mxu0 %v6921_v2  ;;  %v6527_v12 = vcombine.high %v5386_v61, %v9421_v48  ;;  %v6526_v32 = vcombine.low %v5386_v61, %v9421_v48  ;;  %v6930_v5 = vld [vmem:[#allocation4 + $0x20] ss:$12 sps:$4 sm:$0xff]   ;;  %v6934_v2 = vld [vmem:[#allocation4 + $0x8] ss:$12 sps:$4 sm:$0xff]  }
 0x870   : > { %v6487_v52 = vcombine.low %v9246_v38, %v9246_v38 }
 0x871   : > { %v5325_v25 = vsel %vm528_vm4, %v5304_v60, %v5314_v19  ;;  %v5394_v44 = vsel %vm378_vm1, %v5383_v46, %v5384_v8  ;;  %v6923_v39 = vld [vmem:[#allocation4 + $0x128] ss:$12 sps:$4 sm:$0xff]  }
 0x872   : > { %5342 = vst [vmem:[#allocation4 + $0x110] sm:$0xf] %v5325_v25  ;;  %v5395_v29 = vsel %vm563_vm3, %v5374_v13, %v5394_v44  ;;  %v5302_v22 = vpop.permute.xlu1 %5301  ;;  %v5300_v55 = vpop.permute.xlu0 %5299  ;;  %5943 = vmatpush2.bf16.msra.mxu1 %v6532_v1  ;;  %6686 = vmatpush3.bf16.msra.mxu0 %v6922_v57  ;;  %v6090_v1 = vld [vmem:[%s7188_s14 + $0x8] sm:$0xff] }
 0x873   : > { %v5313_v20 = vrot.slane %v5302_v22, 4  ;;  %v5312_v59 = vrot.slane %v5300_v55, 4  ;;  %6687 = vmatprep.subr.bf16.mxu0 %v6923_v39  ;;  %v6529_v9 = vcombine.low %v9418_v49, %v5395_v29  ;;  %v6530_v24 = vcombine.high %v9418_v49, %v5395_v29 }
 0x875   : > { %v5323_v40 = vsel %vm378_vm1, %v5313_v20, %v5314_v19  ;;  %v5322_v8 = vsel %vm528_vm4, %v5300_v55, %v5312_v59  ;;  %5944 = vmatprep.subr.bf16.mxu1 %v6530_v24  ;;  %v6089_v19 = vld [vmem:[%s7188_s14] sm:$0xff]  ;;  %v6091_v24 = vld [vmem:[%s7188_s14 + $0x10] sm:$0xff]  ;;  %s6975_s14 = sshll.u32 %s7052_s28, 4  ;;  %s6976_s14 = int_to_ptr.vmem [resolvable:$false] %s6975_s14 }
 0x876   : > { %v5324_v3 = vsel %vm528_vm4, %v5302_v22, %v5323_v40  ;;  %5340 = vst [vmem:[#allocation4 + $0x104] sm:$0xf] %v5322_v8  ;;  %v5296_v37 = vpop.permute.xlu1 %5295  ;;  %v5306_v14 = vpop.permute.xlu0 %5305  ;;  %5945 = vmatpush2.bf16.msra.mxu1 %v6529_v9  ;;  %6688 = vmatpush3.bf16.msra.mxu0 %v6924_v34  ;;  %s6977_s6 = scalar_lea.vmem %s6976_s14, 384  ;;  %p6978_p7 = scmp.lt.s32.totalorder %s6117_s18, %s6976_s14 }
 0x877   : > { %v5310_v33 = vrot.slane %v5296_v37, 4  ;;  %v5315_v0 = vrot.slane %v5306_v14, 4  ;;  %5946 = vmatprep.subr.bf16.mxu1 %v6527_v12  ;;  %p6979_p8 = scmp.lt.s32.totalorder %s6977_s6, %s6971_s1 }
 0x879   : > { %v5319_v15 = vsel %vm528_vm4, %v5296_v37, %v5310_v33  ;;  %v5326_v49 = vsel %vm378_vm1, %v5315_v0, %v5316_v56  ;;  %v6925_v6 = vld [vmem:[#allocation4 + $0x110] ss:$12 sps:$4 sm:$0xff]   ;;  %p6980_p10 = por %p6979_p8, %p6978_p7 }
 0x87a   : > { %5338 = vst [vmem:[#allocation4 + $0xf8] sm:$0xf] %v5319_v15  ;;  %v5327_v18 = vsel %vm528_vm4, %v5306_v14, %v5326_v49  ;;  %v5294_v10 = vpop.permute.xlu1 %5293  ;;  %v5298_v11 = vpop.permute.xlu0 %5297  ;;  %5947 = vmatpush2.bf16.msra.mxu1 %v6526_v32  ;;  %6689 = vmatprep.subr.bf16.mxu0 %v6925_v6 }
 0x87b   : > { %v5309_v17 = vrot.slane %v5294_v10, 4  ;;  %v5311_v58 = vrot.slane %v5298_v11, 4  ;;  %v6523_v31 = vcombine.low %v5324_v3, %v5327_v18  ;;  %v6524_v28 = vcombine.high %v5324_v3, %v5327_v18  ;;  %6690 = vmatpush3.bf16.msra.mxu0 %v6926_v35  ;;  %p6981_p0 = pnand %p6980_p10, %p6974_p5 }
 0x87d   : > { %v5317_v48 = vsel %vm378_vm1, %v5309_v17, %v5310_v33  ;;  %v5320_v21 = vsel %vm378_vm1, %v5311_v58, %v5312_v59  ;;  %5948 = vmatprep.subr.bf16.mxu1 %v6524_v28 }
 0x87e   : > { %v5318_v50 = vsel %vm528_vm4, %v5294_v10, %v5317_v48  ;;  %v5321_v23 = vsel %vm528_vm4, %v5298_v11, %v5320_v21  ;;  %5949 = vmatpush2.bf16.msra.mxu1 %v6523_v31 }
 0x87f   : > { %v6520_v16 = vcombine.low %v5318_v50, %v5321_v23  ;;  %v6521_v56 = vcombine.high %v5318_v50, %v5321_v23 }
 0x881   : > { %v6927_v42 = vld [vmem:[#allocation4 + $0xf8] ss:$12 sps:$4 sm:$0xff]   ;;  %5950 = vmatprep.subr.bf16.mxu1 %v6521_v56 }
 0x882   : > { %5951 = vmatpush2.bf16.msra.mxu1 %v6520_v16  ;;  %6691 = vmatprep.subr.bf16.mxu0 %v6927_v42 }
 0x883   : > { %5952 = vmatprep.subr.bf16.mxu1 %v6518_v41  ;;  %6692 = vmatpush3.bf16.msra.mxu0 %v6928_v51  ;;  %v7050_v41 = vmov 0.0  }
 0x884   : > { %6693 = vmatprep.subr.bf16.mxu0 %v6929_v63 }
 0x886   : > { %5953 = vmatpush2.bf16.msra.mxu1 %v6517_v53 }
 0x887   : > { %5954 = vmatprep.subr.bf16.mxu1 %v6515_v7  ;;  %6694 = vmatpush3.bf16.msra.mxu0 %v6930_v5  ;;  %v6940_v7 = vld [vmem:[#allocation4 + $0x188] ss:$12 sps:$4 sm:$0xff]  }
 0x888   : > { %6695 = vmatprep.subr.bf16.mxu0 %v6933_v30 }
 0x88a   : > { %5955 = vmatpush2.bf16.msra.mxu1 %v6514_v36 }
 0x88b   : > { %6696 = vmatpush3.bf16.msra.mxu0 %v6934_v2 }
 0x88c   : > { %6730 = vmatprep.subr.bf16.mxu0 %v7050_v41 }
 0x88d   : > { %5957 = vmatmul.mubr.bf16.vlgmr.msra.gmra.mxu1 %v6487_v52 }
 0x88e   : > { %6039 = vmatmul.mubr.bf16.vlgmr.msra.gmra.mxu0 %v6487_v52 }
 0x88f   : > { %6731 = vmatpush3.bf16.msra.mxu0 %v6939_v27  ;;  %6734 = vmatprep.mubr.msk.bf16.mxu0 %vm7051_vm15, %v7050_v41 }
 0x890   : > { %6732 = vmatprep.subr.bf16.mxu0 %v7050_v41 }
 0x893   : > { %6733 = vmatpush3.bf16.msra.mxu0 %v6940_v7 }
 0x896   : > { %6735 = vmatmul.mubr.msk.bf16.vlgmr.msra.gmra.mxu0 %vm2004_vm14, %v9415_v62 }
 0x929   : > { %v5999_v54 = vpop.f32.mrf.mxu0 }
 0x92b   : > { %v6001_v26 = vpop.f32.mrf.mxu0 }
 0x92d   : > { %v6003_v4 = vpop.f32.mrf.mxu0 }
 0x92f   : > { %v6004_v36 = vpop.f32.mrf.mxu0 }
 0x94d   : > { %v5958_v53 = vpop.f32.mrf.mxu1 }
 0x94e   : > { %v6000_v38 = vadd.f32 %v5999_v54, %v5958_v53  ;;  %v6697_v61 = vpop.f32.mrf.mxu0 }
 0x94f   : > { %v5960_v60 = vpop.f32.mrf.mxu1 }
 0x950   : > { %v6086_v13 = vsel %vm983_vm11, %v6000_v38, 0.0  ;;  %v6002_v46 = vadd.f32 %v6001_v26, %v5960_v60  ;;  %v6698_v57 = vpop.f32.mrf.mxu0 }
 0x951   : > { %v5962_v62 = vpop.f32.mrf.mxu1  ;;  %v6092_v44 = vsub.f32 %v6089_v19, %v6086_v13  ;;  %v6699_v43 = vadd.f32 %v6698_v57, %v6697_v61 }
 0x952   : > { %v6087_v25 = vsel %vm984_vm12, %v6002_v46, 0.0  ;;  %v6700_v29 = vpop.f32.mrf.mxu0 }
 0x953   : > { %v6093_v39 = vsub.f32 %v6090_v1, %v6087_v25  ;;  %v5963_v22 = vpop.f32.mrf.mxu1 }
 0x954   : > { %v6701_v20 = vpop.f32.mrf.mxu0 }
 0x955   : > { %v6097_v55 = vcombine.low %v6092_v44, %v6093_v39 }
 0x956   : > { %v6080_v59 = vpop.f32.mrf.mxu0 }
 0x957   : > { %6099 = vst [vmem:[%s7195_s20] sm:$0xff] %v6097_v55  ;;  %v6081_v9 = vadd.f32 %v6699_v43, %v6080_v59 }
 0x958   : > { %v6736_v34 = vpop.f32.mrf.mxu0 }
 0x959   : > { %v6088_v45 = vsel %vm985_vm13, %v6081_v9, 0.0 }
 0x95a   : > { %v6094_v40 = vsub.f32 %v6091_v24, %v6088_v45  ;;  %v6083_v8 = vpop.f32.mrf.mxu0 }
 0x95c   : > { %6100 = vst [vmem:[%s7195_s20 + $0x8] sm:$0xf] %v6094_v40  ;;  %v6737_v12 = vpop.f32.mrf.mxu0 }
 0x95d   : > { %6984 = shalt.err (!%p6981_p0)
}
 0x95e   : > { %s6985_s20 = scalar_lea.hbm %s9492_s0, 192  ;;  %s6989_s16 = scalar_lea.hbm %s9537_s7, 384 }
 0x95f   : > { %p6986_p2 = scmp.ne.s32.totalorder %s9492_s0, %s6985_s20  ;;  %p6990_p3 = scmp.lt.s32.totalorder %s9492_s0, %s9537_s7 }
 0x960   : > { %p6991_p6 = scmp.lt.s32.totalorder %s6989_s16, %s6985_s20 }
 0x961   : > { %p6987_p9 = pnand %p6986_p2, %p9613_p13 }
 0x962   : > { %p6992_p11 = por %p6991_p6, %p6990_p3 }
 0x963   : > { %p6988_p1 = pneg %p6987_p9 }
 0x965   : > { %p6993_p12 = pnand %p6992_p11, %p6988_p1 }
 0x967   : > { %6996 = shalt.err (!%p6993_p12)
}
 0x968   : > { %6745 = dma.vmem_to_hbm [thread:$0]  (%p9613_p13), %s6117_s18, 192, %s9492_s0, %s6102_s21  }
 0x969 PF: > { %s6128_s9 = sand.u32 1, %s7023_s24   ;;  %p9614_p4 = scmp.ne.s32.totalorder %s9578_s13, 0 }
 0x96a   : > { %p9615_p5 = scmp.ge.s32.totalorder %s7035_s27, 2  ;;  %s6129_s11 = scalar_lea.sflag [#allocation7], %s6128_s9 }
 0x96c   : > { %p6752_p7 = pnand %p9615_p5, %p9614_p4 }
 0x96e   : > { %p6753_p8 = pneg %p6752_p7 }
 0x970   : > { %7018 = dma.done.wait (%p6753_p8), %s6129_s11, 192  }
 0x971   : > { %7020 = vsyncadd (%p6753_p8), %s6129_s11, 4294967104  ;;  %p20_p10 = scmp.ge.s32.totalorder %s7118_s30, 4   ;;  %s9616_s24 = smov %s7027_s25 }
 0x972   : > { %s9617_s25 = smov %s7031_s26  ;;  %s9618_s26 = smov %s7130_s10 }
 0x973   : > { %s9619_s27 = smov %s7118_s30  ;;  %22 = sbr.rel (!%p20_p10) target bundleno = 9 (0x9), region = 103 }
 0x978   :  { %6134 = vsyncpa [#allocation6], 1 }
 0x979   :  { %6136 = vsyncpa [#allocation6 + $0x1], 1 }
 0x97a   :  { %6137 = vsyncpa [#allocation7], 1 }
 0x97b   :  { %6139 = vsyncpa [#allocation7 + $0x1], 1 }

</bundles_post_ra>
